<compile_context>
chip_gen: v7x
topology: tpu7x:2x2x1
jax: 0.10.0
libtpu: 0.0.40
codegen_flags: <defaults>
</compile_context>

<pallas_src>
import numpy as np
import jax
import jax.numpy as jnp
from jax import lax
from jax.experimental import pallas as pl
from jax.experimental.pallas import tpu as pltpu  # noqa: F401  (TPU backend)


def _l2_normalize(x, axis=-1, eps=1e-12):
    # F.normalize(x, p=2): x / max(||x||_2, eps) == x * rsqrt(max(sumsq, eps^2))
    sq = jnp.sum(x * x, axis=axis, keepdims=True)
    return x * lax.rsqrt(jnp.maximum(sq, eps * eps))


def _layer_norm(x, w, b, eps=1e-5):
    mu = jnp.mean(x, axis=-1, keepdims=True)
    xc = x - mu
    var = jnp.mean(xc * xc, axis=-1, keepdims=True)
    return xc * lax.rsqrt(var + eps) * w + b


def _latentgnn_fused_kernel(adj_ref, x_ref,
                            w_up_v2l_ref, w_up_l2v_ref,
                            w_psi_v2l_ref, w_psi_l2v_ref,
                            w_lat_ref, ln_ref, w_down_ref,
                            o_ref):
    """Whole batch in a single grid step; all operands resident in VMEM."""
    f32 = jnp.float32
    adj = adj_ref[...]                                      # (B, N, N)  original Adj
    x = x_ref[...]                                          # (B, N, Fin)
    B, N, Fin = x.shape
    C = w_up_v2l_ref.shape[1]
    D = w_psi_v2l_ref.shape[1]
    Fout = w_down_ref.shape[1]

    xf = x.reshape(B * N, Fin)                              # fold batch into M

    # ---- LatentGNN.forward: up-channel projections + L2-normalize (dim=2) ----
    v2l = _l2_normalize(jnp.dot(xf, w_up_v2l_ref[...],
                                preferred_element_type=f32))            # (B*N, C)
    l2v = _l2_normalize(jnp.dot(xf, w_up_l2v_ref[...],
                                preferred_element_type=f32))            # (B*N, C)

    # ---- LatentGNN_Kernel.forward (asymmetric, kernel_index == 0) ----
    # norm_func(Adj, dim=-1) only feeds the visible_lin_{i} loop, which is
    # empty for kernel_index=0, so it is dead code here.
    phi_v2l = jnp.maximum(jnp.dot(v2l, w_psi_v2l_ref[...],
                                  preferred_element_type=f32), 0.0)     # (B*N, D)
    phi_l2v = jnp.maximum(jnp.dot(l2v, w_psi_l2v_ref[...],
                                  preferred_element_type=f32), 0.0)     # (B*N, D)

    v2l_b = v2l.reshape(B, N, C)
    # v2l graph adjacency: (B, D, N), L2-normalized over the node axis.
    v2l_adj = _l2_normalize(jnp.swapaxes(phi_v2l.reshape(B, N, D), 1, 2))  # (B, D, N)
    # l2v graph adjacency is consumed as (l2v_adj^T)^T @ lat == l2v_adj @ lat,
    # so keep it un-transposed as (B, N, D) and normalize along the node axis
    # (identical numerics, two fewer XLU transposes on the critical chain).
    l2v_adj = _l2_normalize(phi_l2v.reshape(B, N, D), axis=1)              # (B, N, D)

    latent = jnp.einsum('bdn,bnc->bdc', v2l_adj, v2l_b,
                        preferred_element_type=f32)                        # (B, D, C)
    # affinity = latent @ latent^T without an explicit transpose.
    aff = _l2_normalize(jnp.einsum('bic,bjc->bij', latent, latent,
                                   preferred_element_type=f32))            # (B, D, D)

    # latent_lin: Linear -> LayerNorm -> ReLU (shared weight, batch folded).
    lat = jnp.dot(latent.reshape(B * D, C), w_lat_ref[...],
                  preferred_element_type=f32)                              # (B*D, C)
    lat = jnp.maximum(_layer_norm(lat, ln_ref[0:1, :], ln_ref[1:2, :]), 0.0)
    lat = jnp.tanh(jnp.einsum('bij,bjc->bic', aff, lat.reshape(B, D, C),
                              preferred_element_type=f32))                 # (B, D, C)

    # Back to visible nodes (no transpose: l2v_adj is already (N, D)).
    vis = jnp.einsum('bnd,bdc->bnc', l2v_adj, lat,
                     preferred_element_type=f32)                           # (B, N, C)
    # kernel_index == 0  ->  the visible refinement loop is empty.

    # ---- LatentGNN.forward: down-channel + bmm with the ORIGINAL Adj ----
    down = jnp.dot(vis.reshape(B * N, C), w_down_ref[...],
                   preferred_element_type=f32)                             # (B*N, Fout)
    out = jnp.einsum('bnm,bmf->bnf', adj, down.reshape(B, N, Fout),
                     preferred_element_type=f32)                           # (B, N, Fout)

    # ---- fused centering: torch's keepdim-less `out - out.mean(axis=1)` ----
    # Broadcasts a (B, Fout) mean against (B, N, Fout): element [b, n, :] gets
    # batch n's node-mean subtracted.  Only well-defined when N == B, exactly
    # mirroring the PyTorch model.
    centered = out - jnp.mean(out, axis=1)

    # Lane-dense store: (B, N*Fout) so the minor dim is a full 128-lane row.
    o_ref[...] = centered.reshape(B, N * Fout).astype(o_ref.dtype)


def latent_gnn_forward(adj, node_feature, params):
    B, N, Fin = node_feature.shape
    Fout = params["w_down"].shape[1]
    # Mirrors torch's keepdim-less mean broadcast, which requires N == B.
    assert B == N, "LatentGNN's final centering only type-checks when N == B"

    ln = jnp.concatenate([params["ln_w"].reshape(1, -1),
                          params["ln_b"].reshape(1, -1)], axis=0)   # (2, C)

    out_flat = pl.pallas_call(
        _latentgnn_fused_kernel,
        out_shape=jax.ShapeDtypeStruct((B, N * Fout), node_feature.dtype),
    )(adj, node_feature,
      params["w_up_v2l"], params["w_up_l2v"],
      params["w_psi_v2l"], params["w_psi_l2v"],
      params["w_lat"], ln, params["w_down"])

    return out_flat.reshape(B, N, Fout)


def latent_gnn_reference(adj, x, p):
    """Pure-JAX reference mirroring the PyTorch forward (for sanity checking)."""
    v2l = _l2_normalize(x @ p["w_up_v2l"])
    l2v = _l2_normalize(x @ p["w_up_l2v"])
    v2l_adj = _l2_normalize(jnp.swapaxes(jax.nn.relu(v2l @ p["w_psi_v2l"]), 1, 2))
    l2v_adj = _l2_normalize(jnp.swapaxes(jax.nn.relu(l2v @ p["w_psi_l2v"]), 1, 2))
    latent = v2l_adj @ v2l
    aff = _l2_normalize(latent @ jnp.swapaxes(latent, 1, 2))
    lat = jax.nn.relu(_layer_norm(latent @ p["w_lat"], p["ln_w"], p["ln_b"]))
    lat = jnp.tanh(aff @ lat)
    vis = jnp.swapaxes(l2v_adj, 1, 2) @ lat
    out = adj @ (vis @ p["w_down"])
    return out - jnp.mean(out, axis=1)


if __name__ == "__main__":
    # N == B so torch's keepdim-less mean broadcast is well-defined.
    B = N = 8
    FIN, MULTI, D_LAT, FOUT = 16, 4, 32, 16
    C = FIN * MULTI                      # latent_channel = in_features * channel_multi

    key = jax.random.PRNGKey(0)
    ks = jax.random.split(key, 10)
    f32 = jnp.float32
    adj = jax.random.normal(ks[0], (B, N, N), f32)
    node_feature = jax.random.normal(ks[1], (B, N, FIN), f32)

    s = 0.1
    params = {
        # Linear weights stored as (in, out); layer applies x @ W (bias=False).
        "w_up_v2l":  s * jax.random.normal(ks[2], (FIN, C), f32),
        "w_up_l2v":  s * jax.random.normal(ks[3], (FIN, C), f32),
        "w_psi_v2l": s * jax.random.normal(ks[4], (C, D_LAT), f32),
        "w_psi_l2v": s * jax.random.normal(ks[5], (C, D_LAT), f32),
        "w_lat":     s * jax.random.normal(ks[6], (C, C), f32),
        "ln_w":      1.0 + 0.05 * jax.random.normal(ks[7], (1, C), f32),
        "ln_b":      0.05 * jax.random.normal(ks[8], (1, C), f32),
        "w_down":    s * jax.random.normal(ks[9], (C, FOUT), f32),
    }

    out = jax.block_until_ready(latent_gnn_forward(adj, node_feature, params))
    ref = jax.block_until_ready(latent_gnn_reference(adj, node_feature, params))
    np.testing.assert_allclose(np.asarray(out), np.asarray(ref), rtol=5e-2, atol=5e-2)
    print("KERNEL_OK")
</pallas_src>

<mosaic_0001>
module attributes {stable_mosaic.version = 11 : i64} {
  func.func @_latentgnn_fused_kernel(%arg0: memref<8x8x8xf32, #tpu.memory_space<vmem>>, %arg1: memref<8x8x16xf32, #tpu.memory_space<vmem>>, %arg2: memref<16x64xf32, #tpu.memory_space<vmem>>, %arg3: memref<16x64xf32, #tpu.memory_space<vmem>>, %arg4: memref<64x32xf32, #tpu.memory_space<vmem>>, %arg5: memref<64x32xf32, #tpu.memory_space<vmem>>, %arg6: memref<64x64xf32, #tpu.memory_space<vmem>>, %arg7: memref<2x64xf32, #tpu.memory_space<vmem>>, %arg8: memref<64x16xf32, #tpu.memory_space<vmem>>, %arg9: memref<8x128xf32, #tpu.memory_space<vmem>>) attributes {dimension_semantics = [], scalar_prefetch = 0 : i64, scratch_operands = 0 : i64, tpu.core_type = #tpu.core_type<tc>} {
    %c0 = arith.constant 0 : index
    %c0_0 = arith.constant 0 : index
    %c0_1 = arith.constant 0 : index
    %0 = vector.load %arg0[%c0, %c0_0, %c0_1] : memref<8x8x8xf32, #tpu.memory_space<vmem>>, vector<8x8x8xf32>
    %c0_2 = arith.constant 0 : index
    %c0_3 = arith.constant 0 : index
    %c0_4 = arith.constant 0 : index
    %1 = vector.load %arg1[%c0_2, %c0_3, %c0_4] : memref<8x8x16xf32, #tpu.memory_space<vmem>>, vector<8x8x16xf32>
    %2 = vector.shape_cast %1 : vector<8x8x16xf32> to vector<64x16xf32>
    %c0_5 = arith.constant 0 : index
    %c0_6 = arith.constant 0 : index
    %3 = vector.load %arg2[%c0_5, %c0_6] : memref<16x64xf32, #tpu.memory_space<vmem>>, vector<16x64xf32>
    %cst = arith.constant dense<0.000000e+00> : vector<64x64xf32>
    %4 = tpu.matmul %2, %3, %cst {dimension_numbers = #tpu.dot_dimension_numbers<[1], [0], [0], [1], [0, 0, 1, 1], [], []>} : vector<64x16xf32>, vector<16x64xf32>, vector<64x64xf32> -> vector<64x64xf32>
    %5 = arith.mulf %4, %4 : vector<64x64xf32>
    %cst_7 = arith.constant dense<0.000000e+00> : vector<64xf32>
    %6 = vector.multi_reduction <add>, %5, %cst_7 [1] : vector<64x64xf32> to vector<64xf32>
    %7 = vector.shape_cast %6 : vector<64xf32> to vector<64x1xf32>
    %cst_8 = arith.constant 1.000000e-24 : f32
    %8 = vector.broadcast %cst_8 : f32 to vector<64x1xf32>
    %9 = arith.maximumf %7, %8 : vector<64x1xf32>
    %10 = math.rsqrt %9 : vector<64x1xf32>
    %11 = vector.broadcast %10 : vector<64x1xf32> to vector<64x64xf32>
    %12 = arith.mulf %4, %11 : vector<64x64xf32>
    %c0_9 = arith.constant 0 : index
    %c0_10 = arith.constant 0 : index
    %13 = vector.load %arg3[%c0_9, %c0_10] : memref<16x64xf32, #tpu.memory_space<vmem>>, vector<16x64xf32>
    %cst_11 = arith.constant dense<0.000000e+00> : vector<64x64xf32>
    %14 = tpu.matmul %2, %13, %cst_11 {dimension_numbers = #tpu.dot_dimension_numbers<[1], [0], [0], [1], [0, 0, 1, 1], [], []>} : vector<64x16xf32>, vector<16x64xf32>, vector<64x64xf32> -> vector<64x64xf32>
    %15 = arith.mulf %14, %14 : vector<64x64xf32>
    %cst_12 = arith.constant dense<0.000000e+00> : vector<64xf32>
    %16 = vector.multi_reduction <add>, %15, %cst_12 [1] : vector<64x64xf32> to vector<64xf32>
    %17 = vector.shape_cast %16 : vector<64xf32> to vector<64x1xf32>
    %cst_13 = arith.constant 1.000000e-24 : f32
    %18 = vector.broadcast %cst_13 : f32 to vector<64x1xf32>
    %19 = arith.maximumf %17, %18 : vector<64x1xf32>
    %20 = math.rsqrt %19 : vector<64x1xf32>
    %21 = vector.broadcast %20 : vector<64x1xf32> to vector<64x64xf32>
    %22 = arith.mulf %14, %21 : vector<64x64xf32>
    %c0_14 = arith.constant 0 : index
    %c0_15 = arith.constant 0 : index
    %23 = vector.load %arg4[%c0_14, %c0_15] : memref<64x32xf32, #tpu.memory_space<vmem>>, vector<64x32xf32>
    %cst_16 = arith.constant dense<0.000000e+00> : vector<64x32xf32>
    %24 = tpu.matmul %12, %23, %cst_16 {dimension_numbers = #tpu.dot_dimension_numbers<[1], [0], [0], [1], [0, 0, 1, 1], [], []>} : vector<64x64xf32>, vector<64x32xf32>, vector<64x32xf32> -> vector<64x32xf32>
    %cst_17 = arith.constant 0.000000e+00 : f32
    %25 = vector.broadcast %cst_17 : f32 to vector<64x32xf32>
    %26 = arith.maximumf %24, %25 : vector<64x32xf32>
    %c0_18 = arith.constant 0 : index
    %c0_19 = arith.constant 0 : index
    %27 = vector.load %arg5[%c0_18, %c0_19] : memref<64x32xf32, #tpu.memory_space<vmem>>, vector<64x32xf32>
    %cst_20 = arith.constant dense<0.000000e+00> : vector<64x32xf32>
    %28 = tpu.matmul %22, %27, %cst_20 {dimension_numbers = #tpu.dot_dimension_numbers<[1], [0], [0], [1], [0, 0, 1, 1], [], []>} : vector<64x64xf32>, vector<64x32xf32>, vector<64x32xf32> -> vector<64x32xf32>
    %cst_21 = arith.constant 0.000000e+00 : f32
    %29 = vector.broadcast %cst_21 : f32 to vector<64x32xf32>
    %30 = arith.maximumf %28, %29 : vector<64x32xf32>
    %31 = vector.shape_cast %12 : vector<64x64xf32> to vector<8x8x64xf32>
    %32 = vector.shape_cast %26 : vector<64x32xf32> to vector<8x8x32xf32>
    %33 = tpu.transpose %32, [0, 2, 1] : vector<8x8x32xf32> -> vector<8x32x8xf32>
    %34 = arith.mulf %33, %33 : vector<8x32x8xf32>
    %cst_22 = arith.constant dense<0.000000e+00> : vector<8x32xf32>
    %35 = vector.multi_reduction <add>, %34, %cst_22 [2] : vector<8x32x8xf32> to vector<8x32xf32>
    %36 = vector.shape_cast %35 : vector<8x32xf32> to vector<8x32x1xf32>
    %cst_23 = arith.constant 1.000000e-24 : f32
    %37 = vector.broadcast %cst_23 : f32 to vector<8x32x1xf32>
    %38 = arith.maximumf %36, %37 : vector<8x32x1xf32>
    %39 = math.rsqrt %38 : vector<8x32x1xf32>
    %40 = vector.broadcast %39 : vector<8x32x1xf32> to vector<8x32x8xf32>
    %41 = arith.mulf %33, %40 : vector<8x32x8xf32>
    %42 = vector.shape_cast %30 : vector<64x32xf32> to vector<8x8x32xf32>
    %43 = arith.mulf %42, %42 : vector<8x8x32xf32>
    %cst_24 = arith.constant dense<0.000000e+00> : vector<8x32xf32>
    %44 = vector.multi_reduction <add>, %43, %cst_24 [1] : vector<8x8x32xf32> to vector<8x32xf32>
    %45 = vector.shape_cast %44 : vector<8x32xf32> to vector<8x1x32xf32>
    %cst_25 = arith.constant 1.000000e-24 : f32
    %46 = vector.broadcast %cst_25 : f32 to vector<8x1x32xf32>
    %47 = arith.maximumf %45, %46 : vector<8x1x32xf32>
    %48 = math.rsqrt %47 : vector<8x1x32xf32>
    %49 = vector.broadcast %48 : vector<8x1x32xf32> to vector<8x8x32xf32>
    %50 = arith.mulf %42, %49 : vector<8x8x32xf32>
    "tpu.trace_start"() <{level = 10 : i32, message = "bdn,bnc->bdc"}> : () -> ()
    %cst_26 = arith.constant dense<0.000000e+00> : vector<8x32x64xf32>
    %51 = tpu.matmul %41, %31, %cst_26 {dimension_numbers = #tpu.dot_dimension_numbers<[2], [1], [1], [2], [0, 0, 0, 1, 1, 2], [0], [0]>} : vector<8x32x8xf32>, vector<8x8x64xf32>, vector<8x32x64xf32> -> vector<8x32x64xf32>
    "tpu.trace_stop"() : () -> ()
    "tpu.trace_start"() <{level = 10 : i32, message = "bic,bjc->bij"}> : () -> ()
    %cst_27 = arith.constant dense<0.000000e+00> : vector<8x32x32xf32>
    %52 = tpu.matmul %51, %51, %cst_27 {dimension_numbers = #tpu.dot_dimension_numbers<[2], [2], [1], [1], [0, 0, 0, 1, 1, 1], [0], [0]>} : vector<8x32x64xf32>, vector<8x32x64xf32>, vector<8x32x32xf32> -> vector<8x32x32xf32>
    "tpu.trace_stop"() : () -> ()
    %53 = arith.mulf %52, %52 : vector<8x32x32xf32>
    %cst_28 = arith.constant dense<0.000000e+00> : vector<8x32xf32>
    %54 = vector.multi_reduction <add>, %53, %cst_28 [2] : vector<8x32x32xf32> to vector<8x32xf32>
    %55 = vector.shape_cast %54 : vector<8x32xf32> to vector<8x32x1xf32>
    %cst_29 = arith.constant 1.000000e-24 : f32
    %56 = vector.broadcast %cst_29 : f32 to vector<8x32x1xf32>
    %57 = arith.maximumf %55, %56 : vector<8x32x1xf32>
    %58 = math.rsqrt %57 : vector<8x32x1xf32>
    %59 = vector.broadcast %58 : vector<8x32x1xf32> to vector<8x32x32xf32>
    %60 = arith.mulf %52, %59 : vector<8x32x32xf32>
    %61 = vector.shape_cast %51 : vector<8x32x64xf32> to vector<256x64xf32>
    %c0_30 = arith.constant 0 : index
    %c0_31 = arith.constant 0 : index
    %62 = vector.load %arg6[%c0_30, %c0_31] : memref<64x64xf32, #tpu.memory_space<vmem>>, vector<64x64xf32>
    %cst_32 = arith.constant dense<0.000000e+00> : vector<256x64xf32>
    %63 = tpu.matmul %61, %62, %cst_32 {dimension_numbers = #tpu.dot_dimension_numbers<[1], [0], [0], [1], [0, 0, 1, 1], [], []>} : vector<256x64xf32>, vector<64x64xf32>, vector<256x64xf32> -> vector<256x64xf32>
    %c0_33 = arith.constant 0 : index
    %c0_34 = arith.constant 0 : index
    %64 = vector.load %arg7[%c0_33, %c0_34] : memref<2x64xf32, #tpu.memory_space<vmem>>, vector<1x64xf32>
    %c1 = arith.constant 1 : index
    %c0_35 = arith.constant 0 : index
    %65 = vector.load %arg7[%c1, %c0_35] : memref<2x64xf32, #tpu.memory_space<vmem>>, vector<1x64xf32>
    %cst_36 = arith.constant dense<0.000000e+00> : vector<256xf32>
    %66 = vector.multi_reduction <add>, %63, %cst_36 [1] : vector<256x64xf32> to vector<256xf32>
    %67 = vector.shape_cast %66 : vector<256xf32> to vector<256x1xf32>
    %cst_37 = arith.constant 6.400000e+01 : f32
    %68 = vector.broadcast %cst_37 : f32 to vector<256x1xf32>
    %69 = arith.divf %67, %68 : vector<256x1xf32>
    %70 = vector.broadcast %69 : vector<256x1xf32> to vector<256x64xf32>
    %71 = arith.subf %63, %70 : vector<256x64xf32>
    %72 = arith.mulf %71, %71 : vector<256x64xf32>
    %cst_38 = arith.constant dense<0.000000e+00> : vector<256xf32>
    %73 = vector.multi_reduction <add>, %72, %cst_38 [1] : vector<256x64xf32> to vector<256xf32>
    %74 = vector.shape_cast %73 : vector<256xf32> to vector<256x1xf32>
    %cst_39 = arith.constant 6.400000e+01 : f32
    %75 = vector.broadcast %cst_39 : f32 to vector<256x1xf32>
    %76 = arith.divf %74, %75 : vector<256x1xf32>
    %cst_40 = arith.constant 9.99999974E-6 : f32
    %77 = vector.broadcast %cst_40 : f32 to vector<256x1xf32>
    %78 = arith.addf %76, %77 : vector<256x1xf32>
    %79 = math.rsqrt %78 : vector<256x1xf32>
    %80 = vector.broadcast %79 : vector<256x1xf32> to vector<256x64xf32>
    %81 = arith.mulf %71, %80 : vector<256x64xf32>
    %82 = vector.broadcast %64 : vector<1x64xf32> to vector<256x64xf32>
    %83 = arith.mulf %81, %82 : vector<256x64xf32>
    %84 = vector.broadcast %65 : vector<1x64xf32> to vector<256x64xf32>
    %85 = arith.addf %83, %84 : vector<256x64xf32>
    %cst_41 = arith.constant 0.000000e+00 : f32
    %86 = vector.broadcast %cst_41 : f32 to vector<256x64xf32>
    %87 = arith.maximumf %85, %86 : vector<256x64xf32>
    %88 = vector.shape_cast %87 : vector<256x64xf32> to vector<8x32x64xf32>
    "tpu.trace_start"() <{level = 10 : i32, message = "bij,bjc->bic"}> : () -> ()
    %cst_42 = arith.constant dense<0.000000e+00> : vector<8x32x64xf32>
    %89 = tpu.matmul %60, %88, %cst_42 {dimension_numbers = #tpu.dot_dimension_numbers<[2], [1], [1], [2], [0, 0, 0, 1, 1, 2], [0], [0]>} : vector<8x32x32xf32>, vector<8x32x64xf32>, vector<8x32x64xf32> -> vector<8x32x64xf32>
    "tpu.trace_stop"() : () -> ()
    %90 = math.tanh %89 : vector<8x32x64xf32>
    "tpu.trace_start"() <{level = 10 : i32, message = "bnd,bdc->bnc"}> : () -> ()
    %cst_43 = arith.constant dense<0.000000e+00> : vector<8x8x64xf32>
    %91 = tpu.matmul %50, %90, %cst_43 {dimension_numbers = #tpu.dot_dimension_numbers<[2], [1], [1], [2], [0, 0, 0, 1, 1, 2], [0], [0]>} : vector<8x8x32xf32>, vector<8x32x64xf32>, vector<8x8x64xf32> -> vector<8x8x64xf32>
    "tpu.trace_stop"() : () -> ()
    %92 = vector.shape_cast %91 : vector<8x8x64xf32> to vector<64x64xf32>
    %c0_44 = arith.constant 0 : index
    %c0_45 = arith.constant 0 : index
    %93 = vector.load %arg8[%c0_44, %c0_45] : memref<64x16xf32, #tpu.memory_space<vmem>>, vector<64x16xf32>
    %cst_46 = arith.constant dense<0.000000e+00> : vector<64x16xf32>
    %94 = tpu.matmul %92, %93, %cst_46 {dimension_numbers = #tpu.dot_dimension_numbers<[1], [0], [0], [1], [0, 0, 1, 1], [], []>} : vector<64x64xf32>, vector<64x16xf32>, vector<64x16xf32> -> vector<64x16xf32>
    %95 = vector.shape_cast %94 : vector<64x16xf32> to vector<8x8x16xf32>
    "tpu.trace_start"() <{level = 10 : i32, message = "bnm,bmf->bnf"}> : () -> ()
    %cst_47 = arith.constant dense<0.000000e+00> : vector<8x8x16xf32>
    %96 = tpu.matmul %0, %95, %cst_47 {dimension_numbers = #tpu.dot_dimension_numbers<[2], [1], [1], [2], [0, 0, 0, 1, 1, 2], [0], [0]>} : vector<8x8x8xf32>, vector<8x8x16xf32>, vector<8x8x16xf32> -> vector<8x8x16xf32>
    "tpu.trace_stop"() : () -> ()
    %cst_48 = arith.constant dense<0.000000e+00> : vector<8x16xf32>
    %97 = vector.multi_reduction <add>, %96, %cst_48 [1] : vector<8x8x16xf32> to vector<8x16xf32>
    %cst_49 = arith.constant 8.000000e+00 : f32
    %98 = vector.broadcast %cst_49 : f32 to vector<8x16xf32>
    %99 = arith.divf %97, %98 : vector<8x16xf32>
    %100 = vector.shape_cast %99 : vector<8x16xf32> to vector<1x8x16xf32>
    %101 = vector.broadcast %100 : vector<1x8x16xf32> to vector<8x8x16xf32>
    %102 = arith.subf %96, %101 : vector<8x8x16xf32>
    %103 = vector.shape_cast %102 : vector<8x8x16xf32> to vector<8x128xf32>
    %c0_50 = arith.constant 0 : index
    %c0_51 = arith.constant 0 : index
    %104 = vector.load %arg9[%c0_50, %c0_51] : memref<8x128xf32, #tpu.memory_space<vmem>>, vector<8x128xf32>
    tpu.vector_store %arg9[%c0_50, %c0_51], %103 {strides = array<i32>} : memref<8x128xf32, #tpu.memory_space<vmem>>, vector<8x128xf32>,
    return
  }
}

</mosaic_0001>

<bundles_post_ra>
// kernel: tpu_custom_call.1
= control target key start
LH: loop header
LB: loop body
LE: loop exit
PB: predicated region body
PF: predicated region fallthrough
CT: control target
= control target key end

     0   :  { %vm51_vm0 = vcmask 130048   ;;  %s9706_s0 = inlined_call_operand.vmem [shape: f32[8,8,8], index: 0, kind: input, shape index: {}]   ;;  %s9707_s1 = inlined_call_operand.vmem [shape: f32[8,8,16], index: 1, kind: input, shape index: {}]   ;;  %s9708_s2 = inlined_call_operand.vmem [shape: f32[16,64], index: 2, kind: input, shape index: {}]   ;;  %s9709_s3 = inlined_call_operand.vmem [shape: f32[16,64], index: 3, kind: input, shape index: {}]   ;;  %s9710_s4 = inlined_call_operand.vmem [shape: f32[64,32], index: 4, kind: input, shape index: {}]   ;;  %s9711_s5 = inlined_call_operand.vmem [shape: f32[64,32], index: 5, kind: input, shape index: {}]   ;;  %s9712_s6 = inlined_call_operand.vmem [shape: f32[64,64], index: 6, kind: input, shape index: {}]   ;;  %s9713_s7 = inlined_call_operand.vmem [shape: f32[2,64], index: 7, kind: input, shape index: {}]   ;;  %s9714_s8 = inlined_call_operand.vmem [shape: f32[64,16], index: 8, kind: input, shape index: {}]   ;;  %s9715_s9 = inlined_call_operand.hbm [shape: f32[8,128], index: 9, kind: output, shape index: {}]  }
   0x1   :  { %v49_v0 = vld [vmem:[%s9708_s2] sm:$0xff]  ;;  %v50_v1 = vld [vmem:[%s9708_s2 + $0x8] sm:$0xff] }
   0x2   :  { %v41_v2 = vld [vmem:[%s9707_s1] sm:$0xff]  ;;  %v7338_v3 = vpack.c.bf16 %v50_v1, %v49_v0  ;;  %v239_v5 = vld [vmem:[%s9709_s3 + $0x8] sm:$0xff] }
   0x3   :  { %6746 = vmatprep.mubr.msk.f32.mxu0 %vm51_vm0, %v41_v2  ;;  %6762 = vmatprep.mubr.msk.f32.mxu1 %vm51_vm0, %v41_v2  ;;  %v238_v4 = vld [vmem:[%s9709_s3] sm:$0xff]  ;;  %v42_v6 = vld [vmem:[%s9707_s1 + $0x8] sm:$0xff] }
   0x4   :  { %7339 = vmatprep.subr.bf16.mxu0 %v7338_v3  ;;  %v7342_v7 = vpack.c.bf16 %v239_v5, %v238_v4 }
   0x5   :  { %7341 = vmatpush3.bf16.msra.mxu0 %v7338_v3 }
   0x6   :  { %14 = vsyncpa [#allocation3], 0  ;;  %v43_v8 = vld [vmem:[%s9707_s1 + $0x10] sm:$0xff]  ;;  %7343 = vmatprep.subr.bf16.mxu1 %v7342_v7  ;;  %v44_v9 = vld [vmem:[%s9707_s1 + $0x18] sm:$0xff]  ;;  %vm189_vm1 = vcmask 523264   ;;  %vm979_vm2 = vcmask 64512  }
   0x7   :  { %7345 = vmatpush3.bf16.msra.mxu1 %v7342_v7  ;;  %v45_v10 = vld [vmem:[%s9707_s1 + $0x20] sm:$0xff]  ;;  %v46_v11 = vld [vmem:[%s9707_s1 + $0x28] sm:$0xff]  ;;  %v47_v12 = vld [vmem:[%s9707_s1 + $0x30] sm:$0xff]  ;;  %vm1180_vm4 = vcmask 261120   ;;  %vm7960_vm5 = vmmov 0   ;;  %vm5979_vm6 = vcmask 1041409  }
   0x8   :  { %6747 = vmatmul.mubr.msk.f32.vlgmr.msra.gmra.mrb[0].mxu0 %vm51_vm0, %v42_v6  ;;  %v48_v13 = vld [vmem:[%s9707_s1 + $0x38] sm:$0xff]  ;;  %v401_v44 = vld [vmem:[%s9710_s4] sm:$0xff]  ;;  %v402_v45 = vld [vmem:[%s9710_s4 + $0x8] sm:$0xff]  ;;  %vm5981_vm7 = vcmask 1042434   ;;  %vm5983_vm8 = vcmask 1043459   ;;  %vm5985_vm9 = vcmask 1044484  }
   0x9   :  { %6749 = vmatprep.mubr.msk.f32.mxu0 %vm51_vm0, %v43_v8  ;;  %v7346_v49 = vpack.c.bf16 %v402_v45, %v401_v44  ;;  %v403_v52 = vld [vmem:[%s9710_s4 + $0x10] sm:$0xff]  ;;  %v404_v53 = vld [vmem:[%s9710_s4 + $0x18] sm:$0xff]  ;;  %v546_v54 = vld [vmem:[%s9711_s5] sm:$0xff]  ;;  %vm5987_vm10 = vcmask 1045509   ;;  %vm5989_vm11 = vcmask 1046534   ;;  %vm5991_vm12 = vcmask 1047559  }
   0xa   :  { %6763 = vmatmul.mubr.msk.f32.vlgmr.msra.gmra.mrb[0].mxu1 %vm51_vm0, %v42_v6  ;;  %v7350_v55 = vpack.c.bf16 %v404_v53, %v403_v52  ;;  %v547_v56 = vld [vmem:[%s9711_s5 + $0x8] sm:$0xff]  ;;  %v405_v60 = vld [vmem:[%s9710_s4 + $0x20] sm:$0xff]  ;;  %v548_v62 = vld [vmem:[%s9711_s5 + $0x10] sm:$0xff]  ;;  %s7965_s12 = smov 16   ;;  %s7967_s13 = smov 80   ;;  %vm6168_vm13 = vcmask 392192  }
   0xb   :  { %6765 = vmatprep.mubr.msk.f32.mxu1 %vm51_vm0, %v43_v8  ;;  %7347 = vmatprep.subr.bf16.mxu0 %v7346_v49  ;;  %v7362_v57 = vpack.c.bf16 %v547_v56, %v546_v54  ;;  %v406_v61 = vld [vmem:[%s9710_s4 + $0x28] sm:$0xff]  ;;  %v549_v0 = vld [vmem:[%s9711_s5 + $0x18] sm:$0xff]  ;;  %v407_v4 = vld [vmem:[%s9710_s4 + $0x30] sm:$0xff]  ;;  %s7968_s14 = smov 64   ;;  %s7969_s15 = smov 112   ;;  %vm6171_vm14 = vcmask 654336  }
   0xc   :  { %6750 = vmatmul.mubr.msk.f32.gmra.mrb[2].mxu0 %vm51_vm0, %v44_v9  ;;  %v7354_v63 = vpack.c.bf16 %v406_v61, %v405_v60  ;;  %v7366_v1 = vpack.c.bf16 %v549_v0, %v548_v62  ;;  %v408_v5 = vld [vmem:[%s9710_s4 + $0x38] sm:$0xff]  ;;  %v550_v6 = vld [vmem:[%s9711_s5 + $0x20] sm:$0xff]  ;;  %v551_v8 = vld [vmem:[%s9711_s5 + $0x28] sm:$0xff]  ;;  %s7966_s4 = smov 48   ;;  %vm6173_vm15 = vcmask 785408   ;;  %s7971_s16 = smov [#allocation2]  }
   0xd   :  { %6752 = vmatprep.mubr.msk.f32.mxu0 %vm51_vm0, %v45_v10  ;;  %7349 = vmatpush3.bf16.msra.mxu0 %v7346_v49  ;;  %v7358_v7 = vpack.c.bf16 %v408_v5, %v407_v4  ;;  %vm8504_vm3 = vmpackc.low %vm189_vm1, %vm189_vm1  ;;  %s6184_s17 = sshll.u32 %s7971_s16, 4  ;;  %s6185_s17 = int_to_ptr.vmem [resolvable:$true] %s6184_s17 }
   0xe   :  { %6766 = vmatmul.mubr.msk.f32.gmra.mrb[2].mxu1 %vm51_vm0, %v44_v9  ;;  %7351 = vmatprep.subr.bf16.mxu0 %v7350_v55  ;;  %v7370_v9 = vpack.c.bf16 %v551_v8, %v550_v6  ;;  %s7935_s18 = scalar_lea.vmem %s6185_s17, 128  ;;  %p7940_p1 = scmp.lt.s32.totalorder %s6185_s17, %s6185_s17 }
   0xf   :  { %6768 = vmatprep.mubr.msk.f32.mxu1 %vm51_vm0, %v45_v10  ;;  %7363 = vmatprep.subr.bf16.mxu1 %v7362_v57  ;;  %p7936_p0 = scmp.ne.s32.totalorder %s6185_s17, %s7935_s18  ;;  %p7941_p2 = scmp.lt.s32.totalorder %s7935_s18, %s7935_s18 }
  0x10   :  { %6753 = vmatmul.mubr.msk.f32.gmra.mrb[4].mxu0 %vm51_vm0, %v46_v11  ;;  %7365 = vmatpush3.bf16.msra.mxu1 %v7362_v57 }
  0x11   :  { %6755 = vmatprep.mubr.msk.f32.mxu0 %vm51_vm0, %v47_v12  ;;  %7353 = vmatpush3.bf16.msra.mxu0 %v7350_v55  ;;  %p7942_p3 = por %p7941_p2, %p7940_p1 }
  0x12   :  { %6769 = vmatmul.mubr.msk.f32.gmra.mrb[4].mxu1 %vm51_vm0, %v46_v11  ;;  %7355 = vmatprep.subr.bf16.mxu0 %v7354_v63 }
  0x13   :  { %6771 = vmatprep.mubr.msk.f32.mxu1 %vm51_vm0, %v47_v12  ;;  %7367 = vmatprep.subr.bf16.mxu1 %v7366_v1  ;;  %v552_v12 = vld [vmem:[%s9711_s5 + $0x30] sm:$0xff]  ;;  %p7943_p4 = pnand %p7942_p3, %p7936_p0 }
  0x14   :  { %6756 = vmatmul.mubr.msk.f32.gmra.mrb[6].mxu0 %vm51_vm0, %v48_v13  ;;  %7369 = vmatpush3.bf16.msra.mxu1 %v7366_v1 }
  0x15   :  { %7357 = vmatpush3.bf16.msra.mxu0 %v7354_v63  ;;  %7371 = vmatprep.subr.bf16.mxu1 %v7370_v9 }
  0x16   :  { %6772 = vmatmul.mubr.msk.f32.gmra.mrb[6].mxu1 %vm51_vm0, %v48_v13  ;;  %7359 = vmatprep.subr.bf16.mxu0 %v7358_v7  ;;  %v553_v13 = vld [vmem:[%s9711_s5 + $0x38] sm:$0xff]  ;;  %s7970_s5 = smov 96  }
  0x18   :  { %7373 = vmatpush3.bf16.msra.mxu1 %v7370_v9 }
  0x19   :  { %7361 = vmatpush3.bf16.msra.mxu0 %v7358_v7 }
  0xdb   :  { %v8074_v14 = vpop.f32.mrb[0].mxu0 }
  0xdc   :  { %v8076_v15 = vpop.f32.mrb[1].mxu0  ;;  %v182_v18 = vmul.f32 %v8074_v14, %v8074_v14 }
  0xdd   :  { %v181_v16 = vmul.f32 %v8076_v15, %v8076_v15  ;;  %v8080_v17 = vpop.f32.mrb[0].mxu1 }
  0xde   :  { %v8087_v21 = vpop.f32.mrb[1].mxu1  ;;  %v193_v27 = vsel %vm189_vm1, %v182_v18, 0.0  ;;  %v346_v42 = vmul.f32 %v8080_v17, %v8080_v17 }
  0xdf   :  { %v8084_v19 = vpop.f32.mrb[2].mxu0  ;;  %v190_v20 = vsel %vm189_vm1, %v181_v16, 0.0  ;;  %v345_v46 = vmul.f32 %v8087_v21, %v8087_v21  ;;  %v7374_v16 = vpack.c.bf16 %v553_v13, %v552_v12 }
  0xe0   :  { %191 = vadd.xlane.f32.xlu0 %v190_v20  ;;  %v8089_v22 = vpop.f32.mrb[3].mxu0  ;;  %v184_v23 = vmul.f32 %v8084_v19, %v8084_v19  ;;  %v356_v48 = vsel %vm189_vm1, %v346_v42, 0.0 }
  0xe1   :  { %v183_v24 = vmul.f32 %v8089_v22, %v8089_v22  ;;  %v8095_v25 = vpop.f32.mrb[2].mxu1  ;;  %v353_v50 = vsel %vm189_vm1, %v345_v46, 0.0  ;;  %7375 = vmatprep.subr.bf16.mxu1 %v7374_v16 }
  0xe2   :  { %v8101_v29 = vpop.f32.mrb[3].mxu1  ;;  %v199_v33 = vsel %vm189_vm1, %v184_v23, 0.0  ;;  %v348_v58 = vmul.f32 %v8095_v25, %v8095_v25  ;;  %7377 = vmatpush3.bf16.msra.mxu1 %v7374_v16 }
  0xe3   :  { %v8097_v26 = vpop.f32.mrb[4].mxu0  ;;  %v196_v28 = vsel %vm189_vm1, %v183_v24, 0.0  ;;  %v347_v51 = vmul.f32 %v8101_v29, %v8101_v29 }
  0xe4   :  { %194 = vadd.xlane.f32.xlu0 %v193_v27  ;;  %197 = vadd.xlane.f32.xlu1 %v196_v28  ;;  %v8103_v30 = vpop.f32.mrb[5].mxu0  ;;  %v186_v31 = vmul.f32 %v8097_v26, %v8097_v26  ;;  %v362_v3 = vsel %vm189_vm1, %v348_v58, 0.0 }
  0xe5   :  { %v185_v32 = vmul.f32 %v8103_v30, %v8103_v30  ;;  %v8110_v34 = vpop.f32.mrb[4].mxu1  ;;  %v359_v59 = vsel %vm189_vm1, %v347_v51, 0.0 }
  0xe6   :  { %v8115_v37 = vpop.f32.mrb[5].mxu1  ;;  %v205_v41 = vsel %vm189_vm1, %v186_v31, 0.0  ;;  %v350_v10 = vmul.f32 %v8110_v34, %v8110_v34 }
  0xe7   :  { %v8112_v35 = vpop.f32.mrb[6].mxu0  ;;  %v202_v36 = vsel %vm189_vm1, %v185_v32, 0.0  ;;  %v349_v2 = vmul.f32 %v8115_v37, %v8115_v37 }
  0xe8   :  { %200 = vadd.xlane.f32.xlu1 %v199_v33  ;;  %203 = vadd.xlane.f32.xlu0 %v202_v36  ;;  %v8117_v38 = vpop.f32.mrb[7].mxu0  ;;  %v188_v39 = vmul.f32 %v8112_v35, %v8112_v35  ;;  %v368_v18 = vsel %vm189_vm1, %v350_v10, 0.0 }
  0xe9   :  { %v187_v40 = vmul.f32 %v8117_v38, %v8117_v38  ;;  %v365_v11 = vsel %vm189_vm1, %v349_v2, 0.0 }
  0xea   :  { %v211_v47 = vsel %vm189_vm1, %v188_v39, 0.0 }
  0xeb   :  { %v208_v43 = vsel %vm189_vm1, %v187_v40, 0.0 }
  0xec   :  { %206 = vadd.xlane.f32.xlu1 %v205_v41  ;;  %209 = vadd.xlane.f32.xlu0 %v208_v43 }
  0xf0   :  { %212 = vadd.xlane.f32.xlu1 %v211_v47  ;;  %357 = vadd.xlane.f32.xlu0 %v356_v48 }
  0xf4   :  { %354 = vadd.xlane.f32.xlu1 %v353_v50 }
  0xf8   :  { %360 = vadd.xlane.f32.xlu1 %v359_v59 }
  0xfc   :  { %363 = vadd.xlane.f32.xlu1 %v362_v3 }
 0x100   :  { %366 = vadd.xlane.f32.xlu1 %v365_v11 }
 0x104   :  { %369 = vadd.xlane.f32.xlu1 %v368_v18 }
 0x16d   :  { %v192_v20 = vpop.xlane.xlu0 %191 }
 0x16e   :  { %v214_v23 = vmax.f32 %v192_v20, 1e-24 }
 0x170   :  { %7631 = vrsqrt.f32 %v214_v23 }
 0x171   :  { %v195_v24 = vpop.xlane.xlu0 %194  ;;  %v198_v27 = vpop.xlane.xlu1 %197 }
 0x172   :  { %v215_v28 = vmax.f32 %v195_v24, 1e-24  ;;  %v216_v31 = vmax.f32 %v198_v27, 1e-24 }
 0x174   :  { %7633 = vrsqrt.f32 %v215_v28 }
 0x175   :  { %7635 = vrsqrt.f32 %v216_v31  ;;  %v201_v32 = vpop.xlane.xlu1 %200  ;;  %v204_v33 = vpop.xlane.xlu0 %203 }
 0x176   :  { %v217_v36 = vmax.f32 %v201_v32, 1e-24  ;;  %v218_v39 = vmax.f32 %v204_v33, 1e-24 }
 0x178   :  { %7637 = vrsqrt.f32 %v217_v36 }
 0x179   :  { %7639 = vrsqrt.f32 %v218_v39  ;;  %v207_v40 = vpop.xlane.xlu1 %206  ;;  %v210_v41 = vpop.xlane.xlu0 %209 }
 0x17a   :  { %v7632_v42 = vpop.eup %7631  ;;  %v219_v43 = vmax.f32 %v207_v40, 1e-24  ;;  %v220_v44 = vmax.f32 %v210_v41, 1e-24 }
 0x17b   :  { %v230_v45 = vmul.f32 %v7632_v42, %v8076_v15 }
 0x17c   :  { %7641 = vrsqrt.f32 %v219_v43 }
 0x17d   :  { %7643 = vrsqrt.f32 %v220_v44  ;;  %6790 = vmatprep.mubr.msk.f32.mxu0 %vm189_vm1, %v230_v45  ;;  %6830 = vmatprep.subr.mxu0 %v230_v45  ;;  %v213_v46 = vpop.xlane.xlu1 %212  ;;  %v358_v47 = vpop.xlane.xlu0 %357 }
 0x17e   :  { %v7634_v48 = vpop.eup %7633  ;;  %v221_v49 = vmax.f32 %v213_v46, 1e-24  ;;  %v378_v50 = vmax.f32 %v358_v47, 1e-24 }
 0x17f   :  { %v7636_v51 = vpop.eup %7635  ;;  %v231_v52 = vmul.f32 %v7634_v48, %v8074_v14 }
 0x180   :  { %7645 = vrsqrt.f32 %v221_v49  ;;  %v8196_v53 = vmul.f32 %v7636_v51, %v8089_v22 }
 0x181   :  { %6791 = vmatmul.mubr.msk.f32.vlgmr.msra.gmra.mrb[8].mxu0 %vm189_vm1, %v231_v52  ;;  %6838 = vmatprep.subr.mxu1 %v231_v52  ;;  %v355_v15 = vpop.xlane.xlu1 %354  ;;  %7647 = vrsqrt.f32 %v378_v50 }
 0x182   :  { %v7638_v54 = vpop.eup %7637  ;;  %6831 = vmatpush3.msra.mxu0 %v230_v45  ;;  %v377_v55 = vmax.f32 %v355_v15, 1e-24  ;;  %6793 = vmatprep.mubr.msk.f32.mxu0 %vm189_vm1, %v8196_v53 }
 0x183   :  { %v7640_v56 = vpop.eup %7639  ;;  %6846 = vmatprep.subr.mxu0 %v8196_v53  ;;  %v8203_v14 = vmul.f32 %v7638_v54, %v8084_v19 }
 0x184   :  { %7649 = vrsqrt.f32 %v377_v55  ;;  %v8206_v22 = vmul.f32 %v7640_v56, %v8103_v30 }
 0x185   :  { %6794 = vmatmul.mubr.msk.f32.gmra.mrb[10].mxu0 %vm189_vm1, %v8203_v14  ;;  %v361_v57 = vpop.xlane.xlu1 %360 }
 0x186   :  { %v7642_v58 = vpop.eup %7641  ;;  %6796 = vmatprep.mubr.msk.f32.mxu0 %vm189_vm1, %v8206_v22  ;;  %v379_v59 = vmax.f32 %v361_v57, 1e-24 }
 0x187   :  { %v7644_v60 = vpop.eup %7643  ;;  %v8213_v61 = vmul.f32 %v7642_v58, %v8097_v26 }
 0x188   :  { %v8216_v19 = vmul.f32 %v7644_v60, %v8117_v38  ;;  %7651 = vrsqrt.f32 %v379_v59 }
 0x189   :  { %6797 = vmatmul.mubr.msk.f32.gmra.mrb[12].mxu0 %vm189_vm1, %v8213_v61  ;;  %v364_v30 = vpop.xlane.xlu1 %363 }
 0x18a   :  { %v7646_v62 = vpop.eup %7645  ;;  %6799 = vmatprep.mubr.msk.f32.mxu0 %vm189_vm1, %v8216_v19  ;;  %v380_v63 = vmax.f32 %v364_v30, 1e-24 }
 0x18b   :  { %v7648_v0 = vpop.eup %7647  ;;  %v8223_v1 = vmul.f32 %v7646_v62, %v8112_v35 }
 0x18c   :  { %7653 = vrsqrt.f32 %v380_v63  ;;  %v394_v2 = vmul.f32 %v7648_v0, %v8080_v17 }
 0x18d   :  { %6800 = vmatmul.mubr.msk.f32.gmra.mrb[14].mxu0 %vm189_vm1, %v8223_v1  ;;  %v367_v26 = vpop.xlane.xlu1 %366 }
 0x18e   :  { %v7650_v38 = vpop.eup %7649  ;;  %v381_v3 = vmax.f32 %v367_v26, 1e-24 }
 0x18f   :  { %v393_v4 = vmul.f32 %v7650_v38, %v8087_v21 }
 0x190   :  { %7655 = vrsqrt.f32 %v381_v3 }
 0x191   :  { %6818 = vmatprep.mubr.msk.f32.mxu1 %vm189_vm1, %v393_v4  ;;  %v370_v5 = vpop.xlane.xlu1 %369 }
 0x192   :  { %v7652_v6 = vpop.eup %7651  ;;  %6819 = vmatmul.mubr.msk.f32.vlgmr.msra.gmra.mrb[8].mxu1 %vm189_vm1, %v394_v2  ;;  %v382_v35 = vmax.f32 %v370_v5, 1e-24 }
 0x193   :  { %6839 = vmatpush3.msra.mxu1 %v231_v52  ;;  %v395_v7 = vmul.f32 %v7652_v6, %v8101_v29  ;;  %v8240_v29 = vpop.f32.mrb[6].mxu1 }
 0x194   :  { %6854 = vmatprep.subr.mxu1 %v8203_v14  ;;  %7657 = vrsqrt.f32 %v382_v35  ;;  %v8242_v12 = vpop.f32.mrb[7].mxu1  ;;  %v352_v26 = vmul.f32 %v8240_v29, %v8240_v29 }
 0x195   :  { %6821 = vmatprep.mubr.msk.f32.mxu1 %vm189_vm1, %v395_v7  ;;  %v351_v59 = vmul.f32 %v8242_v12, %v8242_v12 }
 0x196   :  { %v7654_v17 = vpop.eup %7653  ;;  %v374_v2 = vsel %vm189_vm1, %v352_v26, 0.0 }
 0x197   :  { %v396_v8 = vmul.f32 %v7654_v17, %v8095_v25  ;;  %v371_v63 = vsel %vm189_vm1, %v351_v59, 0.0 }
 0x199   :  { %6822 = vmatmul.mubr.msk.f32.gmra.mrb[10].mxu1 %vm189_vm1, %v396_v8 }
 0x19a   :  { %v7656_v21 = vpop.eup %7655 }
 0x19b   :  { %v397_v9 = vmul.f32 %v7656_v21, %v8115_v37 }
 0x19d   :  { %6824 = vmatprep.mubr.msk.f32.mxu1 %vm189_vm1, %v397_v9 }
 0x19e   :  { %v7658_v10 = vpop.eup %7657 }
 0x19f   :  { %v398_v11 = vmul.f32 %v7658_v10, %v8110_v34 }
 0x1a1   :  { %6825 = vmatmul.mubr.msk.f32.gmra.mrb[12].mxu1 %vm189_vm1, %v398_v11 }
 0x254   :  { %v6792_v13 = vpop.f32.mrb[8].mxu0 }
 0x255   :  { %v539_v16 = vmax.f32 %v6792_v13, 0.0  ;;  %v499_v18 = vpop.f32.mrb[9].mxu0 }
 0x256   :  { %v538_v25 = vmax.f32 %v499_v18, 0.0 }
 0x257   :  { %723 = vxpose.xlu1.b32.start.end [1/1] (short) (narrow) %v539_v16, 32 }
 0x258   :  { %v6795_v20 = vpop.f32.mrb[10].mxu0  ;;  %691 = vxpose.xlu0.b32.start.end [1/1] (short) (narrow) %v538_v25, 32 }
 0x259   :  { %v509_v23 = vpop.f32.mrb[11].mxu0  ;;  %v541_v31 = vmax.f32 %v6795_v20, 0.0 }
 0x25a   :  { %v540_v28 = vmax.f32 %v509_v23, 0.0 }
 0x25c   :  { %v8244_v37 = vpop.f32.mrb[12].mxu0 }
 0x25d   :  { %v519_v24 = vpop.f32.mrb[13].mxu0 }
 0x25e   :  { %v542_v41 = vmax.f32 %v519_v24, 0.0 }
 0x260   :  { %v8246_v27 = vpop.f32.mrb[14].mxu0 }
 0x261   :  { %v529_v34 = vpop.f32.mrb[15].mxu0 }
 0x262   :  { %v544_v40 = vmax.f32 %v529_v34, 0.0 }
 0x264   :  { %755 = vxpose.xlu1.b32.start.end [1/1] (short) (narrow) %v540_v28, 32 }
 0x265   :  { %787 = vxpose.xlu0.b32.start.end [1/1] (short) (narrow) %v541_v31, 32  ;;  %v8248_v32 = vpop.f32.mrb[8].mxu1 }
 0x266   :  { %9743 = vst [vmem:[#allocation5_spill] sm:$0xff] %v8248_v32  ;;  %v8250_v33 = vpop.f32.mrb[9].mxu1 }
 0x267   :  { %9744 = vst [vmem:[#allocation6_spill] sm:$0xff] %v8250_v33 }
 0x26c   :  { %v8252_v36 = vpop.f32.mrb[10].mxu1 }
 0x26d   :  { %9745 = vst [vmem:[#allocation7_spill] sm:$0xff] %v8252_v36  ;;  %v8254_v39 = vpop.f32.mrb[11].mxu1 }
 0x26e   :  { %9746 = vst [vmem:[#allocation8_spill] sm:$0xff] %v8254_v39 }
 0x271   :  { %883 = vxpose.xlu1.b32.start.end [1/1] (short) (narrow) %v544_v40, 32 }
 0x272   :  { %819 = vxpose.xlu0.b32.start.end [1/1] (short) (narrow) %v542_v41, 32 }
 0x274   :  { %v8256_v42 = vpop.f32.mrb[12].mxu1 }
 0x275   :  { %9747 = vst [vmem:[#allocation9_spill] sm:$0xff] %v8256_v42  ;;  %v8258_v43 = vpop.f32.mrb[13].mxu1 }
 0x276   :  { %9748 = vst [vmem:[#allocation10_spill] sm:$0xff] %v8258_v43 }
 0x2d7   :  { %v8260_v44 = vpop.trf.xlu1 }
 0x2d8   :  { %v8262_v45 = vpop.trf.xlu0  ;;  %v951_v3 = vmul.f32 %v8260_v44, %v8260_v44 }
 0x2d9   :  { %v947_v46 = vmul.f32 %v8262_v45, %v8262_v45 }
 0x2da   :  { %v992_v4 = vsel %vm979_vm2, %v951_v3, 0.0 }
 0x2db   :  { %v8266_v47 = vpop.trf.xlu1  ;;  %v980_v48 = vsel %vm979_vm2, %v947_v46, 0.0 }
 0x2dc   :  { %981 = vadd.xlane.f32.xlu1 %v980_v48  ;;  %v8269_v49 = vpop.trf.xlu0  ;;  %v952_v5 = vmul.f32 %v8266_v47, %v8266_v47  ;;  %v543_v48 = vmax.f32 %v8244_v37, 0.0 }
 0x2dd   :  { %v948_v50 = vmul.f32 %v8269_v49, %v8269_v49 }
 0x2de   :  { %v995_v7 = vsel %vm979_vm2, %v952_v5, 0.0 }
 0x2df   :  { %v8273_v51 = vpop.trf.xlu1  ;;  %v983_v52 = vsel %vm979_vm2, %v948_v50, 0.0 }
 0x2e0   :  { %984 = vadd.xlane.f32.xlu0 %v983_v52  ;;  %v8276_v15 = vpop.trf.xlu0  ;;  %v953_v17 = vmul.f32 %v8273_v51, %v8273_v51 }
 0x2e1   :  { %v949_v54 = vmul.f32 %v8276_v15, %v8276_v15 }
 0x2e2   :  { %v998_v9 = vsel %vm979_vm2, %v953_v17, 0.0 }
 0x2e3   :  { %v8280_v55 = vpop.trf.xlu1  ;;  %v986_v56 = vsel %vm979_vm2, %v949_v54, 0.0 }
 0x2e4   :  { %987 = vadd.xlane.f32.xlu1 %v986_v56  ;;  %v8283_v57 = vpop.trf.xlu0 }
 0x2e5   :  { %v950_v18 = vmul.f32 %v8283_v57, %v8283_v57 }
 0x2e7   :  { %v8285_v58 = vpop.trf.xlu1  ;;  %v989_v24 = vsel %vm979_vm2, %v950_v18, 0.0 }
 0x2e8   :  { %v955_v60 = vmul.f32 %v8285_v58, %v8285_v58  ;;  %v8291_v30 = vpop.trf.xlu0 }
 0x2ea   :  { %v1004_v62 = vsel %vm979_vm2, %v955_v60, 0.0 }
 0x2eb   :  { %1005 = vadd.xlane.f32.xlu0 %v1004_v62  ;;  %v8309_v35 = vpop.trf.xlu1 }
 0x2ec   :  { %v8295_v0 = vpop.trf.xlu0  ;;  %v956_v8 = vmul.f32 %v8309_v35, %v8309_v35 }
 0x2ee   :  { %v1007_v10 = vsel %vm979_vm2, %v956_v8, 0.0 }
 0x2ef   :  { %372 = vadd.xlane.f32.xlu0 %v371_v63  ;;  %v8322_v13 = vpop.trf.xlu1 }
 0x2f0   :  { %v8299_v38 = vpop.trf.xlu0  ;;  %v957_v20 = vmul.f32 %v8322_v13, %v8322_v13 }
 0x2f1   :  { %v961_v18 = vmul.f32 %v8299_v38, %v8299_v38 }
 0x2f2   :  { %v1010_v34 = vsel %vm979_vm2, %v957_v20, 0.0 }
 0x2f3   :  { %375 = vadd.xlane.f32.xlu0 %v374_v2  ;;  %v8327_v25 = vpop.trf.xlu1  ;;  %v1022_v20 = vsel %vm979_vm2, %v961_v18, 0.0 }
 0x2f4   :  { %v8307_v6 = vpop.trf.xlu0  ;;  %v958_v52 = vmul.f32 %v8327_v25, %v8327_v25 }
 0x2f6   :  { %v1013_v59 = vsel %vm979_vm2, %v958_v52, 0.0 }
 0x2f7   :  { %993 = vadd.xlane.f32.xlu0 %v992_v4  ;;  %v8337_v31 = vpop.trf.xlu1 }
 0x2f8   :  { %v8316_v21 = vpop.trf.xlu0  ;;  %v971_v41 = vmul.f32 %v8337_v31, %v8337_v31 }
 0x2f9   :  { %v963_v11 = vmul.f32 %v8316_v21, %v8316_v21 }
 0x2fa   :  { %v1052_v46 = vsel %vm979_vm2, %v971_v41, 0.0 }
 0x2fb   :  { %996 = vadd.xlane.f32.xlu0 %v995_v7  ;;  %v1028_v16 = vsel %vm979_vm2, %v963_v11, 0.0  ;;  %v8350_v56 = vpop.trf.xlu1  ;;  %v960_v11 = vmul.f32 %v8295_v0, %v8295_v0 }
 0x2fc   :  { %v8331_v23 = vpop.trf.xlu0  ;;  %v972_v37 = vmul.f32 %v8350_v56, %v8350_v56 }
 0x2fd   :  { %v964_v28 = vmul.f32 %v8331_v23, %v8331_v23 }
 0x2fe   :  { %v1055_v26 = vsel %vm979_vm2, %v972_v37, 0.0 }
 0x2ff   :  { %999 = vadd.xlane.f32.xlu0 %v998_v9  ;;  %v1031_v40 = vsel %vm979_vm2, %v964_v28, 0.0  ;;  %v8358_v63 = vpop.trf.xlu1  ;;  %v954_v9 = vmul.f32 %v8280_v55, %v8280_v55  ;;  %v545_v28 = vmax.f32 %v8246_v27, 0.0 }
 0x300   :  { %v8344_v50 = vpop.trf.xlu0  ;;  %v973_v4 = vmul.f32 %v8358_v63, %v8358_v63 }
 0x301   :  { %v965_v54 = vmul.f32 %v8344_v50, %v8344_v50 }
 0x302   :  { %v1058_v7 = vsel %vm979_vm2, %v973_v4, 0.0 }
 0x303   :  { %1008 = vadd.xlane.f32.xlu0 %v1007_v10  ;;  %v1034_v60 = vsel %vm979_vm2, %v965_v54, 0.0  ;;  %v8366_v5 = vpop.trf.xlu1  ;;  %v1001_v10 = vsel %vm979_vm2, %v954_v9, 0.0 }
 0x304   :  { %v8356_v62 = vpop.trf.xlu0  ;;  %v974_v17 = vmul.f32 %v8366_v5, %v8366_v5 }
 0x305   :  { %v966_v2 = vmul.f32 %v8356_v62, %v8356_v62 }
 0x306   :  { %v1061_v8 = vsel %vm979_vm2, %v974_v17, 0.0 }
 0x307   :  { %1029 = vadd.xlane.f32.xlu0 %v1028_v16  ;;  %v1037_v3 = vsel %vm979_vm2, %v966_v2, 0.0  ;;  %v1019_v16 = vsel %vm979_vm2, %v960_v11, 0.0 }
 0x30b   :  { %990 = vadd.xlane.f32.xlu0 %v989_v24  ;;  %v962_v24 = vmul.f32 %v8307_v6, %v8307_v6 }
 0x30f   :  { %1011 = vadd.xlane.f32.xlu0 %v1010_v34  ;;  %v1025_v34 = vsel %vm979_vm2, %v962_v24, 0.0 }
 0x313   :  { %1032 = vadd.xlane.f32.xlu0 %v1031_v40 }
 0x317   :  { %851 = vxpose.xlu1.b32.start.end [1/1] (short) (narrow) %v543_v48, 32  ;;  %1053 = vadd.xlane.f32.xlu0 %v1052_v46 }
 0x31b   :  { %1014 = vadd.xlane.f32.xlu0 %v1013_v59 }
 0x31f   :  { %1035 = vadd.xlane.f32.xlu0 %v1034_v60 }
 0x323   :  { %1056 = vadd.xlane.f32.xlu0 %v1055_v26 }
 0x327   :  { %1038 = vadd.xlane.f32.xlu0 %v1037_v3 }
 0x32b   :  { %1059 = vadd.xlane.f32.xlu0 %v1058_v7 }
 0x32f   :  { %1062 = vadd.xlane.f32.xlu0 %v1061_v8 }
 0x34a   :  { %1002 = vadd.xlane.f32.xlu1 %v1001_v10 }
 0x34e   :  { %1020 = vadd.xlane.f32.xlu1 %v1019_v16 }
 0x352   :  { %1023 = vadd.xlane.f32.xlu1 %v1022_v20 }
 0x356   :  { %1026 = vadd.xlane.f32.xlu1 %v1025_v34  ;;  %v959_v34 = vmul.f32 %v8291_v30, %v8291_v30 }
 0x35c   :  { %915 = vxpose.xlu0.b32.start.end [1/1] (short) (narrow) %v545_v28, 32 }
 0x369   :  { %v982_v40 = vpop.xlane.xlu1 %981 }
 0x36a   :  { %v1076_v41 = vmax.f32 %v982_v40, 1e-24 }
 0x36c   :  { %7659 = vrsqrt.f32 %v1076_v41  ;;  %v1016_v41 = vsel %vm979_vm2, %v959_v34, 0.0 }
 0x36d   :  { %v985_v46 = vpop.xlane.xlu0 %984 }
 0x36e   :  { %v1077_v48 = vmax.f32 %v985_v46, 1e-24 }
 0x370   :  { %7661 = vrsqrt.f32 %v1077_v48 }
 0x371   :  { %v988_v52 = vpop.xlane.xlu1 %987 }
 0x372   :  { %v1078_v54 = vmax.f32 %v988_v52, 1e-24 }
 0x374   :  { %7663 = vrsqrt.f32 %v1078_v54 }
 0x376   :  { %v7660_v59 = vpop.eup %7659 }
 0x377   :  { %v1140_v60 = vmul.f32 %v7660_v59, %v8262_v45 }
 0x378   :  { %v1006_v37 = vpop.xlane.xlu0 %1005 }
 0x379   :  { %6832 = vmatprep.mubr.msk.f32.mxu0 %vm979_vm2, %v1140_v60  ;;  %v1084_v48 = vmax.f32 %v1006_v37, 1e-24 }
 0x37a   :  { %v7662_v26 = vpop.eup %7661 }
 0x37b   :  { %v1141_v2 = vmul.f32 %v7662_v26, %v8269_v49 }
 0x37c   :  { %v373_v27 = vpop.xlane.xlu0 %372 }
 0x37d   :  { %v383_v3 = vmax.f32 %v373_v27, 1e-24  ;;  %6833 = vmatmul.mubr.msk.f32.vlgmr.msra.gmra.mrb[16].mxu0 %vm979_vm2, %v1141_v2 }
 0x37e   :  { %v7664_v4 = vpop.eup %7663  ;;  %6847 = vmatpush3.msra.mxu0 %v8196_v53 }
 0x37f   :  { %7665 = vrsqrt.f32 %v383_v3  ;;  %6862 = vmatprep.subr.mxu0 %v8206_v22  ;;  %v1142_v7 = vmul.f32 %v7664_v4, %v8276_v15 }
 0x380   :  { %v376_v17 = vpop.xlane.xlu0 %375 }
 0x381   :  { %v384_v45 = vmax.f32 %v376_v17, 1e-24  ;;  %6835 = vmatprep.mubr.msk.f32.mxu0 %vm979_vm2, %v1142_v7 }
 0x383   :  { %7667 = vrsqrt.f32 %v384_v45 }
 0x384   :  { %v994_v8 = vpop.xlane.xlu0 %993 }
 0x385   :  { %v1080_v9 = vmax.f32 %v994_v8, 1e-24 }
 0x387   :  { %7669 = vrsqrt.f32 %v1080_v9 }
 0x388   :  { %v997_v49 = vpop.xlane.xlu0 %996 }
 0x389   :  { %v7666_v10 = vpop.eup %7665  ;;  %v1081_v11 = vmax.f32 %v997_v49, 1e-24 }
 0x38a   :  { %v399_v16 = vmul.f32 %v7666_v10, %v8242_v12 }
 0x38b   :  { %7671 = vrsqrt.f32 %v1081_v11 }
 0x38c   :  { %6827 = vmatprep.mubr.msk.f32.mxu1 %vm189_vm1, %v399_v16  ;;  %v1000_v53 = vpop.xlane.xlu0 %999 }
 0x38d   :  { %v7668_v18 = vpop.eup %7667  ;;  %v1082_v20 = vmax.f32 %v1000_v53, 1e-24 }
 0x38e   :  { %v400_v15 = vmul.f32 %v7668_v18, %v8240_v29 }
 0x38f   :  { %7673 = vrsqrt.f32 %v1082_v20 }
 0x390   :  { %6828 = vmatmul.mubr.msk.f32.gmra.mrb[14].mxu1 %vm189_vm1, %v400_v15  ;;  %v1009_v24 = vpop.xlane.xlu0 %1008  ;;  %7675 = vrsqrt.f32 %v1084_v48 }
 0x391   :  { %v7670_v28 = vpop.eup %7669 }
 0x392   :  { %v1144_v40 = vmul.f32 %v7670_v28, %v8260_v44  ;;  %v1085_v44 = vmax.f32 %v1009_v24, 1e-24 }
 0x394   :  { %6840 = vmatprep.mubr.msk.f32.mxu1 %vm979_vm2, %v1144_v40  ;;  %v1030_v12 = vpop.xlane.xlu0 %1029 }
 0x395   :  { %v7672_v46 = vpop.eup %7671  ;;  %1017 = vadd.xlane.f32.xlu0 %v1016_v41  ;;  %v1092_v16 = vmax.f32 %v1030_v12, 1e-24 }
 0x396   :  { %v1145_v29 = vmul.f32 %v7672_v46, %v8266_v47 }
 0x397   :  { %v8403_v52 = vpop.trf.xlu1 }
 0x398   :  { %6841 = vmatmul.mubr.msk.f32.vlgmr.msra.gmra.mrb[16].mxu1 %vm979_vm2, %v1145_v29  ;;  %v991_v54 = vpop.xlane.xlu0 %990  ;;  %v967_v59 = vmul.f32 %v8403_v52, %v8403_v52 }
 0x399   :  { %v7674_v60 = vpop.eup %7673  ;;  %6855 = vmatpush3.msra.mxu1 %v8203_v14  ;;  %v1079_v26 = vmax.f32 %v991_v54, 1e-24 }
 0x39a   :  { %6870 = vmatprep.subr.mxu1 %v8213_v61  ;;  %v1040_v37 = vsel %vm979_vm2, %v967_v59, 0.0  ;;  %v1146_v47 = vmul.f32 %v7674_v60, %v8273_v51  ;;  %v7676_v9 = vpop.eup %7675 }
 0x39b   :  { %7677 = vrsqrt.f32 %v1079_v26  ;;  %v8412_v2 = vpop.trf.xlu1  ;;  %1041 = vadd.xlane.f32.xlu1 %v1040_v37  ;;  %v1148_v15 = vmul.f32 %v7676_v9, %v8285_v58 }
 0x39c   :  { %6843 = vmatprep.mubr.msk.f32.mxu1 %vm979_vm2, %v1146_v47  ;;  %v1012_v27 = vpop.xlane.xlu0 %1011  ;;  %v968_v3 = vmul.f32 %v8412_v2, %v8412_v2  ;;  %7679 = vrsqrt.f32 %v1085_v44 }
 0x39d   :  { %v1086_v14 = vmax.f32 %v1012_v27, 1e-24 }
 0x39e   :  { %v1043_v4 = vsel %vm979_vm2, %v968_v3, 0.0 }
 0x39f   :  { %7681 = vrsqrt.f32 %v1086_v14  ;;  %v8418_v7 = vpop.trf.xlu1  ;;  %1044 = vadd.xlane.f32.xlu1 %v1043_v4 }
 0x3a0   :  { %v1033_v17 = vpop.xlane.xlu0 %1032  ;;  %v969_v51 = vmul.f32 %v8418_v7, %v8418_v7  ;;  %7683 = vrsqrt.f32 %v1092_v16 }
 0x3a1   :  { %v1093_v28 = vmax.f32 %v1033_v17, 1e-24 }
 0x3a2   :  { %v1046_v45 = vsel %vm979_vm2, %v969_v51, 0.0 }
 0x3a3   :  { %v8423_v8 = vpop.trf.xlu1  ;;  %1047 = vadd.xlane.f32.xlu1 %v1046_v45 }
 0x3a4   :  { %v1054_v49 = vpop.xlane.xlu0 %1053  ;;  %v970_v10 = vmul.f32 %v8423_v8, %v8423_v8 }
 0x3a5   :  { %v7678_v11 = vpop.eup %7677  ;;  %v1100_v48 = vmax.f32 %v1054_v49, 1e-24 }
 0x3a6   :  { %v1049_v53 = vsel %vm979_vm2, %v970_v10, 0.0  ;;  %v1143_v18 = vmul.f32 %v7678_v11, %v8283_v57  ;;  %v7680_v20 = vpop.eup %7679 }
 0x3a7   :  { %1050 = vadd.xlane.f32.xlu1 %v1049_v53  ;;  %v1149_v41 = vmul.f32 %v7680_v20, %v8309_v35 }
 0x3a8   :  { %6836 = vmatmul.mubr.msk.f32.gmra.mrb[18].mxu0 %vm979_vm2, %v1143_v18  ;;  %v1015_v24 = vpop.xlane.xlu0 %1014 }
 0x3a9   :  { %v7682_v34 = vpop.eup %7681  ;;  %v1087_v40 = vmax.f32 %v1015_v24, 1e-24  ;;  %6848 = vmatprep.mubr.msk.f32.mxu0 %vm979_vm2, %v1148_v15 }
 0x3aa   :  { %v1150_v12 = vmul.f32 %v7682_v34, %v8322_v13  ;;  %v7684_v29 = vpop.eup %7683 }
 0x3ab   :  { %7685 = vrsqrt.f32 %v1087_v40 }
 0x3ac   :  { %6849 = vmatmul.mubr.msk.f32.vlgmr.msra.gmra.mrb[20].mxu0 %vm979_vm2, %v1149_v41  ;;  %v1036_v57 = vpop.xlane.xlu0 %1035  ;;  %7687 = vrsqrt.f32 %v1093_v28 }
 0x3ad   :  { %6863 = vmatpush3.msra.mxu0 %v8206_v22  ;;  %v1094_v58 = vmax.f32 %v1036_v57, 1e-24  ;;  %6851 = vmatprep.mubr.msk.f32.mxu0 %vm979_vm2, %v1150_v12  ;;  %v1156_v22 = vmul.f32 %v7684_v29, %v8316_v21 }
 0x3ae   :  { %6878 = vmatprep.subr.mxu0 %v8216_v19 }
 0x3af   :  { %7689 = vrsqrt.f32 %v1094_v58 }
 0x3b0   :  { %v1057_v46 = vpop.xlane.xlu0 %1056  ;;  %7691 = vrsqrt.f32 %v1100_v48 }
 0x3b1   :  { %v1101_v59 = vmax.f32 %v1057_v46, 1e-24 }
 0x3b4   :  { %v1039_v35 = vpop.xlane.xlu0 %1038 }
 0x3b5   :  { %v7686_v54 = vpop.eup %7685  ;;  %v1095_v13 = vmax.f32 %v1039_v35, 1e-24 }
 0x3b6   :  { %v1151_v60 = vmul.f32 %v7686_v54, %v8327_v25  ;;  %v7688_v44 = vpop.eup %7687 }
 0x3b7   :  { %7693 = vrsqrt.f32 %v1095_v13  ;;  %v1157_v27 = vmul.f32 %v7688_v44, %v8331_v23 }
 0x3b8   :  { %6852 = vmatmul.mubr.msk.f32.gmra.mrb[22].mxu0 %vm979_vm2, %v1151_v60  ;;  %v1060_v26 = vpop.xlane.xlu0 %1059  ;;  %7695 = vrsqrt.f32 %v1101_v59 }
 0x3b9   :  { %v7690_v37 = vpop.eup %7689  ;;  %v1102_v47 = vmax.f32 %v1060_v26, 1e-24  ;;  %6864 = vmatprep.mubr.msk.f32.mxu0 %vm979_vm2, %v1156_v22 }
 0x3ba   :  { %v1158_v3 = vmul.f32 %v7690_v37, %v8344_v50  ;;  %v7692_v21 = vpop.eup %7691 }
 0x3bb   :  { %7697 = vrsqrt.f32 %v1102_v47  ;;  %v1164_v45 = vmul.f32 %v7692_v21, %v8337_v31 }
 0x3bc   :  { %6865 = vmatmul.mubr.msk.f32.vlgmr.msra.gmra.mrb[24].mxu0 %vm979_vm2, %v1157_v27  ;;  %v1063_v25 = vpop.xlane.xlu0 %1062 }
 0x3bd   :  { %6879 = vmatpush3.msra.mxu0 %v8216_v19  ;;  %v1103_v14 = vmax.f32 %v1063_v25, 1e-24  ;;  %6867 = vmatprep.mubr.msk.f32.mxu0 %vm979_vm2, %v1158_v3 }
 0x3bf   :  { %7699 = vrsqrt.f32 %v1103_v14 }
 0x3c1   :  { %v7694_v4 = vpop.eup %7693 }
 0x3c2   :  { %v1159_v17 = vmul.f32 %v7694_v4, %v8356_v62  ;;  %v7696_v51 = vpop.eup %7695 }
 0x3c3   :  { %v1165_v50 = vmul.f32 %v7696_v51, %v8350_v56 }
 0x3c4   :  { %6868 = vmatmul.mubr.msk.f32.gmra.mrb[26].mxu0 %vm979_vm2, %v1159_v17 }
 0x3c5   :  { %v7698_v23 = vpop.eup %7697  ;;  %6880 = vmatprep.mubr.msk.f32.mxu0 %vm979_vm2, %v1164_v45 }
 0x3c6   :  { %v1166_v19 = vmul.f32 %v7698_v23, %v8358_v63 }
 0x3c8   :  { %6881 = vmatmul.mubr.msk.f32.vlgmr.msra.gmra.mrb[28].mxu0 %vm979_vm2, %v1165_v50 }
 0x3c9   :  { %v7700_v9 = vpop.eup %7699  ;;  %6883 = vmatprep.mubr.msk.f32.mxu0 %vm979_vm2, %v1166_v19 }
 0x3ca   :  { %v1167_v49 = vmul.f32 %v7700_v9, %v8366_v5 }
 0x3cc   :  { %6884 = vmatmul.mubr.msk.f32.gmra.mrb[30].mxu0 %vm979_vm2, %v1167_v49 }
 0x3d7   :  { %v1003_v62 = vpop.xlane.xlu1 %1002 }
 0x3d8   :  { %v1083_v31 = vmax.f32 %v1003_v62, 1e-24 }
 0x3da   :  { %7701 = vrsqrt.f32 %v1083_v31 }
 0x3db   :  { %v1021_v41 = vpop.xlane.xlu1 %1020 }
 0x3dc   :  { %v8457_v10 = vpop.trf.xlu0  ;;  %v1089_v57 = vmax.f32 %v1021_v41, 1e-24 }
 0x3dd   :  { %v975_v11 = vmul.f32 %v8457_v10, %v8457_v10 }
 0x3de   :  { %7703 = vrsqrt.f32 %v1089_v57 }
 0x3df   :  { %v1064_v56 = vsel %vm979_vm2, %v975_v11, 0.0  ;;  %v1024_v12 = vpop.xlane.xlu1 %1023 }
 0x3e0   :  { %1065 = vadd.xlane.f32.xlu1 %v1064_v56  ;;  %v8462_v63 = vpop.trf.xlu0 }
 0x3e1   :  { %v976_v16 = vmul.f32 %v8462_v63, %v8462_v63 }
 0x3e3   :  { %v1067_v5 = vsel %vm979_vm2, %v976_v16, 0.0  ;;  %v1027_v58 = vpop.xlane.xlu1 %1026 }
 0x3e4   :  { %v7702_v53 = vpop.eup %7701  ;;  %1068 = vadd.xlane.f32.xlu1 %v1067_v5  ;;  %v8467_v18 = vpop.trf.xlu0  ;;  %v1091_v29 = vmax.f32 %v1027_v58, 1e-24 }
 0x3e5   :  { %v1147_v20 = vmul.f32 %v7702_v53, %v8280_v55  ;;  %v977_v15 = vmul.f32 %v8467_v18, %v8467_v18  ;;  %v1090_v55 = vmax.f32 %v1024_v12, 1e-24 }
 0x3e7   :  { %6844 = vmatmul.mubr.msk.f32.gmra.mrb[18].mxu1 %vm979_vm2, %v1147_v20  ;;  %v1070_v24 = vsel %vm979_vm2, %v977_v15, 0.0  ;;  %7705 = vrsqrt.f32 %v1090_v55 }
 0x3e8   :  { %1071 = vadd.xlane.f32.xlu1 %v1070_v24  ;;  %v8474_v34 = vpop.trf.xlu0  ;;  %v7704_v13 = vpop.eup %7703 }
 0x3e9   :  { %v978_v28 = vmul.f32 %v8474_v34, %v8474_v34  ;;  %v1153_v47 = vmul.f32 %v7704_v13, %v8295_v0 }
 0x3eb   :  { %v1073_v40 = vsel %vm979_vm2, %v978_v28, 0.0 }
 0x3ec   :  { %1074 = vadd.xlane.f32.xlu1 %v1073_v40 }
 0x3f1   :  { %v7706_v44 = vpop.eup %7705 }
 0x3f2   :  { %v1154_v25 = vmul.f32 %v7706_v44, %v8299_v38 }
 0x422   :  { %v1018_v46 = vpop.xlane.xlu0 %1017 }
 0x423   :  { %v1088_v48 = vmax.f32 %v1018_v46, 1e-24 }
 0x425   :  { %7707 = vrsqrt.f32 %v1088_v48 }
 0x426   :  { %7709 = vrsqrt.f32 %v1091_v29 }
 0x428   :  { %v1042_v35 = vpop.xlane.xlu1 %1041 }
 0x429   :  { %v1096_v54 = vmax.f32 %v1042_v35, 1e-24 }
 0x42b   :  { %7711 = vrsqrt.f32 %v1096_v54 }
 0x42c   :  { %v1045_v59 = vpop.xlane.xlu1 %1044 }
 0x42d   :  { %v1097_v60 = vmax.f32 %v1045_v59, 1e-24 }
 0x42f   :  { %v7708_v22 = vpop.eup %7707  ;;  %7713 = vrsqrt.f32 %v1097_v60 }
 0x430   :  { %v1048_v26 = vpop.xlane.xlu1 %1047  ;;  %v1152_v37 = vmul.f32 %v7708_v22, %v8291_v30  ;;  %v7710_v3 = vpop.eup %7709 }
 0x431   :  { %v1098_v27 = vmax.f32 %v1048_v26, 1e-24  ;;  %v1155_v30 = vmul.f32 %v7710_v3, %v8307_v6 }
 0x432   :  { %6856 = vmatprep.mubr.msk.f32.mxu1 %vm979_vm2, %v1152_v37 }
 0x433   :  { %7715 = vrsqrt.f32 %v1098_v27  ;;  %6857 = vmatmul.mubr.msk.f32.vlgmr.msra.gmra.mrb[20].mxu1 %vm979_vm2, %v1153_v47 }
 0x434   :  { %6871 = vmatpush3.msra.mxu1 %v8213_v61  ;;  %v1051_v14 = vpop.xlane.xlu1 %1050  ;;  %6859 = vmatprep.mubr.msk.f32.mxu1 %vm979_vm2, %v1154_v25  ;;  %v3037_v25 = vld [vmem:[%s9712_s6] sm:$0xff] }
 0x435   :  { %v7712_v21 = vpop.eup %7711  ;;  %v1099_v4 = vmax.f32 %v1051_v14, 1e-24  ;;  %6886 = vmatprep.subr.mxu1 %v8223_v1  ;;  %v3038_v14 = vld [vmem:[%s9712_s6 + $0x8] sm:$0xff] }
 0x436   :  { %v1160_v0 = vmul.f32 %v7712_v21, %v8403_v52  ;;  %v7474_v21 = vpack.c.bf16 %v3038_v14, %v3037_v25 }
 0x437   :  { %7717 = vrsqrt.f32 %v1099_v4  ;;  %6860 = vmatmul.mubr.msk.f32.gmra.mrb[22].mxu1 %vm979_vm2, %v1155_v30  ;;  %v3039_v4 = vld [vmem:[%s9712_s6 + $0x10] sm:$0xff]  ;;  %v3040_v30 = vld [vmem:[%s9712_s6 + $0x18] sm:$0xff] }
 0x438   :  { %6872 = vmatprep.mubr.msk.f32.mxu1 %vm979_vm2, %v1160_v0  ;;  %v7478_v0 = vpack.c.bf16 %v3040_v30, %v3039_v4 }
 0x439   :  { %v7714_v38 = vpop.eup %7713 }
 0x43a   :  { %v1161_v17 = vmul.f32 %v7714_v38, %v8412_v2  ;;  %v3041_v38 = vld [vmem:[%s9712_s6 + $0x20] sm:$0xff] }
 0x43c   :  { %6873 = vmatmul.mubr.msk.f32.vlgmr.msra.gmra.mrb[24].mxu1 %vm979_vm2, %v1161_v17  ;;  %v3042_v17 = vld [vmem:[%s9712_s6 + $0x28] sm:$0xff] }
 0x43d   :  { %v7716_v61 = vpop.eup %7715  ;;  %6887 = vmatpush3.msra.mxu1 %v8223_v1 }
 0x43e   :  { %v1162_v51 = vmul.f32 %v7716_v61, %v8418_v7  ;;  %v7482_v61 = vpack.c.bf16 %v3042_v17, %v3041_v38 }
 0x440   :  { %6875 = vmatprep.mubr.msk.f32.mxu1 %vm979_vm2, %v1162_v51 }
 0x441   :  { %v7718_v6 = vpop.eup %7717 }
 0x442   :  { %v1163_v52 = vmul.f32 %v7718_v6, %v8423_v8  ;;  %v3043_v6 = vld [vmem:[%s9712_s6 + $0x30] sm:$0xff] }
 0x444   :  { %6876 = vmatmul.mubr.msk.f32.gmra.mrb[26].mxu1 %vm979_vm2, %v1163_v52  ;;  %v3044_v52 = vld [vmem:[%s9712_s6 + $0x38] sm:$0xff] }
 0x450   :  { %v8498_v45 = vpop.f32.mrb[16].mxu0 }
 0x451   :  { %v8500_v23 = vpop.f32.mrb[17].mxu0 }
 0x452   :  { %v7378_v1 = vpack.c.bf16 %v8498_v45, %v8500_v23  ;;  %6902 = vmatprep.mubr.msk.f32.mxu0 %vm189_vm1, %v8500_v23 }
 0x454   :  { %7380 = vmatprep.subr.msk.bf16.mxu0 %vm8504_vm3, %v7378_v1 }
 0x455   :  { %7383 = vmatpush3.bf16.xpose.msk.msra.mxu0 %vm8504_vm3, %v7378_v1 }
 0x463   :  { %v8516_v7 = vpop.f32.mrb[14].mxu1 }
 0x464   :  { %9751 = vst [vmem:[#allocation11_spill] sm:$0xff] %v8516_v7  ;;  %v8518_v8 = vpop.f32.mrb[15].mxu1 }
 0x465   :  { %9752 = vst [vmem:[#allocation12_spill] sm:$0xff] %v8518_v8 }
 0x46b   :  { %v8520_v50 = vpop.f32.mrb[16].mxu1 }
 0x46c   :  { %v8522_v19 = vpop.f32.mrb[17].mxu1 }
 0x46d   :  { %v7390_v9 = vpack.c.bf16 %v8520_v50, %v8522_v19  ;;  %v1066_v49 = vpop.xlane.xlu1 %1065 }
 0x46e   :  { %v1104_v62 = vmax.f32 %v1066_v49, 1e-24  ;;  %v7486_v49 = vpack.c.bf16 %v3044_v52, %v3043_v6 }
 0x46f   :  { %7392 = vmatprep.subr.msk.bf16.mxu1 %vm8504_vm3, %v7390_v9 }
 0x470   :  { %7719 = vrsqrt.f32 %v1104_v62 }
 0x471   :  { %v1069_v31 = vpop.xlane.xlu1 %1068 }
 0x472   :  { %v1105_v11 = vmax.f32 %v1069_v31, 1e-24 }
 0x474   :  { %7721 = vrsqrt.f32 %v1105_v11 }
 0x475   :  { %v1072_v56 = vpop.xlane.xlu1 %1071 }
 0x476   :  { %v1106_v16 = vmax.f32 %v1072_v56, 1e-24 }
 0x478   :  { %7723 = vrsqrt.f32 %v1106_v16 }
 0x479   :  { %v1075_v5 = vpop.xlane.xlu1 %1074 }
 0x47a   :  { %v7720_v53 = vpop.eup %7719  ;;  %v1107_v20 = vmax.f32 %v1075_v5, 1e-24 }
 0x47b   :  { %v8528_v15 = vpop.f32.mrb[18].mxu0  ;;  %v1168_v24 = vmul.f32 %v7720_v53, %v8457_v10 }
 0x47c   :  { %7725 = vrsqrt.f32 %v1107_v20  ;;  %v8531_v28 = vpop.f32.mrb[19].mxu0 }
 0x47d   :  { %v7384_v40 = vpack.c.bf16 %v8528_v15, %v8531_v28  ;;  %6888 = vmatprep.mubr.msk.f32.mxu1 %vm979_vm2, %v1168_v24 }
 0x47e   :  { %v7722_v41 = vpop.eup %7721 }
 0x47f   :  { %v1169_v12 = vmul.f32 %v7722_v41, %v8462_v63  ;;  %v8537_v57 = vpop.f32.mrb[20].mxu0  ;;  %7386 = vmatprep.subr.msk.bf16.mxu0 %vm8504_vm3, %v7384_v40 }
 0x480   :  { %v8541_v55 = vpop.f32.mrb[21].mxu0  ;;  %7389 = vmatpush3.bf16.xpose.msk.msra.mxu0 %vm8504_vm3, %v7384_v40 }
 0x481   :  { %v7402_v10 = vpack.c.bf16 %v8537_v57, %v8541_v55  ;;  %6889 = vmatmul.mubr.msk.f32.vlgmr.msra.gmra.mrb[28].mxu1 %vm979_vm2, %v1169_v12 }
 0x482   :  { %7395 = vmatpush3.bf16.xpose.msk.msra.mxu1 %vm8504_vm3, %v7390_v9  ;;  %v7724_v58 = vpop.eup %7723 }
 0x483   :  { %7404 = vmatprep.subr.msk.bf16.mxu0 %vm8504_vm3, %v7402_v10  ;;  %v1170_v63 = vmul.f32 %v7724_v58, %v8467_v18 }
 0x485   :  { %6891 = vmatprep.mubr.msk.f32.mxu1 %vm979_vm2, %v1170_v63 }
 0x486   :  { %v7726_v46 = vpop.eup %7725 }
 0x487   :  { %6903 = vmatmul.mubr.msk.f32.vlgmr.msra.gmra.mrb[32].mxu0 %vm189_vm1, %v8498_v45  ;;  %v1171_v48 = vmul.f32 %v7726_v46, %v8474_v34 }
 0x488   :  { %6905 = vmatprep.mubr.msk.f32.mxu0 %vm189_vm1, %v8531_v28  ;;  %7407 = vmatpush3.bf16.xpose.msk.msra.mxu0 %vm8504_vm3, %v7402_v10 }
 0x489   :  { %6892 = vmatmul.mubr.msk.f32.gmra.mrb[30].mxu1 %vm979_vm2, %v1171_v48 }
 0x48a   :  { %6916 = vmatprep.mubr.msk.f32.mxu1 %vm189_vm1, %v8522_v19 }
 0x48b   :  { %v8564_v18 = vpop.f32.mrb[22].mxu0  ;;  %6906 = vmatmul.mubr.msk.f32.gmra.mrb[34].mxu0 %vm189_vm1, %v8528_v15 }
 0x48c   :  { %v8568_v29 = vpop.f32.mrb[23].mxu0  ;;  %6930 = vmatprep.mubr.msk.f32.mxu0 %vm189_vm1, %v8541_v55 }
 0x48d   :  { %v7408_v34 = vpack.c.bf16 %v8564_v18, %v8568_v29 }
 0x48f   :  { %v8574_v35 = vpop.f32.mrb[24].mxu0  ;;  %7410 = vmatprep.subr.msk.bf16.mxu0 %vm8504_vm3, %v7408_v34 }
 0x490   :  { %v8578_v54 = vpop.f32.mrb[25].mxu0  ;;  %7413 = vmatpush3.bf16.xpose.msk.msra.mxu0 %vm8504_vm3, %v7408_v34 }
 0x491   :  { %v7426_v59 = vpack.c.bf16 %v8574_v35, %v8578_v54 }
 0x493   :  { %7428 = vmatprep.subr.msk.bf16.mxu0 %vm8504_vm3, %v7426_v59 }
 0x497   :  { %v8586_v13 = vpop.f32.mrb[26].mxu0  ;;  %6931 = vmatmul.mubr.msk.f32.vlgmr.msra.gmra.mrb[36].mxu0 %vm189_vm1, %v8537_v57 }
 0x498   :  { %v8590_v60 = vpop.f32.mrb[27].mxu0  ;;  %6933 = vmatprep.mubr.msk.f32.mxu0 %vm189_vm1, %v8568_v29  ;;  %7431 = vmatpush3.bf16.xpose.msk.msra.mxu0 %vm8504_vm3, %v7426_v59 }
 0x499   :  { %v7432_v44 = vpack.c.bf16 %v8586_v13, %v8590_v60 }
 0x49b   :  { %v8598_v22 = vpop.f32.mrb[28].mxu0  ;;  %6934 = vmatmul.mubr.msk.f32.gmra.mrb[38].mxu0 %vm189_vm1, %v8564_v18  ;;  %7434 = vmatprep.subr.msk.bf16.mxu0 %vm8504_vm3, %v7432_v44 }
 0x49c   :  { %v8604_v26 = vpop.f32.mrb[29].mxu0  ;;  %6958 = vmatprep.mubr.msk.f32.mxu0 %vm189_vm1, %v8578_v54 }
 0x49d   :  { %v7450_v37 = vpack.c.bf16 %v8598_v22, %v8604_v26 }
 0x49f   :  { %v8610_v47 = vpop.f32.mrb[30].mxu0 }
 0x4a0   :  { %v8612_v27 = vpop.f32.mrb[31].mxu0  ;;  %7437 = vmatpush3.bf16.xpose.msk.msra.mxu0 %vm8504_vm3, %v7432_v44 }
 0x4a1   :  { %v7456_v3 = vpack.c.bf16 %v8610_v47, %v8612_v27  ;;  %7452 = vmatprep.subr.msk.bf16.mxu0 %vm8504_vm3, %v7450_v37 }
 0x4a7   :  { %6959 = vmatmul.mubr.msk.f32.vlgmr.msra.gmra.mrb[40].mxu0 %vm189_vm1, %v8574_v35 }
 0x4a8   :  { %6961 = vmatprep.mubr.msk.f32.mxu0 %vm189_vm1, %v8590_v60  ;;  %7455 = vmatpush3.bf16.xpose.msk.msra.mxu0 %vm8504_vm3, %v7450_v37 }
 0x4a9   :  { %7458 = vmatprep.subr.msk.bf16.mxu0 %vm8504_vm3, %v7456_v3 }
 0x4ab   :  { %6962 = vmatmul.mubr.msk.f32.gmra.mrb[42].mxu0 %vm189_vm1, %v8586_v13 }
 0x4ac   :  { %6986 = vmatprep.mubr.msk.f32.mxu0 %vm189_vm1, %v8604_v26 }
 0x4b0   :  { %7461 = vmatpush3.bf16.xpose.msk.msra.mxu0 %vm8504_vm3, %v7456_v3 }
 0x4b1   :  { %7475 = vmatprep.subr.bf16.mxu0 %v7474_v21 }
 0x4b7   :  { %6987 = vmatmul.mubr.msk.f32.vlgmr.msra.gmra.mrb[44].mxu0 %vm189_vm1, %v8598_v22 }
 0x4b8   :  { %6989 = vmatprep.mubr.msk.f32.mxu0 %vm189_vm1, %v8612_v27  ;;  %7477 = vmatpush3.bf16.msra.mxu0 %v7474_v21 }
 0x4b9   :  { %7479 = vmatprep.subr.bf16.mxu0 %v7478_v0 }
 0x4ba   :  { %v6845_v51 = vpop.f32.mrb[18].mxu1 }
 0x4bb   :  { %v1446_v1 = vpop.f32.mrb[19].mxu1  ;;  %6990 = vmatmul.mubr.msk.f32.gmra.mrb[46].mxu0 %vm189_vm1, %v8610_v47 }
 0x4bc   :  { %v7396_v9 = vpack.c.bf16 %v6845_v51, %v1446_v1  ;;  %7481 = vmatpush3.bf16.msra.mxu0 %v7478_v0  ;;  %7022 = vmatprep.mubr.msk.f32.mxu0 %vm189_vm1, %v8500_v23 }
 0x4bd   :  { %7483 = vmatprep.subr.bf16.mxu0 %v7482_v61 }
 0x4be   :  { %7398 = vmatprep.subr.msk.bf16.mxu1 %vm8504_vm3, %v7396_v9 }
 0x4bf   :  { %7401 = vmatpush3.bf16.xpose.msk.msra.mxu1 %vm8504_vm3, %v7396_v9 }
 0x4c0   :  { %7485 = vmatpush3.bf16.msra.mxu0 %v7482_v61 }
 0x4c1   :  { %7487 = vmatprep.subr.bf16.mxu0 %v7486_v49 }
 0x4c4   :  { %7489 = vmatpush3.bf16.msra.mxu0 %v7486_v49 }
 0x4c6   :  { %6917 = vmatmul.mubr.msk.f32.vlgmr.msra.gmra.mrb[32].mxu1 %vm189_vm1, %v8520_v50 }
 0x4c7   :  { %6919 = vmatprep.mubr.msk.f32.mxu1 %vm189_vm1, %v1446_v1  ;;  %7023 = vmatmul.mubr.msk.f32.vlgmr.msra.gmra.mrb[48].mxu0 %vm189_vm1, %v8498_v45 }
 0x4c8   :  { %7025 = vmatprep.mubr.msk.f32.mxu0 %vm189_vm1, %v8531_v28 }
 0x4ca   :  { %6920 = vmatmul.mubr.msk.f32.gmra.mrb[34].mxu1 %vm189_vm1, %v6845_v51 }
 0x4cb   :  { %7026 = vmatmul.mubr.msk.f32.gmra.mrb[50].mxu0 %vm189_vm1, %v8528_v15 }
 0x4cc   :  { %7028 = vmatprep.mubr.msk.f32.mxu0 %vm189_vm1, %v8522_v19 }
 0x4cf   :  { %7029 = vmatmul.mubr.msk.f32.gmra.mrb[52].mxu0 %vm189_vm1, %v8520_v50 }
 0x4d0   :  { %7031 = vmatprep.mubr.msk.f32.mxu0 %vm189_vm1, %v1446_v1 }
 0x4d3   :  { %7032 = vmatmul.mubr.msk.f32.gmra.mrb[54].mxu0 %vm189_vm1, %v6845_v51 }
 0x4d4   :  { %7034 = vmatprep.mubr.msk.f32.mxu0 %vm189_vm1, %v8541_v55 }
 0x4d7   :  { %7035 = vmatmul.mubr.msk.f32.gmra.mrb[56].mxu0 %vm189_vm1, %v8537_v57 }
 0x4d8   :  { %7037 = vmatprep.mubr.msk.f32.mxu0 %vm189_vm1, %v8568_v29 }
 0x4db   :  { %7038 = vmatmul.mubr.msk.f32.gmra.mrb[58].mxu0 %vm189_vm1, %v8564_v18 }
 0x506   :  { %v6858_v45 = vpop.f32.mrb[20].mxu1 }
 0x507   :  { %v1630_v23 = vpop.f32.mrb[21].mxu1 }
 0x508   :  { %v7414_v19 = vpack.c.bf16 %v6858_v45, %v1630_v23  ;;  %6944 = vmatprep.mubr.msk.f32.mxu1 %vm189_vm1, %v1630_v23  ;;  %7040 = vmatprep.mubr.msk.f32.mxu0 %vm189_vm1, %v1630_v23 }
 0x509   :  { %7041 = vmatmul.mubr.msk.f32.gmra.mrb[60].mxu0 %vm189_vm1, %v6858_v45 }
 0x50a   :  { %v6861_v50 = vpop.f32.mrb[22].mxu1  ;;  %7416 = vmatprep.subr.msk.bf16.mxu1 %vm8504_vm3, %v7414_v19 }
 0x50b   :  { %v1640_v62 = vpop.f32.mrb[23].mxu1  ;;  %7419 = vmatpush3.bf16.xpose.msk.msra.mxu1 %vm8504_vm3, %v7414_v19 }
 0x50c   :  { %v7420_v31 = vpack.c.bf16 %v6861_v50, %v1640_v62  ;;  %7043 = vmatprep.mubr.msk.f32.mxu0 %vm189_vm1, %v1640_v62 }
 0x50d   :  { %7044 = vmatmul.mubr.msk.f32.gmra.mrb[62].mxu0 %vm189_vm1, %v6861_v50 }
 0x50e   :  { %7422 = vmatprep.subr.msk.bf16.mxu1 %vm8504_vm3, %v7420_v31  ;;  %7046 = vmatprep.mubr.msk.f32.mxu0 %vm189_vm1, %v8578_v54 }
 0x50f   :  { %v6874_v11 = vpop.f32.mrb[24].mxu1 }
 0x510   :  { %v1824_v56 = vpop.f32.mrb[25].mxu1 }
 0x511   :  { %v7438_v16 = vpack.c.bf16 %v6874_v11, %v1824_v56  ;;  %7047 = vmatmul.mubr.msk.f32.gmra.mrb[64].mxu0 %vm189_vm1, %v8574_v35 }
 0x512   :  { %7049 = vmatprep.mubr.msk.f32.mxu0 %vm189_vm1, %v8590_v60 }
 0x513   :  { %7425 = vmatpush3.bf16.xpose.msk.msra.mxu1 %vm8504_vm3, %v7420_v31 }
 0x514   :  { %7440 = vmatprep.subr.msk.bf16.mxu1 %vm8504_vm3, %v7438_v16 }
 0x515   :  { %7050 = vmatmul.mubr.msk.f32.gmra.mrb[66].mxu0 %vm189_vm1, %v8586_v13 }
 0x516   :  { %7052 = vmatprep.mubr.msk.f32.mxu0 %vm189_vm1, %v1824_v56 }
 0x517   :  { %v6877_v5 = vpop.f32.mrb[26].mxu1 }
 0x518   :  { %v1834_v53 = vpop.f32.mrb[27].mxu1 }
 0x519   :  { %v7444_v20 = vpack.c.bf16 %v6877_v5, %v1834_v53  ;;  %7053 = vmatmul.mubr.msk.f32.gmra.mrb[68].mxu0 %vm189_vm1, %v6874_v11 }
 0x51a   :  { %6945 = vmatmul.mubr.msk.f32.vlgmr.msra.gmra.mrb[36].mxu1 %vm189_vm1, %v6858_v45  ;;  %7055 = vmatprep.mubr.msk.f32.mxu0 %vm189_vm1, %v1834_v53 }
 0x51b   :  { %6947 = vmatprep.mubr.msk.f32.mxu1 %vm189_vm1, %v1640_v62  ;;  %7443 = vmatpush3.bf16.xpose.msk.msra.mxu1 %vm8504_vm3, %v7438_v16 }
 0x51c   :  { %7446 = vmatprep.subr.msk.bf16.mxu1 %vm8504_vm3, %v7444_v20 }
 0x51d   :  { %7056 = vmatmul.mubr.msk.f32.gmra.mrb[70].mxu0 %vm189_vm1, %v6877_v5 }
 0x51e   :  { %6948 = vmatmul.mubr.msk.f32.gmra.mrb[38].mxu1 %vm189_vm1, %v6861_v50  ;;  %7058 = vmatprep.mubr.msk.f32.mxu0 %vm189_vm1, %v8604_v26 }
 0x51f   :  { %6972 = vmatprep.mubr.msk.f32.mxu1 %vm189_vm1, %v1824_v56 }
 0x521   :  { %7059 = vmatmul.mubr.msk.f32.gmra.mrb[72].mxu0 %vm189_vm1, %v8598_v22 }
 0x522   :  { %7061 = vmatprep.mubr.msk.f32.mxu0 %vm189_vm1, %v8612_v27 }
 0x523   :  { %7449 = vmatpush3.bf16.xpose.msk.msra.mxu1 %vm8504_vm3, %v7444_v20 }
 0x525   :  { %7062 = vmatmul.mubr.msk.f32.gmra.mrb[74].mxu0 %vm189_vm1, %v8610_v47 }
 0x52a   :  { %6973 = vmatmul.mubr.msk.f32.vlgmr.msra.gmra.mrb[40].mxu1 %vm189_vm1, %v6874_v11 }
 0x52b   :  { %6975 = vmatprep.mubr.msk.f32.mxu1 %vm189_vm1, %v1834_v53 }
 0x52e   :  { %6976 = vmatmul.mubr.msk.f32.gmra.mrb[42].mxu1 %vm189_vm1, %v6877_v5 }
 0x554   :  { %v6890_v15 = vpop.f32.mrb[28].mxu1 }
 0x555   :  { %v2018_v24 = vpop.f32.mrb[29].mxu1 }
 0x556   :  { %v7462_v28 = vpack.c.bf16 %v6890_v15, %v2018_v24  ;;  %7000 = vmatprep.mubr.msk.f32.mxu1 %vm189_vm1, %v2018_v24  ;;  %7064 = vmatprep.mubr.msk.f32.mxu0 %vm189_vm1, %v2018_v24 }
 0x557   :  { %7065 = vmatmul.mubr.msk.f32.gmra.mrb[76].mxu0 %vm189_vm1, %v6890_v15 }
 0x558   :  { %7464 = vmatprep.subr.msk.bf16.mxu1 %vm8504_vm3, %v7462_v28 }
 0x559   :  { %7467 = vmatpush3.bf16.xpose.msk.msra.mxu1 %vm8504_vm3, %v7462_v28 }
 0x55a   :  { %v8749_v40 = vpop.f32.mrb[32].mxu0 }
 0x55b   :  { %9753 = vst [vmem:[#allocation13_spill] sm:$0xff] %v8749_v40  ;;  %v8751_v41 = vpop.f32.mrb[33].mxu0  ;;  %v2814_v3 = vmul.f32 %v8749_v40, %v8749_v40 }
 0x55c   :  { %v6893_v12 = vpop.f32.mrb[30].mxu1  ;;  %v2813_v14 = vmul.f32 %v8751_v41, %v8751_v41 }
 0x55d   :  { %v2028_v57 = vpop.f32.mrb[31].mxu1  ;;  %v2848_v61 = vsel %vm1180_vm4, %v2814_v3, 0.0 }
 0x55e   :  { %v7468_v55 = vpack.c.bf16 %v6893_v12, %v2028_v57  ;;  %v8753_v10 = vpop.f32.mrb[34].mxu0  ;;  %7067 = vmatprep.mubr.msk.f32.mxu0 %vm189_vm1, %v2028_v57  ;;  %v2845_v6 = vsel %vm1180_vm4, %v2813_v14, 0.0 }
 0x55f   :  { %9754 = vst [vmem:[#allocation14_spill] sm:$0xff] %v8753_v10  ;;  %v8756_v58 = vpop.f32.mrb[35].mxu0  ;;  %7068 = vmatmul.mubr.msk.f32.gmra.mrb[78].mxu0 %vm189_vm1, %v6893_v12  ;;  %v2816_v9 = vmul.f32 %v8753_v10, %v8753_v10 }
 0x560   :  { %9755 = vst [vmem:[#allocation15_spill] sm:$0xff] %v8756_v58  ;;  %7470 = vmatprep.subr.msk.bf16.mxu1 %vm8504_vm3, %v7468_v55  ;;  %v2815_v45 = vmul.f32 %v8756_v58, %v8756_v58 }
 0x561   :  { %7473 = vmatpush3.bf16.xpose.msk.msra.mxu1 %vm8504_vm3, %v7468_v55  ;;  %v2854_v62 = vsel %vm1180_vm4, %v2816_v9, 0.0 }
 0x562   :  { %v2851_v31 = vsel %vm1180_vm4, %v2815_v45, 0.0 }
 0x568   :  { %7001 = vmatmul.mubr.msk.f32.vlgmr.msra.gmra.mrb[44].mxu1 %vm189_vm1, %v6890_v15 }
 0x569   :  { %7003 = vmatprep.mubr.msk.f32.mxu1 %vm189_vm1, %v2028_v57 }
 0x56a   :  { %v8765_v63 = vpop.f32.mrb[36].mxu0 }
 0x56b   :  { %v8767_v46 = vpop.f32.mrb[37].mxu0 }
 0x56c   :  { %7004 = vmatmul.mubr.msk.f32.gmra.mrb[46].mxu1 %vm189_vm1, %v6893_v12 }
 0x56e   :  { %v8770_v48 = vpop.f32.mrb[38].mxu0 }
 0x56f   :  { %v8772_v18 = vpop.f32.mrb[39].mxu0 }
 0x570   :  { %v2823_v42 = vmul.f32 %v8772_v18, %v8772_v18 }
 0x57a   :  { %v8774_v29 = vpop.f32.mrb[40].mxu0 }
 0x57b   :  { %v8776_v34 = vpop.f32.mrb[41].mxu0 }
 0x57c   :  { %9756 = vst [vmem:[#allocation16_spill] sm:$0xff] %v8776_v34 }
 0x57e   :  { %v8778_v2 = vpop.f32.mrb[42].mxu0 }
 0x57f   :  { %9757 = vst [vmem:[#allocation17_spill] sm:$0xff] %v8778_v2  ;;  %v8780_v35 = vpop.f32.mrb[43].mxu0 }
 0x580   :  { %9758 = vst [vmem:[#allocation18_spill] sm:$0xff] %v8780_v35 }
 0x58a   :  { %v8782_v54 = vpop.f32.mrb[44].mxu0 }
 0x58b   :  { %9759 = vst [vmem:[#allocation19_spill] sm:$0xff] %v8782_v54  ;;  %v8784_v59 = vpop.f32.mrb[45].mxu0 }
 0x58c   :  { %9760 = vst [vmem:[#allocation20_spill] sm:$0xff] %v8784_v59 }
 0x58e   :  { %v8786_v13 = vpop.f32.mrb[46].mxu0 }
 0x58f   :  { %9761 = vst [vmem:[#allocation21_spill] sm:$0xff] %v8786_v13  ;;  %v8788_v60 = vpop.f32.mrb[47].mxu0 }
 0x590   :  { %9762 = vst [vmem:[#allocation22_spill] sm:$0xff] %v8788_v60 }
 0x599   :  { %v8790_v44 = vpop.f32.mrb[32].mxu1 }
 0x59a   :  { %9763 = vst [vmem:[#allocation23_spill] sm:$0xff] %v8790_v44  ;;  %v2818_v22 = vmul.f32 %v8790_v44, %v8790_v44  ;;  %v8794_v26 = vpop.f32.mrb[33].mxu1  ;;  %v8796_v37 = vpop.f32.mrb[48].mxu0 }
 0x59b   :  { %9764 = vst [vmem:[#allocation24_spill] sm:$0xff] %v8794_v26  ;;  %v2817_v47 = vmul.f32 %v8794_v26, %v8794_v26  ;;  %v8800_v27 = vpop.f32.mrb[49].mxu0  ;;  %v3275_v36 = vsel %vm189_vm1, %v8796_v37, 0.0 }
 0x59c   :  { %v2860_v25 = vsel %vm1180_vm4, %v2818_v22, 0.0 }
 0x59d   :  { %2861 = vadd.xlane.f32.xlu1 %v2860_v25  ;;  %v8807_v21 = vpop.f32.mrb[34].mxu1  ;;  %v2857_v4 = vsel %vm1180_vm4, %v2817_v47, 0.0 }
 0x59e   :  { %9765 = vst [vmem:[#allocation25_spill] sm:$0xff] %v8807_v21  ;;  %v8810_v30 = vpop.f32.mrb[50].mxu0  ;;  %2858 = vadd.xlane.f32.xlu0 %v2857_v4  ;;  %v8812_v0 = vpop.f32.mrb[35].mxu1  ;;  %v2820_v17 = vmul.f32 %v8807_v21, %v8807_v21 }
 0x59f   :  { %v8814_v38 = vpop.f32.mrb[51].mxu0  ;;  %v2819_v51 = vmul.f32 %v8812_v0, %v8812_v0 }
 0x5a0   :  { %v2866_v49 = vsel %vm1180_vm4, %v2820_v17, 0.0  ;;  %v2822_v17 = vmul.f32 %v8765_v63, %v8765_v63 }
 0x5a1   :  { %2849 = vadd.xlane.f32.xlu1 %v2848_v61  ;;  %v2863_v23 = vsel %vm1180_vm4, %v2819_v51, 0.0 }
 0x5a2   :  { %v8822_v52 = vpop.f32.mrb[52].mxu0  ;;  %2846 = vadd.xlane.f32.xlu0 %v2845_v6  ;;  %v2821_v6 = vmul.f32 %v8767_v46, %v8767_v46 }
 0x5a3   :  { %v8824_v1 = vpop.f32.mrb[53].mxu0 }
 0x5a5   :  { %2867 = vadd.xlane.f32.xlu1 %v2866_v49 }
 0x5a6   :  { %v8832_v19 = vpop.f32.mrb[54].mxu0  ;;  %2864 = vadd.xlane.f32.xlu0 %v2863_v23 }
 0x5a7   :  { %v8834_v50 = vpop.f32.mrb[55].mxu0 }
 0x5a9   :  { %2855 = vadd.xlane.f32.xlu1 %v2854_v62  ;;  %v2824_v62 = vmul.f32 %v8770_v48, %v8770_v48 }
 0x5aa   :  { %v8838_v11 = vpop.f32.mrb[56].mxu0  ;;  %2852 = vadd.xlane.f32.xlu0 %v2851_v31 }
 0x5ab   :  { %v8840_v56 = vpop.f32.mrb[57].mxu0 }
 0x5ae   :  { %v8842_v16 = vpop.f32.mrb[58].mxu0 }
 0x5af   :  { %v8844_v5 = vpop.f32.mrb[59].mxu0 }
 0x5dc   :  { %v8846_v53 = vpop.f32.mrb[60].mxu0 }
 0x5dd   :  { %v8848_v20 = vpop.f32.mrb[61].mxu0 }
 0x5e0   :  { %v8850_v15 = vpop.f32.mrb[62].mxu0 }
 0x5e1   :  { %v8852_v24 = vpop.f32.mrb[63].mxu0 }
 0x5e4   :  { %v8854_v28 = vpop.f32.mrb[64].mxu0 }
 0x5e5   :  { %v8856_v12 = vpop.f32.mrb[65].mxu0 }
 0x5e8   :  { %v8858_v57 = vpop.f32.mrb[66].mxu0 }
 0x5e9   :  { %v8860_v55 = vpop.f32.mrb[67].mxu0 }
 0x5ec   :  { %v8862_v22 = vpop.f32.mrb[68].mxu0 }
 0x5ed   :  { %v8864_v47 = vpop.f32.mrb[36].mxu1  ;;  %v8866_v3 = vpop.f32.mrb[69].mxu0 }
 0x5ee   :  { %v2826_v25 = vmul.f32 %v8864_v47, %v8864_v47  ;;  %v8870_v14 = vpop.f32.mrb[37].mxu1 }
 0x5ef   :  { %v2825_v4 = vmul.f32 %v8870_v14, %v8870_v14 }
 0x5f0   :  { %v8876_v61 = vpop.f32.mrb[70].mxu0  ;;  %v2884_v51 = vsel %vm1180_vm4, %v2826_v25, 0.0  ;;  %v2872_v25 = vsel %vm1180_vm4, %v2822_v17, 0.0 }
 0x5f1   :  { %v8881_v9 = vpop.f32.mrb[71].mxu0  ;;  %2885 = vadd.xlane.f32.xlu1 %v2884_v51  ;;  %v8883_v49 = vpop.f32.mrb[38].mxu1  ;;  %v2881_v45 = vsel %vm1180_vm4, %v2825_v4, 0.0  ;;  %v2869_v51 = vsel %vm1180_vm4, %v2821_v6, 0.0  ;;  %v2875_v6 = vsel %vm1180_vm4, %v2823_v42, 0.0  ;;  %v3284_v42 = vsel %vm189_vm1, %v8824_v1, 0.0 }
 0x5f2   :  { %9766 = vst [vmem:[#allocation26_spill] sm:$0xff] %v8883_v49  ;;  %2882 = vadd.xlane.f32.xlu0 %v2881_v45  ;;  %v8886_v23 = vpop.f32.mrb[39].mxu1  ;;  %v2878_v45 = vsel %vm1180_vm4, %v2824_v62, 0.0  ;;  %v3272_v62 = vsel %vm189_vm1, %v8800_v27, 0.0 }
 0x5f3   :  { %v2827_v7 = vmul.f32 %v8886_v23, %v8886_v23 }
 0x5f4   :  { %v8890_v31 = vpop.f32.mrb[72].mxu0 }
 0x5f5   :  { %v8895_v8 = vpop.f32.mrb[73].mxu0  ;;  %2873 = vadd.xlane.f32.xlu1 %v2872_v25  ;;  %v2887_v17 = vsel %vm1180_vm4, %v2827_v7, 0.0  ;;  %v3278_v7 = vsel %vm189_vm1, %v8814_v38, 0.0  ;;  %v3347_v58 = vsel %vm189_vm1, %v8890_v31, 0.0 }
 0x5f6   :  { %2870 = vadd.xlane.f32.xlu0 %v2869_v51 }
 0x5f8   :  { %v8898_v4 = vpop.f32.mrb[74].mxu0 }
 0x5f9   :  { %v8903_v43 = vpop.f32.mrb[75].mxu0  ;;  %2879 = vadd.xlane.f32.xlu1 %v2878_v45 }
 0x5fa   :  { %2888 = vadd.xlane.f32.xlu0 %v2887_v17  ;;  %v3287_v17 = vsel %vm189_vm1, %v8822_v52, 0.0 }
 0x5fd   :  { %3276 = vadd.xlane.f32.xlu1 %v3275_v36  ;;  %v8908_v25 = vpop.f32.mrb[40].mxu1  ;;  %v3281_v36 = vsel %vm189_vm1, %v8810_v30, 0.0 }
 0x5fe   :  { %9767 = vst [vmem:[#allocation27_spill] sm:$0xff] %v8908_v25  ;;  %2876 = vadd.xlane.f32.xlu0 %v2875_v6  ;;  %v8911_v51 = vpop.f32.mrb[41].mxu1  ;;  %v3290_v6 = vsel %vm189_vm1, %v8834_v50, 0.0 }
 0x5ff   :  { %9768 = vst [vmem:[#allocation28_spill] sm:$0xff] %v8911_v51 }
 0x601   :  { %3273 = vadd.xlane.f32.xlu1 %v3272_v62  ;;  %v8915_v39 = vpop.f32.mrb[42].mxu1  ;;  %v3293_v62 = vsel %vm189_vm1, %v8832_v19, 0.0 }
 0x602   :  { %9769 = vst [vmem:[#allocation29_spill] sm:$0xff] %v8915_v39  ;;  %3279 = vadd.xlane.f32.xlu0 %v3278_v7  ;;  %v8919_v45 = vpop.f32.mrb[43].mxu1  ;;  %v3296_v7 = vsel %vm189_vm1, %v8840_v56, 0.0 }
 0x603   :  { %9770 = vst [vmem:[#allocation30_spill] sm:$0xff] %v8919_v45 }
 0x605   :  { %3282 = vadd.xlane.f32.xlu1 %v3281_v36  ;;  %v3299_v36 = vsel %vm189_vm1, %v8838_v11, 0.0 }
 0x606   :  { %3285 = vadd.xlane.f32.xlu0 %v3284_v42  ;;  %v3302_v42 = vsel %vm189_vm1, %v8844_v5, 0.0 }
 0x609   :  { %3288 = vadd.xlane.f32.xlu1 %v3287_v17  ;;  %v3305_v17 = vsel %vm189_vm1, %v8842_v16, 0.0 }
 0x60a   :  { %3291 = vadd.xlane.f32.xlu0 %v3290_v6  ;;  %v3308_v6 = vsel %vm189_vm1, %v8848_v20, 0.0 }
 0x60d   :  { %3294 = vadd.xlane.f32.xlu1 %v3293_v62  ;;  %v3311_v62 = vsel %vm189_vm1, %v8846_v53, 0.0 }
 0x60e   :  { %3297 = vadd.xlane.f32.xlu0 %v3296_v7  ;;  %v3314_v7 = vsel %vm189_vm1, %v8852_v24, 0.0 }
 0x611   :  { %3300 = vadd.xlane.f32.xlu1 %v3299_v36  ;;  %v3317_v36 = vsel %vm189_vm1, %v8850_v15, 0.0 }
 0x612   :  { %3303 = vadd.xlane.f32.xlu0 %v3302_v42  ;;  %v3320_v42 = vsel %vm189_vm1, %v8856_v12, 0.0 }
 0x615   :  { %3306 = vadd.xlane.f32.xlu1 %v3305_v17  ;;  %v3323_v17 = vsel %vm189_vm1, %v8854_v28, 0.0 }
 0x616   :  { %3309 = vadd.xlane.f32.xlu0 %v3308_v6  ;;  %v3326_v6 = vsel %vm189_vm1, %v8860_v55, 0.0 }
 0x619   :  { %3312 = vadd.xlane.f32.xlu1 %v3311_v62  ;;  %v3329_v62 = vsel %vm189_vm1, %v8858_v57, 0.0 }
 0x61a   :  { %3315 = vadd.xlane.f32.xlu0 %v3314_v7  ;;  %v3332_v7 = vsel %vm189_vm1, %v8866_v3, 0.0 }
 0x61d   :  { %3318 = vadd.xlane.f32.xlu1 %v3317_v36  ;;  %v3335_v36 = vsel %vm189_vm1, %v8862_v22, 0.0 }
 0x61e   :  { %3321 = vadd.xlane.f32.xlu0 %v3320_v42  ;;  %v3338_v42 = vsel %vm189_vm1, %v8881_v9, 0.0 }
 0x621   :  { %3324 = vadd.xlane.f32.xlu1 %v3323_v17 }
 0x622   :  { %3327 = vadd.xlane.f32.xlu0 %v3326_v6 }
 0x625   :  { %3330 = vadd.xlane.f32.xlu1 %v3329_v62  ;;  %v3341_v62 = vsel %vm189_vm1, %v8876_v61, 0.0 }
 0x626   :  { %3333 = vadd.xlane.f32.xlu0 %v3332_v7  ;;  %v3344_v7 = vsel %vm189_vm1, %v8895_v8, 0.0 }
 0x629   :  { %3336 = vadd.xlane.f32.xlu1 %v3335_v36 }
 0x62a   :  { %v8961_v17 = vpop.f32.mrb[76].mxu0  ;;  %3339 = vadd.xlane.f32.xlu0 %v3338_v42  ;;  %v3350_v42 = vsel %vm189_vm1, %v8903_v43, 0.0 }
 0x62b   :  { %v8963_v32 = vpop.f32.mrb[77].mxu0  ;;  %v8965_v6 = vpop.xlane.xlu0 %2858 }
 0x62c   :  { %9771 = vst [vmem:[#allocation31_spill] sm:$0xff] %v8965_v6 }
 0x62d   :  { %3342 = vadd.xlane.f32.xlu1 %v3341_v62 }
 0x62e   :  { %3345 = vadd.xlane.f32.xlu0 %v3344_v7  ;;  %v3353_v7 = vsel %vm189_vm1, %v8898_v4, 0.0 }
 0x62f   :  { %v2847_v33 = vpop.xlane.xlu0 %2846 }
 0x630   :  { %v2941_v36 = vmax.f32 %v2847_v33, 1e-24  ;;  %v3356_v33 = vsel %vm189_vm1, %v8963_v32, 0.0 }
 0x631   :  { %3348 = vadd.xlane.f32.xlu1 %v3347_v58  ;;  %v3359_v58 = vsel %vm189_vm1, %v8961_v17, 0.0 }
 0x632   :  { %7727 = vrsqrt.f32 %v2941_v36  ;;  %v8975_v10 = vpop.f32.mrb[78].mxu0  ;;  %3351 = vadd.xlane.f32.xlu0 %v3350_v42  ;;  %v2829_v36 = vmul.f32 %v8776_v34, %v8776_v34 }
 0x633   :  { %v8977_v21 = vpop.f32.mrb[79].mxu0  ;;  %v2865_v62 = vpop.xlane.xlu0 %2864 }
 0x634   :  { %v2947_v40 = vmax.f32 %v2865_v62, 1e-24  ;;  %v3362_v42 = vsel %vm189_vm1, %v8977_v21, 0.0 }
 0x635   :  { %3354 = vadd.xlane.f32.xlu1 %v3353_v7  ;;  %v2828_v7 = vmul.f32 %v8883_v49, %v8883_v49 }
 0x636   :  { %7729 = vrsqrt.f32 %v2947_v40  ;;  %3357 = vadd.xlane.f32.xlu0 %v3356_v33  ;;  %v3365_v40 = vsel %vm189_vm1, %v8975_v10, 0.0  ;;  %v2831_v33 = vmul.f32 %v8780_v35, %v8780_v35 }
 0x637   :  { %v2890_v49 = vsel %vm1180_vm4, %v2828_v7, 0.0  ;;  %v2834_v7 = vmul.f32 %v8908_v25, %v8908_v25 }
 0x639   :  { %3360 = vadd.xlane.f32.xlu1 %v3359_v58  ;;  %v2893_v58 = vsel %vm1180_vm4, %v2829_v36, 0.0  ;;  %v2899_v36 = vsel %vm1180_vm4, %v2831_v33, 0.0  ;;  %v2908_v33 = vsel %vm1180_vm4, %v2834_v7, 0.0 }
 0x63a   :  { %3363 = vadd.xlane.f32.xlu0 %v3362_v42 }
 0x63b   :  { %v8989_v62 = vpop.f32.mrb[44].mxu1 }
 0x63c   :  { %9772 = vst [vmem:[#allocation32_spill] sm:$0xff] %v8989_v62  ;;  %v7728_v26 = vpop.eup %7727  ;;  %v8993_v44 = vpop.f32.mrb[45].mxu1 }
 0x63d   :  { %9773 = vst [vmem:[#allocation33_spill] sm:$0xff] %v8993_v44  ;;  %3366 = vadd.xlane.f32.xlu1 %v3365_v40  ;;  %v3005_v34 = vmul.f32 %v7728_v26, %v8751_v41  ;;  %v2830_v44 = vmul.f32 %v8774_v29, %v8774_v29  ;;  %v2833_v40 = vmul.f32 %v8911_v51, %v8911_v51 }
 0x63e   :  { %2894 = vadd.xlane.f32.xlu0 %v2893_v58 }
 0x63f   :  { %v9001_v42 = vpop.f32.mrb[46].mxu1  ;;  %7078 = vmatprep.mubr.msk.f32.mxu1 %vm1180_vm4, %v3005_v34  ;;  %v2832_v34 = vmul.f32 %v8778_v2, %v8778_v2  ;;  %v2896_v26 = vsel %vm1180_vm4, %v2830_v44, 0.0  ;;  %v2905_v58 = vsel %vm1180_vm4, %v2833_v40, 0.0 }
 0x640   :  { %9774 = vst [vmem:[#allocation34_spill] sm:$0xff] %v9001_v42  ;;  %v7730_v6 = vpop.eup %7729  ;;  %v9006_v62 = vpop.f32.mrb[47].mxu1 }
 0x641   :  { %9775 = vst [vmem:[#allocation35_spill] sm:$0xff] %v9006_v62  ;;  %2891 = vadd.xlane.f32.xlu1 %v2890_v49  ;;  %v9013_v41 = vmul.f32 %v7730_v6, %v8812_v0  ;;  %v2902_v49 = vsel %vm1180_vm4, %v2832_v34, 0.0  ;;  %v9023_v0 = vpop.xlane.xlu1 %2861 }
 0x642   :  { %2900 = vadd.xlane.f32.xlu0 %v2899_v36  ;;  %9777 = vst [vmem:[#allocation37_spill] sm:$0xff] %v9023_v0 }
 0x643   :  { %9776 = vst [vmem:[#allocation36_spill] sm:$0xff] %v9013_v41 }
 0x645   :  { %2897 = vadd.xlane.f32.xlu1 %v2896_v26  ;;  %v9025_v6 = vpop.xlane.xlu1 %2849  ;;  %v9031_v26 = vpop.xlane.xlu0 %2852 }
 0x646   :  { %2906 = vadd.xlane.f32.xlu0 %v2905_v58  ;;  %9778 = vst [vmem:[#allocation38_spill] sm:$0xff] %v9025_v6  ;;  %9781 = vst [vmem:[#allocation41_spill] sm:$0xff] %v9031_v26 }
 0x649   :  { %2903 = vadd.xlane.f32.xlu1 %v2902_v49  ;;  %v9027_v36 = vpop.xlane.xlu1 %2867 }
 0x64a   :  { %9779 = vst [vmem:[#allocation39_spill] sm:$0xff] %v9027_v36 }
 0x64d   :  { %2909 = vadd.xlane.f32.xlu1 %v2908_v33  ;;  %v9029_v44 = vpop.xlane.xlu1 %2855 }
 0x64e   :  { %9780 = vst [vmem:[#allocation40_spill] sm:$0xff] %v9029_v44 }
 0x67e   :  { %v2886_v40 = vpop.xlane.xlu1 %2885 }
 0x67f   :  { %v2954_v58 = vmax.f32 %v2886_v40, 1e-24  ;;  %v2883_v51 = vpop.xlane.xlu0 %2882 }
 0x680   :  { %v2953_v35 = vmax.f32 %v2883_v51, 1e-24 }
 0x681   :  { %7731 = vrsqrt.f32 %v2954_v58 }
 0x682   :  { %7733 = vrsqrt.f32 %v2953_v35  ;;  %v2874_v34 = vpop.xlane.xlu1 %2873 }
 0x683   :  { %v2950_v49 = vmax.f32 %v2874_v34, 1e-24  ;;  %v2871_v7 = vpop.xlane.xlu0 %2870 }
 0x684   :  { %v2949_v33 = vmax.f32 %v2871_v7, 1e-24 }
 0x685   :  { %7735 = vrsqrt.f32 %v2950_v49 }
 0x686   :  { %7737 = vrsqrt.f32 %v2949_v33  ;;  %v2880_v41 = vpop.xlane.xlu1 %2879 }
 0x687   :  { %v2952_v6 = vmax.f32 %v2880_v41, 1e-24  ;;  %v2889_v0 = vpop.xlane.xlu0 %2888 }
 0x688   :  { %v2955_v36 = vmax.f32 %v2889_v0, 1e-24 }
 0x689   :  { %7739 = vrsqrt.f32 %v2952_v6 }
 0x68a   :  { %7741 = vrsqrt.f32 %v2955_v36  ;;  %v3277_v44 = vpop.xlane.xlu1 %3276 }
 0x68b   :  { %v7732_v26 = vpop.eup %7731  ;;  %v3370_v25 = vmul.f32 0.015625, %v3277_v44  ;;  %v2877_v40 = vpop.xlane.xlu0 %2876 }
 0x68c   :  { %v7734_v2 = vpop.eup %7733  ;;  %v9034_v51 = vmul.f32 %v7732_v26, %v8864_v47  ;;  %v2951_v35 = vmax.f32 %v2877_v40, 1e-24 }
 0x68d   :  { %v9037_v58 = vsub.f32 %v8796_v37, %v3370_v25  ;;  %v9040_v34 = vmul.f32 %v7734_v2, %v8870_v14 }
 0x68e   :  { %7743 = vrsqrt.f32 %v2951_v35  ;;  %v3274_v41 = vpop.xlane.xlu1 %3273 }
 0x68f   :  { %v7736_v0 = vpop.eup %7735  ;;  %v3369_v6 = vmul.f32 0.015625, %v3274_v41  ;;  %v3280_v36 = vpop.xlane.xlu0 %3279  ;;  %v3434_v44 = vmul.f32 %v9037_v58, %v9037_v58 }
 0x690   :  { %v7738_v49 = vpop.eup %7737  ;;  %v9045_v7 = vmul.f32 %v7736_v0, %v8765_v63  ;;  %v3371_v47 = vmul.f32 0.015625, %v3280_v36 }
 0x691   :  { %v9048_v26 = vsub.f32 %v8800_v27, %v3369_v6  ;;  %v3468_v37 = vsel %vm189_vm1, %v3434_v44, 0.0  ;;  %v9052_v2 = vmul.f32 %v7738_v49, %v8767_v46 }
 0x692   :  { %v9055_v14 = vsub.f32 %v8814_v38, %v3371_v47  ;;  %v3283_v25 = vpop.xlane.xlu1 %3282  ;;  %3469 = vadd.xlane.f32.xlu1 %v3468_v37 }
 0x693   :  { %v7740_v33 = vpop.eup %7739  ;;  %v3372_v40 = vmul.f32 0.015625, %v3283_v25  ;;  %v3286_v35 = vpop.xlane.xlu0 %3285  ;;  %v3433_v63 = vmul.f32 %v9048_v26, %v9048_v26 }
 0x694   :  { %v7742_v41 = vpop.eup %7741  ;;  %v3373_v0 = vmul.f32 0.015625, %v3286_v35  ;;  %v3435_v27 = vmul.f32 %v9055_v14, %v9055_v14  ;;  %v9062_v6 = vmul.f32 %v7740_v33, %v8770_v48 }
 0x695   :  { %v9065_v46 = vsub.f32 %v8810_v30, %v3372_v40  ;;  %v3465_v38 = vsel %vm189_vm1, %v3433_v63, 0.0  ;;  %v9069_v36 = vmul.f32 %v7742_v41, %v8886_v23 }
 0x696   :  { %v9072_v44 = vsub.f32 %v8824_v1, %v3373_v0  ;;  %v3289_v49 = vpop.xlane.xlu1 %3288  ;;  %3466 = vadd.xlane.f32.xlu0 %v3465_v38  ;;  %v3471_v30 = vsel %vm189_vm1, %v3435_v27, 0.0 }
 0x697   :  { %v3374_v47 = vmul.f32 0.015625, %v3289_v49  ;;  %v3292_v37 = vpop.xlane.xlu0 %3291  ;;  %v3436_v25 = vmul.f32 %v9065_v46, %v9065_v46 }
 0x698   :  { %v7744_v48 = vpop.eup %7743  ;;  %v3375_v33 = vmul.f32 0.015625, %v3292_v37  ;;  %v3437_v1 = vmul.f32 %v9072_v44, %v9072_v44 }
 0x699   :  { %v9078_v40 = vsub.f32 %v8822_v52, %v3374_v47  ;;  %v3474_v23 = vsel %vm189_vm1, %v3436_v25, 0.0  ;;  %v9084_v35 = vmul.f32 %v7744_v48, %v8772_v18 }
 0x69a   :  { %v9087_v63 = vsub.f32 %v8834_v50, %v3375_v33  ;;  %v3295_v41 = vpop.xlane.xlu1 %3294  ;;  %3475 = vadd.xlane.f32.xlu1 %v3474_v23  ;;  %3472 = vadd.xlane.f32.xlu0 %v3471_v30  ;;  %v3477_v18 = vsel %vm189_vm1, %v3437_v1, 0.0 }
 0x69b   :  { %v3376_v0 = vmul.f32 0.015625, %v3295_v41  ;;  %v3298_v38 = vpop.xlane.xlu0 %3297  ;;  %v3438_v52 = vmul.f32 %v9078_v40, %v9078_v40 }
 0x69c   :  { %v3377_v27 = vmul.f32 0.015625, %v3298_v38  ;;  %v3439_v50 = vmul.f32 %v9087_v63, %v9087_v63 }
 0x69d   :  { %v9092_v49 = vsub.f32 %v8832_v19, %v3376_v0  ;;  %v3480_v47 = vsel %vm189_vm1, %v3438_v52, 0.0 }
 0x69e   :  { %v9099_v37 = vsub.f32 %v8840_v56, %v3377_v27  ;;  %v3301_v25 = vpop.xlane.xlu1 %3300  ;;  %3481 = vadd.xlane.f32.xlu1 %v3480_v47  ;;  %3478 = vadd.xlane.f32.xlu0 %v3477_v18  ;;  %v3483_v41 = vsel %vm189_vm1, %v3439_v50, 0.0 }
 0x69f   :  { %v3378_v48 = vmul.f32 0.015625, %v3301_v25  ;;  %v3304_v33 = vpop.xlane.xlu0 %3303  ;;  %v3440_v30 = vmul.f32 %v9092_v49, %v9092_v49 }
 0x6a0   :  { %v3379_v19 = vmul.f32 0.015625, %v3304_v33  ;;  %v3441_v56 = vmul.f32 %v9099_v37, %v9099_v37 }
 0x6a1   :  { %v9104_v23 = vsub.f32 %v8838_v11, %v3378_v48  ;;  %v3486_v1 = vsel %vm189_vm1, %v3440_v30, 0.0 }
 0x6a2   :  { %v9111_v0 = vsub.f32 %v8844_v5, %v3379_v19  ;;  %v3307_v38 = vpop.xlane.xlu1 %3306  ;;  %3487 = vadd.xlane.f32.xlu1 %v3486_v1  ;;  %3484 = vadd.xlane.f32.xlu0 %v3483_v41  ;;  %v3489_v25 = vsel %vm189_vm1, %v3441_v56, 0.0 }
 0x6a3   :  { %v3380_v52 = vmul.f32 0.015625, %v3307_v38  ;;  %v3310_v27 = vpop.xlane.xlu0 %3309  ;;  %v3442_v47 = vmul.f32 %v9104_v23, %v9104_v23 }
 0x6a4   :  { %v3381_v11 = vmul.f32 0.015625, %v3310_v27  ;;  %v3443_v5 = vmul.f32 %v9111_v0, %v9111_v0 }
 0x6a5   :  { %v9116_v18 = vsub.f32 %v8842_v16, %v3380_v52  ;;  %v3492_v50 = vsel %vm189_vm1, %v3442_v47, 0.0 }
 0x6a6   :  { %v9123_v48 = vsub.f32 %v8848_v20, %v3381_v11  ;;  %v3313_v33 = vpop.xlane.xlu1 %3312  ;;  %3493 = vadd.xlane.f32.xlu1 %v3492_v50  ;;  %3490 = vadd.xlane.f32.xlu0 %v3489_v25  ;;  %v3495_v38 = vsel %vm189_vm1, %v3443_v5, 0.0 }
 0x6a7   :  { %v3382_v30 = vmul.f32 0.015625, %v3313_v33  ;;  %v3316_v19 = vpop.xlane.xlu0 %3315  ;;  %v3444_v1 = vmul.f32 %v9116_v18, %v9116_v18 }
 0x6a8   :  { %v3383_v16 = vmul.f32 0.015625, %v3316_v19  ;;  %v3445_v20 = vmul.f32 %v9123_v48, %v9123_v48 }
 0x6a9   :  { %v9128_v41 = vsub.f32 %v8846_v53, %v3382_v30  ;;  %v3498_v56 = vsel %vm189_vm1, %v3444_v1, 0.0 }
 0x6aa   :  { %v9135_v52 = vsub.f32 %v8852_v24, %v3383_v16  ;;  %v3319_v27 = vpop.xlane.xlu1 %3318  ;;  %3499 = vadd.xlane.f32.xlu1 %v3498_v56  ;;  %3496 = vadd.xlane.f32.xlu0 %v3495_v38  ;;  %v3501_v33 = vsel %vm189_vm1, %v3445_v20, 0.0 }
 0x6ab   :  { %v3384_v47 = vmul.f32 0.015625, %v3319_v27  ;;  %v3322_v11 = vpop.xlane.xlu0 %3321  ;;  %v3446_v50 = vmul.f32 %v9128_v41, %v9128_v41 }
 0x6ac   :  { %v3385_v53 = vmul.f32 0.015625, %v3322_v11  ;;  %v3447_v24 = vmul.f32 %v9135_v52, %v9135_v52 }
 0x6ad   :  { %v9140_v25 = vsub.f32 %v8850_v15, %v3384_v47  ;;  %v3504_v5 = vsel %vm189_vm1, %v3446_v50, 0.0 }
 0x6ae   :  { %v9147_v30 = vsub.f32 %v8856_v12, %v3385_v53  ;;  %v3325_v19 = vpop.xlane.xlu1 %3324  ;;  %3505 = vadd.xlane.f32.xlu1 %v3504_v5  ;;  %3502 = vadd.xlane.f32.xlu0 %v3501_v33  ;;  %v3507_v27 = vsel %vm189_vm1, %v3447_v24, 0.0 }
 0x6af   :  { %v3386_v1 = vmul.f32 0.015625, %v3325_v19  ;;  %v3328_v16 = vpop.xlane.xlu0 %3327  ;;  %v3448_v56 = vmul.f32 %v9140_v25, %v9140_v25 }
 0x6b0   :  { %v3387_v15 = vmul.f32 0.015625, %v3328_v16  ;;  %v3449_v12 = vmul.f32 %v9147_v30, %v9147_v30 }
 0x6b1   :  { %v9152_v38 = vsub.f32 %v8854_v28, %v3386_v1  ;;  %v3510_v20 = vsel %vm189_vm1, %v3448_v56, 0.0 }
 0x6b2   :  { %v9159_v47 = vsub.f32 %v8860_v55, %v3387_v15  ;;  %v3331_v11 = vpop.xlane.xlu1 %3330  ;;  %3511 = vadd.xlane.f32.xlu1 %v3510_v20  ;;  %3508 = vadd.xlane.f32.xlu0 %v3507_v27  ;;  %v3513_v19 = vsel %vm189_vm1, %v3449_v12, 0.0 }
 0x6b3   :  { %v3388_v50 = vmul.f32 0.015625, %v3331_v11  ;;  %v3334_v53 = vpop.xlane.xlu0 %3333  ;;  %v3450_v5 = vmul.f32 %v9152_v38, %v9152_v38 }
 0x6b4   :  { %v3389_v28 = vmul.f32 0.015625, %v3334_v53  ;;  %v3451_v55 = vmul.f32 %v9159_v47, %v9159_v47 }
 0x6b5   :  { %v9164_v33 = vsub.f32 %v8858_v57, %v3388_v50  ;;  %v3516_v24 = vsel %vm189_vm1, %v3450_v5, 0.0 }
 0x6b6   :  { %v9171_v1 = vsub.f32 %v8866_v3, %v3389_v28  ;;  %v3337_v16 = vpop.xlane.xlu1 %3336  ;;  %3517 = vadd.xlane.f32.xlu1 %v3516_v24  ;;  %3514 = vadd.xlane.f32.xlu0 %v3513_v19  ;;  %v3519_v11 = vsel %vm189_vm1, %v3451_v55, 0.0 }
 0x6b7   :  { %v3390_v56 = vmul.f32 0.015625, %v3337_v16  ;;  %v3340_v15 = vpop.xlane.xlu0 %3339  ;;  %v3452_v20 = vmul.f32 %v9164_v33, %v9164_v33 }
 0x6b8   :  { %v3391_v57 = vmul.f32 0.015625, %v3340_v15  ;;  %v3453_v3 = vmul.f32 %v9171_v1, %v9171_v1 }
 0x6b9   :  { %v9176_v27 = vsub.f32 %v8862_v22, %v3390_v56  ;;  %v3522_v12 = vsel %vm189_vm1, %v3452_v20, 0.0 }
 0x6ba   :  { %v9183_v50 = vsub.f32 %v8881_v9, %v3391_v57  ;;  %v3343_v53 = vpop.xlane.xlu1 %3342  ;;  %3523 = vadd.xlane.f32.xlu1 %v3522_v12  ;;  %3520 = vadd.xlane.f32.xlu0 %v3519_v11  ;;  %v3525_v16 = vsel %vm189_vm1, %v3453_v3, 0.0 }
 0x6bb   :  { %v3392_v5 = vmul.f32 0.015625, %v3343_v53  ;;  %v3346_v28 = vpop.xlane.xlu0 %3345  ;;  %v3454_v24 = vmul.f32 %v9176_v27, %v9176_v27 }
 0x6bc   :  { %v3393_v22 = vmul.f32 0.015625, %v3346_v28  ;;  %v3455_v9 = vmul.f32 %v9183_v50, %v9183_v50 }
 0x6bd   :  { %v9188_v19 = vsub.f32 %v8876_v61, %v3392_v5  ;;  %v3528_v55 = vsel %vm189_vm1, %v3454_v24, 0.0 }
 0x6be   :  { %v9195_v56 = vsub.f32 %v8895_v8, %v3393_v22  ;;  %v3349_v15 = vpop.xlane.xlu1 %3348  ;;  %3529 = vadd.xlane.f32.xlu1 %v3528_v55  ;;  %3526 = vadd.xlane.f32.xlu0 %v3525_v16  ;;  %v3531_v53 = vsel %vm189_vm1, %v3455_v9, 0.0 }
 0x6bf   :  { %v3394_v20 = vmul.f32 0.015625, %v3349_v15  ;;  %v3352_v57 = vpop.xlane.xlu0 %3351  ;;  %v3456_v12 = vmul.f32 %v9188_v19, %v9188_v19 }
 0x6c0   :  { %v3395_v61 = vmul.f32 0.015625, %v3352_v57  ;;  %v3457_v8 = vmul.f32 %v9195_v56, %v9195_v56 }
 0x6c1   :  { %v9200_v11 = vsub.f32 %v8890_v31, %v3394_v20  ;;  %v3534_v3 = vsel %vm189_vm1, %v3456_v12, 0.0 }
 0x6c2   :  { %v9207_v5 = vsub.f32 %v8903_v43, %v3395_v61  ;;  %v3355_v28 = vpop.xlane.xlu1 %3354  ;;  %3535 = vadd.xlane.f32.xlu1 %v3534_v3  ;;  %3532 = vadd.xlane.f32.xlu0 %v3531_v53  ;;  %v3537_v15 = vsel %vm189_vm1, %v3457_v8, 0.0 }
 0x6c3   :  { %v3396_v24 = vmul.f32 0.015625, %v3355_v28  ;;  %v3358_v22 = vpop.xlane.xlu0 %3357  ;;  %v3458_v55 = vmul.f32 %v9200_v11, %v9200_v11 }
 0x6c4   :  { %9782 = vst [vmem:[#allocation42_spill] sm:$0xff] %v9207_v5  ;;  %v3397_v31 = vmul.f32 0.015625, %v3358_v22  ;;  %v3459_v43 = vmul.f32 %v9207_v5, %v9207_v5 }
 0x6c5   :  { %v9212_v16 = vsub.f32 %v8898_v4, %v3396_v24  ;;  %v3540_v9 = vsel %vm189_vm1, %v3458_v55, 0.0 }
 0x6c6   :  { %v9219_v20 = vsub.f32 %v8963_v32, %v3397_v31  ;;  %v3361_v57 = vpop.xlane.xlu1 %3360  ;;  %3541 = vadd.xlane.f32.xlu1 %v3540_v9  ;;  %3538 = vadd.xlane.f32.xlu0 %v3537_v15  ;;  %v3543_v28 = vsel %vm189_vm1, %v3459_v43, 0.0 }
 0x6c7   :  { %v3398_v12 = vmul.f32 0.015625, %v3361_v57  ;;  %v3364_v61 = vpop.xlane.xlu0 %3363  ;;  %v3460_v3 = vmul.f32 %v9212_v16, %v9212_v16 }
 0x6c8   :  { %9783 = vst [vmem:[#allocation43_spill] sm:$0xff] %v9219_v20  ;;  %v3399_v4 = vmul.f32 0.015625, %v3364_v61  ;;  %v3461_v32 = vmul.f32 %v9219_v20, %v9219_v20  ;;  %v2836_v61 = vmul.f32 %v8915_v39, %v8915_v39 }
 0x6c9   :  { %v9224_v53 = vsub.f32 %v8961_v17, %v3398_v12  ;;  %v3546_v8 = vsel %vm189_vm1, %v3460_v3, 0.0 }
 0x6ca   :  { %v9231_v24 = vsub.f32 %v8977_v21, %v3399_v4  ;;  %v3367_v22 = vpop.xlane.xlu1 %3366  ;;  %3547 = vadd.xlane.f32.xlu1 %v3546_v8  ;;  %3544 = vadd.xlane.f32.xlu0 %v3543_v28  ;;  %v3549_v15 = vsel %vm189_vm1, %v3461_v32, 0.0  ;;  %v2838_v32 = vmul.f32 %v8782_v54, %v8782_v54 }
 0x6cb   :  { %9784 = vst [vmem:[#allocation44_spill] sm:$0xff] %v9224_v53  ;;  %v3400_v55 = vmul.f32 0.015625, %v3367_v22  ;;  %v3462_v31 = vmul.f32 %v9224_v53, %v9224_v53  ;;  %v2837_v22 = vmul.f32 %v8784_v59, %v8784_v59 }
 0x6cc   :  { %9785 = vst [vmem:[#allocation45_spill] sm:$0xff] %v9231_v24  ;;  %v3463_v43 = vmul.f32 %v9231_v24, %v9231_v24 }
 0x6cd   :  { %v9236_v17 = vsub.f32 %v8975_v10, %v3400_v55  ;;  %v3552_v9 = vsel %vm189_vm1, %v3462_v31, 0.0  ;;  %v2835_v10 = vmul.f32 %v8919_v45, %v8919_v45  ;;  %v2914_v55 = vsel %vm1180_vm4, %v2836_v61, 0.0  ;;  %v9796_v45 = vld [vmem:[#allocation38_spill] sm:$0xff] }
 0x6ce   :  { %v2892_v57 = vpop.xlane.xlu1 %2891  ;;  %3553 = vadd.xlane.f32.xlu1 %v3552_v9  ;;  %3550 = vadd.xlane.f32.xlu0 %v3549_v15  ;;  %v3555_v4 = vsel %vm189_vm1, %v3463_v43, 0.0  ;;  %v2840_v43 = vmul.f32 %v8786_v13, %v8786_v13  ;;  %v2942_v24 = vmax.f32 %v9796_v45, 1e-24 }
 0x6cf   :  { %9786 = vst [vmem:[#allocation46_spill] sm:$0xff] %v9236_v17  ;;  %v2956_v21 = vmax.f32 %v2892_v57, 1e-24  ;;  %v3464_v12 = vmul.f32 %v9236_v17, %v9236_v17  ;;  %v2911_v31 = vsel %vm1180_vm4, %v2835_v10, 0.0  ;;  %v2839_v57 = vmul.f32 %v8788_v60, %v8788_v60  ;;  %v9795_v60 = vld [vmem:[#allocation31_spill] sm:$0xff] }
 0x6d0   :  { %v2945_v13 = vmax.f32 %v9795_v60, 1e-24  ;;  %v9301_v60 = vld [vmem:[%s9713_s7] ss:$0 sm:$0xff] }
 0x6d1   :  { %7745 = vrsqrt.f32 %v2956_v21  ;;  %v3558_v3 = vsel %vm189_vm1, %v3464_v12, 0.0  ;;  %v2920_v21 = vsel %vm1180_vm4, %v2838_v32, 0.0  ;;  %v2917_v12 = vsel %vm1180_vm4, %v2837_v22, 0.0 }
 0x6d2   :  { %v2898_v8 = vpop.xlane.xlu1 %2897  ;;  %3559 = vadd.xlane.f32.xlu1 %v3558_v3  ;;  %3556 = vadd.xlane.f32.xlu0 %v3555_v4  ;;  %v2926_v4 = vsel %vm1180_vm4, %v2840_v43, 0.0  ;;  %v2923_v32 = vsel %vm1180_vm4, %v2839_v57, 0.0  ;;  %v2844_v43 = vmul.f32 %v9001_v42, %v9001_v42  ;;  %v9790_v57 = vld [vmem:[#allocation17_spill] sm:$0xff] }
 0x6d3   :  { %v2958_v28 = vmax.f32 %v2898_v8, 1e-24  ;;  %v9787_v8 = vld [vmem:[#allocation26_spill] sm:$0xff] }
 0x6d5   :  { %7747 = vrsqrt.f32 %v2958_v28 }
 0x6d6   :  { %v2904_v9 = vpop.xlane.xlu1 %2903  ;;  %2915 = vadd.xlane.f32.xlu1 %v2914_v55  ;;  %2912 = vadd.xlane.f32.xlu0 %v2911_v31  ;;  %v9788_v55 = vld [vmem:[#allocation32_spill] sm:$0xff] }
 0x6d7   :  { %v2960_v15 = vmax.f32 %v2904_v9, 1e-24  ;;  %v2842_v31 = vmul.f32 %v9788_v55, %v9788_v55  ;;  %v9789_v9 = vld [vmem:[#allocation33_spill] sm:$0xff] }
 0x6d9   :  { %7749 = vrsqrt.f32 %v2960_v15  ;;  %v2841_v15 = vmul.f32 %v9789_v9, %v9789_v9 }
 0x6da   :  { %v2910_v3 = vpop.xlane.xlu1 %2909  ;;  %2921 = vadd.xlane.f32.xlu1 %v2920_v21  ;;  %2918 = vadd.xlane.f32.xlu0 %v2917_v12  ;;  %v2843_v12 = vmul.f32 %v9006_v62, %v9006_v62  ;;  %v9288_v62 = vpop.xlane.xlu0 %2894 }
 0x6db   :  { %v7746_v61 = vpop.eup %7745  ;;  %v2962_v10 = vmax.f32 %v2910_v3, 1e-24  ;;  %v2932_v3 = vsel %vm1180_vm4, %v2842_v31, 0.0 }
 0x6dc   :  { %v9264_v28 = vmul.f32 %v7746_v61, %v9787_v8  ;;  %v2929_v61 = vsel %vm1180_vm4, %v2841_v15, 0.0  ;;  %v2938_v8 = vsel %vm1180_vm4, %v2844_v43, 0.0 }
 0x6dd   :  { %7751 = vrsqrt.f32 %v2962_v10 }
 0x6de   :  { %2927 = vadd.xlane.f32.xlu1 %v2926_v4  ;;  %2924 = vadd.xlane.f32.xlu0 %v2923_v32  ;;  %v9290_v31 = vpop.xlane.xlu0 %2900 }
 0x6df   :  { %v7748_v22 = vpop.eup %7747 }
 0x6e0   :  { %v9272_v21 = vmul.f32 %v7748_v22, %v8774_v29  ;;  %v2935_v29 = vsel %vm1180_vm4, %v2843_v12, 0.0  ;;  %v9792_v22 = vld [vmem:[#allocation27_spill] sm:$0xff]  ;;  %v9794_v12 = vld [vmem:[#allocation37_spill] sm:$0xff] }
 0x6e2   :  { %2933 = vadd.xlane.f32.xlu1 %v2932_v3  ;;  %2930 = vadd.xlane.f32.xlu0 %v2929_v61  ;;  %v9292_v15 = vpop.xlane.xlu0 %2906 }
 0x6e3   :  { %v7750_v10 = vpop.eup %7749 }
 0x6e4   :  { %v9281_v4 = vmul.f32 %v7750_v10, %v9790_v57 }
 0x6e6   :  { %9791 = vst [vmem:[#allocation26_spill] sm:$0xff] %v9281_v4  ;;  %2939 = vadd.xlane.f32.xlu1 %v2938_v8  ;;  %2936 = vadd.xlane.f32.xlu0 %v2935_v29  ;;  %v2946_v8 = vmax.f32 %v9794_v12, 1e-24  ;;  %v9803_v4 = vld [vmem:[#allocation25_spill] sm:$0xff] }
 0x6e7   :  { %v7752_v32 = vpop.eup %7751 }
 0x6e8   :  { %v9286_v42 = vmul.f32 %v7752_v32, %v9792_v22 }
 0x6ea   :  { %9793 = vst [vmem:[#allocation17_spill] sm:$0xff] %v9286_v42 }
 0x71f   :  { %v3470_v3 = vpop.xlane.xlu1 %3469 }
 0x720   :  { %v3562_v61 = vmul.f32 0.015625, %v3470_v3 }
 0x722   :  { %v3594_v10 = vadd.f32 1e-05, %v3562_v61 }
 0x723   :  { %v3467_v57 = vpop.xlane.xlu0 %3466 }
 0x724   :  { %7753 = vrsqrt.f32 %v3594_v10  ;;  %v3561_v43 = vmul.f32 0.015625, %v3467_v57 }
 0x726   :  { %v3593_v9 = vadd.f32 1e-05, %v3561_v43  ;;  %v9797_v43 = vld [vmem:[#allocation39_spill] sm:$0xff] }
 0x727   :  { %v3476_v29 = vpop.xlane.xlu1 %3475  ;;  %v3473_v55 = vpop.xlane.xlu0 %3472  ;;  %v2948_v39 = vmax.f32 %v9797_v43, 1e-24 }
 0x728   :  { %7755 = vrsqrt.f32 %v3593_v9  ;;  %v3564_v32 = vmul.f32 0.015625, %v3476_v29  ;;  %v3563_v22 = vmul.f32 0.015625, %v3473_v55  ;;  %v9798_v55 = vld [vmem:[#allocation40_spill] sm:$0xff] }
 0x729   :  { %7757 = vrsqrt.f32 %v2946_v8  ;;  %v2944_v45 = vmax.f32 %v9798_v55, 1e-24 }
 0x72a   :  { %v3596_v59 = vadd.f32 1e-05, %v3564_v32  ;;  %v3595_v54 = vadd.f32 1e-05, %v3563_v22 }
 0x72b   :  { %v3482_v3 = vpop.xlane.xlu1 %3481  ;;  %v3479_v61 = vpop.xlane.xlu0 %3478 }
 0x72c   :  { %7759 = vrsqrt.f32 %v3596_v59  ;;  %v3566_v10 = vmul.f32 0.015625, %v3482_v3  ;;  %v3565_v57 = vmul.f32 0.015625, %v3479_v61 }
 0x72d   :  { %7761 = vrsqrt.f32 %v3595_v54  ;;  %v9799_v54 = vld [vmem:[#allocation41_spill] sm:$0xff] }
 0x72e   :  { %v7754_v12 = vpop.eup %7753  ;;  %7763 = vrsqrt.f32 %v2945_v13  ;;  %v3598_v9 = vadd.f32 1e-05, %v3566_v10  ;;  %v3597_v29 = vadd.f32 1e-05, %v3565_v57  ;;  %v2943_v61 = vmax.f32 %v9799_v54, 1e-24 }
 0x72f   :  { %7765 = vrsqrt.f32 %v2942_v24  ;;  %v3488_v8 = vpop.xlane.xlu1 %3487  ;;  %v3485_v32 = vpop.xlane.xlu0 %3484  ;;  %v3658_v59 = vmul.f32 %v7754_v12, %v9037_v58  ;;  %v9310_v24 = vld [vmem:[%s9713_s7 + $0x1] ss:$0 sm:$0xff] }
 0x730   :  { %7767 = vrsqrt.f32 %v3598_v9  ;;  %v3568_v22 = vmul.f32 0.015625, %v3488_v8  ;;  %v3567_v3 = vmul.f32 0.015625, %v3485_v32 }
 0x731   :  { %7769 = vrsqrt.f32 %v3597_v29  ;;  %v3694_v13 = vmul.f32 %v9301_v60, %v3658_v59 }
 0x732   :  { %v7756_v10 = vpop.eup %7755  ;;  %7771 = vrsqrt.f32 %v2948_v39  ;;  %v3600_v57 = vadd.f32 1e-05, %v3568_v22  ;;  %v3599_v43 = vadd.f32 1e-05, %v3567_v3 }
 0x733   :  { %7773 = vrsqrt.f32 %v2944_v45  ;;  %v3494_v55 = vpop.xlane.xlu1 %3493  ;;  %v3491_v58 = vpop.xlane.xlu0 %3490  ;;  %v3657_v12 = vmul.f32 %v7756_v10, %v9048_v26  ;;  %v3730_v39 = vadd.f32 %v9310_v24, %v3694_v13 }
 0x734   :  { %7775 = vrsqrt.f32 %v3600_v57  ;;  %v3570_v9 = vmul.f32 0.015625, %v3494_v55  ;;  %v3569_v8 = vmul.f32 0.015625, %v3491_v58  ;;  %v7758_v29 = vpop.eup %7757 }
 0x735   :  { %7777 = vrsqrt.f32 %v3599_v43  ;;  %v3693_v32 = vmul.f32 %v9301_v60, %v3657_v12  ;;  %v3762_v12 = vmax.f32 %v3730_v39, 0.0 }
 0x736   :  { %v7760_v59 = vpop.eup %7759  ;;  %7779 = vrsqrt.f32 %v2943_v61  ;;  %v3602_v22 = vadd.f32 1e-05, %v3570_v9  ;;  %v3601_v3 = vadd.f32 1e-05, %v3569_v8  ;;  %v9800_v8 = vld [vmem:[#allocation23_spill] sm:$0xff] }
 0x737   :  { %v7762_v54 = vpop.eup %7761  ;;  %v3500_v17 = vpop.xlane.xlu1 %3499  ;;  %v3729_v42 = vadd.f32 %v9310_v24, %v3693_v32  ;;  %v3660_v26 = vmul.f32 %v7760_v59, %v9065_v46  ;;  %v9320_v20 = vmul.f32 %v7758_v29, %v9800_v8 }
 0x738   :  { %v3497_v45 = vpop.xlane.xlu0 %3496  ;;  %v7764_v10 = vpop.eup %7763  ;;  %7781 = vrsqrt.f32 %v3602_v22  ;;  %v3572_v57 = vmul.f32 0.015625, %v3500_v17  ;;  %v3659_v43 = vmul.f32 %v7762_v54, %v9055_v14 }
 0x739   :  { %v3571_v55 = vmul.f32 0.015625, %v3497_v45  ;;  %v7766_v58 = vpop.eup %7765  ;;  %7783 = vrsqrt.f32 %v3601_v3  ;;  %v3761_v13 = vmax.f32 %v3729_v42, 0.0  ;;  %v3696_v61 = vmul.f32 %v9301_v60, %v3660_v26  ;;  %v9801_v42 = vld [vmem:[#allocation24_spill] sm:$0xff] }
 0x73a   :  { %v7768_v9 = vpop.eup %7767  ;;  %v3604_v53 = vadd.f32 1e-05, %v3572_v57  ;;  %v3695_v46 = vmul.f32 %v9301_v60, %v3659_v43  ;;  %v9326_v39 = vmul.f32 %v7764_v10, %v9801_v42 }
 0x73b   :  { %v3603_v32 = vadd.f32 1e-05, %v3571_v55  ;;  %v7770_v59 = vpop.eup %7769  ;;  %v3506_v22 = vpop.xlane.xlu1 %3505  ;;  %v7490_v45 = vpack.c.bf16 %v3762_v12, %v3761_v13  ;;  %v3732_v14 = vadd.f32 %v9310_v24, %v3696_v61  ;;  %v3662_v3 = vmul.f32 %v7768_v9, %v9078_v40  ;;  %v9802_v61 = vld [vmem:[#allocation13_spill] sm:$0xff] }
 0x73c   :  { %v3503_v17 = vpop.xlane.xlu0 %3502  ;;  %v7772_v54 = vpop.eup %7771  ;;  %7785 = vrsqrt.f32 %v3604_v53  ;;  %v3574_v26 = vmul.f32 0.015625, %v3506_v22  ;;  %v3731_v57 = vadd.f32 %v9310_v24, %v3695_v46  ;;  %v3661_v8 = vmul.f32 %v7770_v59, %v9072_v44 }
 0x73d   :  { %v3573_v29 = vmul.f32 0.015625, %v3503_v17  ;;  %v7774_v55 = vpop.eup %7773  ;;  %7787 = vrsqrt.f32 %v3603_v32  ;;  %7491 = vmatprep.subr.bf16.mxu1 %v7490_v45  ;;  %v3764_v43 = vmax.f32 %v3732_v14, 0.0  ;;  %v3698_v13 = vmul.f32 %v9301_v60, %v3662_v3 }
 0x73e   :  { %v7776_v12 = vpop.eup %7775  ;;  %v3006_v40 = vmul.f32 %v7766_v58, %v9802_v61  ;;  %v3606_v9 = vadd.f32 1e-05, %v3574_v26  ;;  %7493 = vmatpush3.bf16.msra.mxu1 %v7490_v45  ;;  %v3763_v42 = vmax.f32 %v3731_v57, 0.0  ;;  %v3697_v46 = vmul.f32 %v9301_v60, %v3661_v8 }
 0x73f   :  { %v3605_v10 = vadd.f32 1e-05, %v3573_v29  ;;  %v7778_v53 = vpop.eup %7777  ;;  %v3512_v22 = vpop.xlane.xlu1 %3511  ;;  %v3734_v32 = vadd.f32 %v9310_v24, %v3698_v13  ;;  %v3664_v14 = vmul.f32 %v7776_v12, %v9092_v49  ;;  %v9336_v44 = vmul.f32 %v7772_v54, %v9803_v4  ;;  %v9804_v13 = vld [vmem:[#allocation14_spill] sm:$0xff] }
 0x740   :  { %v3509_v17 = vpop.xlane.xlu0 %3508  ;;  %v7780_v59 = vpop.eup %7779  ;;  %7789 = vrsqrt.f32 %v3606_v9  ;;  %v3576_v3 = vmul.f32 0.015625, %v3512_v22  ;;  %v7494_v26 = vpack.c.bf16 %v3764_v43, %v3763_v42  ;;  %v3733_v45 = vadd.f32 %v9310_v24, %v3697_v46  ;;  %v9805_v43 = vld [vmem:[#allocation15_spill] sm:$0xff] }
 0x741   :  { %v3575_v58 = vmul.f32 0.015625, %v3509_v17  ;;  %7791 = vrsqrt.f32 %v3605_v10  ;;  %v3766_v29 = vmax.f32 %v3734_v32, 0.0  ;;  %v3663_v57 = vmul.f32 %v7778_v53, %v9087_v63 }
 0x742   :  { %v7782_v61 = vpop.eup %7781  ;;  %v3608_v8 = vadd.f32 1e-05, %v3576_v3  ;;  %7495 = vmatprep.subr.bf16.mxu1 %v7494_v26  ;;  %v3008_v49 = vmul.f32 %v7774_v55, %v9804_v13  ;;  %v3700_v4 = vmul.f32 %v9301_v60, %v3664_v14  ;;  %v3765_v22 = vmax.f32 %v3733_v45, 0.0 }
 0x743   :  { %v3607_v5 = vadd.f32 1e-05, %v3575_v58  ;;  %v7784_v54 = vpop.eup %7783  ;;  %7497 = vmatpush3.bf16.msra.mxu1 %v7494_v26  ;;  %v3518_v12 = vpop.xlane.xlu1 %3517  ;;  %v3007_v10 = vmul.f32 %v7780_v59, %v9805_v43  ;;  %v3699_v42 = vmul.f32 %v9301_v60, %v3663_v57  ;;  %v3666_v17 = vmul.f32 %v7782_v61, %v9104_v23 }
 0x744   :  { %v3515_v9 = vpop.xlane.xlu0 %3514  ;;  %7793 = vrsqrt.f32 %v3608_v8  ;;  %v3578_v63 = vmul.f32 0.015625, %v3518_v12  ;;  %v3736_v46 = vadd.f32 %v9310_v24, %v3700_v4  ;;  %v7498_v55 = vpack.c.bf16 %v3766_v29, %v3765_v22 }
 0x745   :  { %v3577_v53 = vmul.f32 0.015625, %v3515_v9  ;;  %7795 = vrsqrt.f32 %v3607_v5  ;;  %v3735_v32 = vadd.f32 %v9310_v24, %v3699_v42  ;;  %v3665_v14 = vmul.f32 %v7784_v54, %v9099_v37 }
 0x746   :  { %v7786_v3 = vpop.eup %7785  ;;  %v3610_v58 = vadd.f32 1e-05, %v3578_v63  ;;  %7079 = vmatmul.mubr.msk.f32.vlgmr.msra.gmra.mrb[48].mxu1 %vm1180_vm4, %v3006_v40  ;;  %v3768_v59 = vmax.f32 %v3736_v46, 0.0  ;;  %v3702_v45 = vmul.f32 %v9301_v60, %v3666_v17  ;;  %v2957_v57 = vmax.f32 %v9288_v62, 1e-24  ;;  %7499 = vmatprep.subr.bf16.mxu1 %v7498_v55 }
 0x747   :  { %v3609_v26 = vadd.f32 1e-05, %v3577_v53  ;;  %v7788_v23 = vpop.eup %7787  ;;  %7081 = vmatprep.mubr.msk.f32.mxu1 %vm1180_vm4, %v3007_v10  ;;  %v3524_v5 = vpop.xlane.xlu1 %3523  ;;  %v3767_v61 = vmax.f32 %v3735_v32, 0.0  ;;  %v3701_v8 = vmul.f32 %v9301_v60, %v3665_v14  ;;  %v3668_v37 = vmul.f32 %v7786_v3, %v9116_v18  ;;  %7501 = vmatpush3.bf16.msra.mxu1 %v7498_v55 }
 0x748   :  { %v3521_v29 = vpop.xlane.xlu0 %3520  ;;  %7797 = vrsqrt.f32 %v3610_v58  ;;  %v3580_v13 = vmul.f32 0.015625, %v3524_v5  ;;  %v3738_v4 = vadd.f32 %v9310_v24, %v3702_v45  ;;  %v3667_v12 = vmul.f32 %v7788_v23, %v9111_v0 }
 0x749   :  { %v3579_v40 = vmul.f32 0.015625, %v3521_v29  ;;  %7799 = vrsqrt.f32 %v3609_v26  ;;  %v7502_v54 = vpack.c.bf16 %v3768_v59, %v3767_v61  ;;  %v3737_v62 = vadd.f32 %v9310_v24, %v3701_v8 }
 0x74a   :  { %v7790_v9 = vpop.eup %7789  ;;  %v3612_v22 = vadd.f32 1e-05, %v3580_v13  ;;  %7082 = vmatmul.mubr.msk.f32.gmra.mrb[50].mxu1 %vm1180_vm4, %v3008_v49  ;;  %v3770_v10 = vmax.f32 %v3738_v4, 0.0  ;;  %v3704_v18 = vmul.f32 %v9301_v60, %v3668_v37  ;;  %7801 = vrsqrt.f32 %v2957_v57  ;;  %v9806_v37 = vld [vmem:[#allocation36_spill] sm:$0xff] }
 0x74b   :  { %v3611_v43 = vadd.f32 1e-05, %v3579_v40  ;;  %v7792_v42 = vpop.eup %7791  ;;  %7503 = vmatprep.subr.bf16.mxu1 %v7502_v54  ;;  %7092 = vmatprep.mubr.msk.f32.mxu1 %vm1180_vm4, %v9326_v39  ;;  %v3530_v17 = vpop.xlane.xlu1 %3529  ;;  %v3769_v53 = vmax.f32 %v3737_v62, 0.0  ;;  %v3703_v46 = vmul.f32 %v9301_v60, %v3667_v12  ;;  %v3670_v0 = vmul.f32 %v7790_v9, %v9128_v41 }
 0x74c   :  { %v3527_v63 = vpop.xlane.xlu0 %3526  ;;  %7803 = vrsqrt.f32 %v3612_v22  ;;  %7505 = vmatpush3.bf16.msra.mxu1 %v7502_v54  ;;  %v3582_v55 = vmul.f32 0.015625, %v3530_v17  ;;  %v3740_v32 = vadd.f32 %v9310_v24, %v3704_v18  ;;  %v3669_v58 = vmul.f32 %v7792_v42, %v9123_v48 }
 0x74d   :  { %v3581_v49 = vmul.f32 0.015625, %v3527_v63  ;;  %7805 = vrsqrt.f32 %v3611_v43  ;;  %v7506_v14 = vpack.c.bf16 %v3770_v10, %v3769_v53  ;;  %v3739_v3 = vadd.f32 %v9310_v24, %v3703_v46 }
 0x74e   :  { %v7794_v39 = vpop.eup %7793  ;;  %v3614_v26 = vadd.f32 1e-05, %v3582_v55  ;;  %v3772_v45 = vmax.f32 %v3740_v32, 0.0  ;;  %v3706_v23 = vmul.f32 %v9301_v60, %v3670_v0  ;;  %v2959_v41 = vmax.f32 %v9290_v31, 1e-24 }
 0x74f   :  { %v3613_v59 = vadd.f32 1e-05, %v3581_v49  ;;  %v7796_v57 = vpop.eup %7795  ;;  %7093 = vmatmul.mubr.msk.f32.vlgmr.msra.gmra.mrb[52].mxu1 %vm1180_vm4, %v9320_v20  ;;  %7507 = vmatprep.subr.bf16.mxu1 %v7506_v14  ;;  %v3536_v5 = vpop.xlane.xlu1 %3535  ;;  %v3771_v61 = vmax.f32 %v3739_v3, 0.0  ;;  %v3705_v8 = vmul.f32 %v9301_v60, %v3669_v58  ;;  %v3672_v48 = vmul.f32 %v7794_v39, %v9140_v25 }
 0x750   :  { %v3533_v29 = vpop.xlane.xlu0 %3532  ;;  %7807 = vrsqrt.f32 %v3614_v26  ;;  %7095 = vmatprep.mubr.msk.f32.mxu1 %vm1180_vm4, %v9806_v37  ;;  %7509 = vmatpush3.bf16.msra.mxu1 %v7506_v14  ;;  %v3584_v13 = vmul.f32 0.015625, %v3536_v5  ;;  %v3742_v31 = vadd.f32 %v9310_v24, %v3706_v23  ;;  %v3671_v54 = vmul.f32 %v7796_v57, %v9135_v52 }
 0x751   :  { %v3583_v40 = vmul.f32 0.015625, %v3533_v29  ;;  %7809 = vrsqrt.f32 %v3613_v59  ;;  %v7510_v4 = vpack.c.bf16 %v3772_v45, %v3771_v61  ;;  %v3741_v20 = vadd.f32 %v9310_v24, %v3705_v8 }
 0x752   :  { %v7798_v62 = vpop.eup %7797  ;;  %v3616_v12 = vadd.f32 1e-05, %v3584_v13  ;;  %v3774_v22 = vmax.f32 %v3742_v31, 0.0  ;;  %v3708_v25 = vmul.f32 %v9301_v60, %v3672_v48  ;;  %7811 = vrsqrt.f32 %v2959_v41 }
 0x753   :  { %v3615_v9 = vadd.f32 1e-05, %v3583_v40  ;;  %v7800_v43 = vpop.eup %7799  ;;  %7096 = vmatmul.mubr.msk.f32.gmra.mrb[54].mxu1 %vm1180_vm4, %v9336_v44  ;;  %7511 = vmatprep.subr.bf16.mxu1 %v7510_v4  ;;  %v3542_v10 = vpop.xlane.xlu1 %3541  ;;  %v3773_v42 = vmax.f32 %v3741_v20, 0.0  ;;  %v3707_v17 = vmul.f32 %v9301_v60, %v3671_v54  ;;  %v3674_v63 = vmul.f32 %v7798_v62, %v9152_v38 }
 0x754   :  { %v3539_v18 = vpop.xlane.xlu0 %3538  ;;  %7813 = vrsqrt.f32 %v3616_v12  ;;  %7513 = vmatpush3.bf16.msra.mxu1 %v7510_v4  ;;  %7106 = vmatprep.mubr.msk.f32.mxu1 %vm1180_vm4, %v9052_v2  ;;  %v3586_v52 = vmul.f32 0.015625, %v3542_v10  ;;  %v3744_v46 = vadd.f32 %v9310_v24, %v3708_v25  ;;  %v9385_v0 = vpop.eup %7801  ;;  %v3673_v49 = vmul.f32 %v7800_v43, %v9147_v30 }
 0x755   :  { %v3585_v53 = vmul.f32 0.015625, %v3539_v18  ;;  %7815 = vrsqrt.f32 %v3615_v9  ;;  %v7514_v44 = vpack.c.bf16 %v3774_v22, %v3773_v42  ;;  %v3743_v55 = vadd.f32 %v9310_v24, %v3707_v17 }
 0x756   :  { %v7804_v32 = vpop.eup %7803  ;;  %v3618_v14 = vadd.f32 1e-05, %v3586_v52  ;;  %v3776_v3 = vmax.f32 %v3744_v46, 0.0  ;;  %v3710_v58 = vmul.f32 %v9301_v60, %v3674_v63  ;;  %v2961_v2 = vmax.f32 %v9292_v15, 1e-24  ;;  %v9807_v52 = vld [vmem:[#allocation16_spill] sm:$0xff] }
 0x757   :  { %v3617_v38 = vadd.f32 1e-05, %v3585_v53  ;;  %v7806_v39 = vpop.eup %7805  ;;  %7107 = vmatmul.mubr.msk.f32.vlgmr.msra.gmra.mrb[56].mxu1 %vm1180_vm4, %v9045_v7  ;;  %7515 = vmatprep.subr.bf16.mxu1 %v7514_v44  ;;  %v3548_v26 = vpop.xlane.xlu1 %3547  ;;  %v3775_v45 = vmax.f32 %v3743_v55, 0.0  ;;  %v3709_v23 = vmul.f32 %v9301_v60, %v3673_v49  ;;  %v3676_v30 = vmul.f32 %v7804_v32, %v9164_v33 }
 0x758   :  { %v3545_v59 = vpop.xlane.xlu0 %3544  ;;  %7817 = vrsqrt.f32 %v3618_v14  ;;  %7109 = vmatprep.mubr.msk.f32.mxu1 %vm1180_vm4, %v9084_v35  ;;  %7517 = vmatpush3.bf16.msra.mxu1 %v7514_v44  ;;  %v3588_v57 = vmul.f32 0.015625, %v3548_v26  ;;  %v3746_v15 = vadd.f32 %v9310_v24, %v3710_v58  ;;  %v3675_v29 = vmul.f32 %v7806_v39, %v9159_v47 }
 0x759   :  { %v3587_v41 = vmul.f32 0.015625, %v3545_v59  ;;  %7819 = vrsqrt.f32 %v3617_v38  ;;  %v7518_v5 = vpack.c.bf16 %v3776_v3, %v3775_v45  ;;  %v3745_v7 = vadd.f32 %v9310_v24, %v3709_v23 }
 0x75a   :  { %v7808_v61 = vpop.eup %7807  ;;  %v3620_v8 = vadd.f32 1e-05, %v3588_v57  ;;  %v3778_v37 = vmax.f32 %v3746_v15, 0.0  ;;  %v3712_v33 = vmul.f32 %v9301_v60, %v3676_v30  ;;  %7821 = vrsqrt.f32 %v2961_v2 }
 0x75b   :  { %v3619_v48 = vadd.f32 1e-05, %v3587_v41  ;;  %v7810_v13 = vpop.eup %7809  ;;  %7110 = vmatmul.mubr.msk.f32.gmra.mrb[58].mxu1 %vm1180_vm4, %v9062_v6  ;;  %7519 = vmatprep.subr.bf16.mxu1 %v7518_v5  ;;  %v3554_v35 = vpop.xlane.xlu1 %3553  ;;  %v3777_v31 = vmax.f32 %v3745_v7, 0.0  ;;  %v3711_v4 = vmul.f32 %v9301_v60, %v3675_v29  ;;  %v3678_v20 = vmul.f32 %v7808_v61, %v9176_v27  ;;  %v9808_v7 = vld [vmem:[#allocation18_spill] sm:$0xff] }
 0x75c   :  { %v3551_v40 = vpop.xlane.xlu0 %3550  ;;  %7823 = vrsqrt.f32 %v3620_v8  ;;  %7521 = vmatpush3.bf16.msra.mxu1 %v7518_v5  ;;  %7120 = vmatprep.mubr.msk.f32.mxu1 %vm1180_vm4, %v9040_v34  ;;  %v3590_v47 = vmul.f32 0.015625, %v3554_v35  ;;  %v3748_v62 = vadd.f32 %v9310_v24, %v3712_v33  ;;  %v7812_v12 = vpop.eup %7811  ;;  %v3677_v22 = vmul.f32 %v7810_v13, %v9171_v1 }
 0x75d   :  { %v3589_v54 = vmul.f32 0.015625, %v3551_v40  ;;  %7825 = vrsqrt.f32 %v3619_v48  ;;  %v7522_v6 = vpack.c.bf16 %v3778_v37, %v3777_v31  ;;  %v3747_v9 = vadd.f32 %v9310_v24, %v3711_v4  ;;  %v9809_v4 = vld [vmem:[#allocation42_spill] sm:$0xff] }
 0x75e   :  { %v7814_v25 = vpop.eup %7813  ;;  %v3622_v43 = vadd.f32 1e-05, %v3590_v47  ;;  %v3780_v27 = vmax.f32 %v3748_v62, 0.0  ;;  %v3714_v18 = vmul.f32 %v9301_v60, %v3678_v20  ;;  %v3021_v53 = vmul.f32 %v9385_v0, %v9807_v52 }
 0x75f   :  { %v3621_v10 = vadd.f32 1e-05, %v3589_v54  ;;  %v7816_v42 = vpop.eup %7815  ;;  %7121 = vmatmul.mubr.msk.f32.vlgmr.msra.gmra.mrb[60].mxu1 %vm1180_vm4, %v9034_v51  ;;  %7523 = vmatprep.subr.bf16.mxu1 %v7522_v6  ;;  %v3560_v34 = vpop.xlane.xlu1 %3559  ;;  %v3779_v63 = vmax.f32 %v3747_v9, 0.0  ;;  %v3713_v46 = vmul.f32 %v9301_v60, %v3677_v22  ;;  %v3680_v1 = vmul.f32 %v7814_v25, %v9188_v19  ;;  %v9811_v25 = vld [vmem:[#allocation26_spill] sm:$0xff] }
 0x760   :  { %v3557_v17 = vpop.xlane.xlu0 %3556  ;;  %7827 = vrsqrt.f32 %v3622_v43  ;;  %7123 = vmatprep.mubr.msk.f32.mxu1 %vm1180_vm4, %v9069_v36  ;;  %7525 = vmatpush3.bf16.msra.mxu1 %v7522_v6  ;;  %v3592_v44 = vmul.f32 0.015625, %v3560_v34  ;;  %v3750_v51 = vadd.f32 %v9310_v24, %v3714_v18  ;;  %v3679_v14 = vmul.f32 %v7816_v42, %v9183_v50  ;;  %v9812_v42 = vld [vmem:[#allocation44_spill] sm:$0xff] }
 0x761   :  { %v3591_v55 = vmul.f32 0.015625, %v3557_v17  ;;  %7829 = vrsqrt.f32 %v3621_v10  ;;  %v7526_v49 = vpack.c.bf16 %v3780_v27, %v3779_v63  ;;  %v3749_v32 = vadd.f32 %v9310_v24, %v3713_v46 }
 0x762   :  { %v7818_v0 = vpop.eup %7817  ;;  %v3624_v38 = vadd.f32 1e-05, %v3592_v44  ;;  %v3782_v58 = vmax.f32 %v3750_v51, 0.0  ;;  %v3716_v19 = vmul.f32 %v9301_v60, %v3680_v1  ;;  %v3715_v59 = vmul.f32 %v9301_v60, %v3679_v14 }
 0x763   :  { %v3623_v3 = vadd.f32 1e-05, %v3591_v55  ;;  %v7820_v39 = vpop.eup %7819  ;;  %7124 = vmatmul.mubr.msk.f32.gmra.mrb[62].mxu1 %vm1180_vm4, %v9264_v28  ;;  %7527 = vmatprep.subr.bf16.mxu1 %v7526_v49  ;;  %v2916_v36 = vpop.xlane.xlu1 %2915  ;;  %v3781_v26 = vmax.f32 %v3749_v32, 0.0  ;;  %v3682_v45 = vmul.f32 %v7818_v0, %v9200_v11  ;;  %v3023_v29 = vmul.f32 %v7812_v12, %v9808_v7  ;;  %v9810_v12 = vld [vmem:[#allocation28_spill] sm:$0xff]  ;;  %v9814_v0 = vld [vmem:[#allocation17_spill] sm:$0xff] }
 0x764   :  { %v2913_v2 = vpop.xlane.xlu0 %2912  ;;  %7831 = vrsqrt.f32 %v3624_v38  ;;  %7529 = vmatpush3.bf16.msra.mxu1 %v7526_v49  ;;  %7134 = vmatprep.mubr.msk.f32.mxu1 %vm1180_vm4, %v3021_v53  ;;  %v2964_v50 = vmax.f32 %v2916_v36, 1e-24  ;;  %v3752_v30 = vadd.f32 %v9310_v24, %v3716_v19  ;;  %v7822_v57 = vpop.eup %7821  ;;  %v3751_v28 = vadd.f32 %v9310_v24, %v3715_v59  ;;  %v9813_v53 = vld [vmem:[#allocation43_spill] sm:$0xff]  ;;  %v9815_v19 = vld [vmem:[#allocation46_spill] sm:$0xff] }
 0x765   :  { %v2963_v23 = vmax.f32 %v2913_v2, 1e-24  ;;  %7833 = vrsqrt.f32 %v3623_v3  ;;  %v7530_v41 = vpack.c.bf16 %v3782_v58, %v3781_v26  ;;  %v3681_v15 = vmul.f32 %v7820_v39, %v9195_v56 }
 0x766   :  { %v7824_v5 = vpop.eup %7823  ;;  %7835 = vrsqrt.f32 %v2964_v50  ;;  %v3784_v11 = vmax.f32 %v3752_v30, 0.0  ;;  %v3718_v61 = vmul.f32 %v9301_v60, %v3682_v45  ;;  %v3783_v33 = vmax.f32 %v3751_v28, 0.0 }
 0x767   :  { %v7826_v8 = vpop.eup %7825  ;;  %7837 = vrsqrt.f32 %v2963_v23  ;;  %7135 = vmatmul.mubr.msk.f32.vlgmr.msra.gmra.mrb[64].mxu1 %vm1180_vm4, %v9272_v21  ;;  %7531 = vmatprep.subr.bf16.mxu1 %v7530_v41  ;;  %v2922_v48 = vpop.xlane.xlu1 %2921  ;;  %v3717_v13 = vmul.f32 %v9301_v60, %v3681_v15  ;;  %v3684_v56 = vmul.f32 %v7824_v5, %v9212_v16  ;;  %v3025_v6 = vmul.f32 %v7822_v57, %v9810_v12  ;;  %v9816_v23 = vld [vmem:[#allocation29_spill] sm:$0xff]  ;;  %v9818_v5 = vld [vmem:[#allocation30_spill] sm:$0xff] }
 0x768   :  { %v2919_v37 = vpop.xlane.xlu0 %2918  ;;  %7137 = vmatprep.mubr.msk.f32.mxu1 %vm1180_vm4, %v3023_v29  ;;  %7533 = vmatpush3.bf16.msra.mxu1 %v7530_v41  ;;  %v2966_v35 = vmax.f32 %v2922_v48, 1e-24  ;;  %v3754_v31 = vadd.f32 %v9310_v24, %v3718_v61  ;;  %v3683_v20 = vmul.f32 %v7826_v8, %v9809_v4  ;;  %v7534_v47 = vpack.c.bf16 %v3784_v11, %v3783_v33  ;;  %v9817_v41 = vld [vmem:[#allocation45_spill] sm:$0xff] }
 0x769   :  { %v2965_v40 = vmax.f32 %v2919_v37, 1e-24  ;;  %v3753_v21 = vadd.f32 %v9310_v24, %v3717_v13  ;;  %v3720_v54 = vmul.f32 %v9301_v60, %v3684_v56 }
 0x76a   :  { %v7828_v62 = vpop.eup %7827  ;;  %7839 = vrsqrt.f32 %v2966_v35  ;;  %v3786_v9 = vmax.f32 %v3754_v31, 0.0  ;;  %v3719_v16 = vmul.f32 %v9301_v60, %v3683_v20  ;;  %7535 = vmatprep.subr.bf16.mxu1 %v7534_v47 }
 0x76b   :  { %v7830_v22 = vpop.eup %7829  ;;  %7841 = vrsqrt.f32 %v2965_v40  ;;  %7138 = vmatmul.mubr.msk.f32.gmra.mrb[66].mxu1 %vm1180_vm4, %v9811_v25  ;;  %v2928_v43 = vpop.xlane.xlu1 %2927  ;;  %v3785_v27 = vmax.f32 %v3753_v21, 0.0  ;;  %v3756_v18 = vadd.f32 %v9310_v24, %v3720_v54  ;;  %v3686_v34 = vmul.f32 %v7828_v62, %v9812_v42  ;;  %v9819_v40 = vld [vmem:[#allocation19_spill] sm:$0xff] }
 0x76c   :  { %v2925_v10 = vpop.xlane.xlu0 %2924  ;;  %7537 = vmatpush3.bf16.msra.mxu1 %v7534_v47  ;;  %7148 = vmatprep.mubr.msk.f32.mxu1 %vm1180_vm4, %v3025_v6  ;;  %v2968_v17 = vmax.f32 %v2928_v43, 1e-24  ;;  %v3755_v52 = vadd.f32 %v9310_v24, %v3719_v16  ;;  %v3685_v46 = vmul.f32 %v7830_v22, %v9813_v53  ;;  %v9821_v6 = vld [vmem:[#allocation21_spill] sm:$0xff]  ;;  %v9822_v16 = vld [vmem:[#allocation22_spill] sm:$0xff]  ;;  %v9823_v43 = vld [vmem:[#allocation32_spill] sm:$0xff] }
 0x76d   :  { %v2967_v63 = vmax.f32 %v2925_v10, 1e-24  ;;  %v7538_v1 = vpack.c.bf16 %v3786_v9, %v3785_v27  ;;  %v3788_v44 = vmax.f32 %v3756_v18, 0.0  ;;  %v3722_v55 = vmul.f32 %v9301_v60, %v3686_v34  ;;  %v9824_v27 = vld [vmem:[#allocation33_spill] sm:$0xff] }
 0x76e   :  { %v7832_v51 = vpop.eup %7831  ;;  %7843 = vrsqrt.f32 %v2968_v17  ;;  %v3787_v49 = vmax.f32 %v3755_v52, 0.0  ;;  %v3721_v32 = vmul.f32 %v9301_v60, %v3685_v46  ;;  %v9825_v17 = vld [vmem:[#allocation34_spill] sm:$0xff]  ;;  %v9826_v52 = vld [vmem:[#allocation35_spill] sm:$0xff]  ;;  %v7959_v46 = vmov 0.0|0.0  }
 0x76f   :  { %v7834_v14 = vpop.eup %7833  ;;  %7845 = vrsqrt.f32 %v2967_v63  ;;  %7149 = vmatmul.mubr.msk.f32.vlgmr.msra.gmra.mrb[68].mxu1 %vm1180_vm4, %v9814_v0  ;;  %7539 = vmatprep.subr.bf16.mxu1 %v7538_v1  ;;  %v2934_v38 = vpop.xlane.xlu1 %2933  ;;  %v3758_v58 = vadd.f32 %v9310_v24, %v3722_v55  ;;  %v3688_v39 = vmul.f32 %v7832_v51, %v9815_v19  ;;  %v9829_v19 = vld [vmem:[#allocation8_spill] sm:$0xff] }
 0x770   :  { %v2931_v3 = vpop.xlane.xlu0 %2930  ;;  %v7836_v36 = vpop.eup %7835  ;;  %7541 = vmatpush3.bf16.msra.mxu1 %v7538_v1  ;;  %v2970_v2 = vmax.f32 %v2934_v38, 1e-24  ;;  %v7542_v59 = vpack.c.bf16 %v3788_v44, %v3787_v49  ;;  %v3757_v45 = vadd.f32 %v9310_v24, %v3721_v32  ;;  %v3687_v28 = vmul.f32 %v7834_v14, %v9817_v41  ;;  %7560 = vmatprep.subr.bf16.mxu0 %v7959_v46  ;;  %v9827_v44 = vld [vmem:[#allocation6_spill] sm:$0xff]  ;;  %v9828_v32 = vld [vmem:[#allocation5_spill] sm:$0xff] }
 0x771   :  { %v2969_v26 = vmax.f32 %v2931_v3, 1e-24  ;;  %v7838_v50 = vpop.eup %7837  ;;  %v3028_v30 = vmul.f32 %v7836_v36, %v9816_v23  ;;  %v3790_v57 = vmax.f32 %v3758_v58, 0.0  ;;  %v3724_v15 = vmul.f32 %v9301_v60, %v3688_v39 }
 0x772   :  { %7847 = vrsqrt.f32 %v2970_v2  ;;  %7543 = vmatprep.subr.bf16.mxu1 %v7542_v59  ;;  %v3027_v7 = vmul.f32 %v7838_v50, %v9818_v5  ;;  %v3789_v29 = vmax.f32 %v3757_v45, 0.0  ;;  %v3723_v8 = vmul.f32 %v9301_v60, %v3687_v28  ;;  %v9820_v60 = vld [vmem:[#allocation20_spill] sm:$0xff]  ;;  %v9830_v50 = vld [vmem:[#allocation7_spill] sm:$0xff] }
 0x773   :  { %7849 = vrsqrt.f32 %v2969_v26  ;;  %v2940_v11 = vpop.xlane.xlu1 %2939  ;;  %v3760_v48 = vadd.f32 %v9310_v24, %v3724_v15  ;;  %v7961_v1 = vmov 0.0   ;;  %v9490_v55 = vmax.f32 %v9827_v44, 0.0 }
 0x774   :  { %v2937_v61 = vpop.xlane.xlu0 %2936  ;;  %v7840_v37 = vpop.eup %7839  ;;  %7545 = vmatpush3.bf16.msra.mxu1 %v7542_v59  ;;  %7151 = vmatprep.mubr.msk.f32.mxu1 %vm1180_vm4, %v3027_v7  ;;  %v2972_v33 = vmax.f32 %v2940_v11, 1e-24  ;;  %v7546_v56 = vpack.c.bf16 %v3790_v57, %v3789_v29  ;;  %v3759_v4 = vadd.f32 %v9310_v24, %v3723_v8  ;;  %v9496_v14 = vmax.f32 %v9828_v32, 0.0  ;;  %v9831_v8 = vld [vmem:[#allocation10_spill] sm:$0xff] }
 0x775   :  { %v2971_v13 = vmax.f32 %v2937_v61, 1e-24  ;;  %v7842_v35 = vpop.eup %7841  ;;  %v3030_v31 = vmul.f32 %v7840_v37, %v9819_v40  ;;  %7152 = vmatmul.mubr.msk.f32.gmra.mrb[70].mxu1 %vm1180_vm4, %v3028_v30  ;;  %v3792_v20 = vmax.f32 %v3760_v48, 0.0  ;;  %7201 = vmatprep.mubr.msk.f32.mxu0 %vm7960_vm5, %v7961_v1  ;;  %v1172_v51 = vmul.f32 %v9490_v55, %v9490_v55 }
 0x776   :  { %7851 = vrsqrt.f32 %v2972_v33  ;;  %7547 = vmatprep.subr.bf16.mxu1 %v7546_v56  ;;  %v3029_v47 = vmul.f32 %v7842_v35, %v9820_v60  ;;  %v3791_v21 = vmax.f32 %v3759_v4, 0.0  ;;  %v1173_v38 = vmul.f32 %v9496_v14, %v9496_v14 }
 0x777   :  { %7853 = vrsqrt.f32 %v2971_v13  ;;  %v1181_v49 = vsel %vm1180_vm4, %v1172_v51, 0.0  ;;  %v9502_v39 = vmax.f32 %v9829_v19, 0.0  ;;  %v9507_v23 = vmax.f32 %v9830_v50, 0.0 }
 0x778   :  { %v7844_v54 = vpop.eup %7843  ;;  %7162 = vmatprep.mubr.msk.f32.mxu1 %vm1180_vm4, %v3029_v47  ;;  %v7550_v12 = vpack.c.bf16 %v3792_v20, %v3791_v21  ;;  %v1182_v0 = vrot.slane %v1181_v49, 4  ;;  %v1188_v58 = vsel %vm1180_vm4, %v1173_v38, 0.0  ;;  %v9514_v48 = vmax.f32 %v9831_v8, 0.0  ;;  %v9833_v38 = vld [vmem:[#allocation12_spill] sm:$0xff] }
 0x779   :  { %v7846_v62 = vpop.eup %7845  ;;  %7163 = vmatmul.mubr.msk.f32.vlgmr.msra.gmra.mrb[72].mxu1 %vm1180_vm4, %v3030_v31  ;;  %v3032_v9 = vmul.f32 %v7844_v54, %v9821_v6  ;;  %v1189_v2 = vrot.slane %v1188_v58, 4  ;;  %v1174_v26 = vmul.f32 %v9502_v39, %v9502_v39  ;;  %v1175_v15 = vmul.f32 %v9507_v23, %v9507_v23 }
 0x77a   :  { %7549 = vmatpush3.bf16.msra.mxu1 %v7546_v56  ;;  %v3031_v22 = vmul.f32 %v7846_v62, %v9822_v16  ;;  %v1183_v3 = vadd.f32 %v1182_v0, %v1181_v49  ;;  %v1176_v31 = vmul.f32 %v9514_v48, %v9514_v48  ;;  %v9832_v62 = vld [vmem:[#allocation9_spill] sm:$0xff] }
 0x77b   :  { %7551 = vmatprep.subr.bf16.mxu1 %v7550_v12  ;;  %v1190_v45 = vadd.f32 %v1189_v2, %v1188_v58  ;;  %v1195_v30 = vsel %vm1180_vm4, %v1174_v26, 0.0  ;;  %v1202_v61 = vsel %vm1180_vm4, %v1175_v15, 0.0 }
 0x77c   :  { %v7848_v24 = vpop.eup %7847  ;;  %7165 = vmatprep.mubr.msk.f32.mxu1 %vm1180_vm4, %v3031_v22  ;;  %v1184_v36 = vrot.slane %v1183_v3, 2  ;;  %v1196_v28 = vrot.slane %v1195_v30, 4  ;;  %v1203_v56 = vrot.slane %v1202_v61, 4  ;;  %v1209_v21 = vsel %vm1180_vm4, %v1176_v31, 0.0 }
 0x77d   :  { %v7850_v25 = vpop.eup %7849  ;;  %v3034_v10 = vmul.f32 %v7848_v24, %v9823_v43  ;;  %7166 = vmatmul.mubr.msk.f32.gmra.mrb[74].mxu1 %vm1180_vm4, %v3032_v9  ;;  %v1191_v41 = vrot.slane %v1190_v45, 2  ;;  %v1210_v43 = vrot.slane %v1209_v21, 4 }
 0x77e   :  { %7553 = vmatpush3.bf16.msra.mxu1 %v7550_v12  ;;  %v3033_v18 = vmul.f32 %v7850_v25, %v9824_v27  ;;  %v1185_v59 = vadd.f32 %v1184_v36, %v1183_v3  ;;  %v1197_v29 = vadd.f32 %v1196_v28, %v1195_v30  ;;  %v1204_v60 = vadd.f32 %v1203_v56, %v1202_v61 }
 0x77f   :  { %7554 = vmatprep.subr.bf16.mxu1 %v7959_v46  ;;  %v1192_v7 = vadd.f32 %v1191_v41, %v1190_v45  ;;  %v9520_v12 = vmax.f32 %v9832_v62, 0.0  ;;  %v9527_v3 = vmax.f32 %v9833_v38, 0.0 }
 0x780   :  { %v7852_v42 = vpop.eup %7851  ;;  %7176 = vmatprep.mubr.msk.f32.mxu1 %vm1180_vm4, %v3033_v18  ;;  %v1186_v57 = vrot.slane %v1185_v59, 1  ;;  %v1198_v35 = vrot.slane %v1197_v29, 2  ;;  %v1205_v24 = vrot.slane %v1204_v60, 2 }
 0x781   :  { %v7854_v34 = vpop.eup %7853  ;;  %7177 = vmatmul.mubr.msk.f32.vlgmr.msra.gmra.mrb[76].mxu1 %vm1180_vm4, %v3034_v10  ;;  %v3036_v63 = vmul.f32 %v7852_v42, %v9825_v17  ;;  %v1193_v13 = vrot.slane %v1192_v7, 1  ;;  %v1177_v18 = vmul.f32 %v9520_v12, %v9520_v12  ;;  %v1178_v41 = vmul.f32 %v9527_v3, %v9527_v3 }
 0x782   :  { %v3035_v53 = vmul.f32 %v7854_v34, %v9826_v52  ;;  %v1187_v5 = vadd.f32 %v1186_v57, %v1185_v59  ;;  %v1199_v47 = vadd.f32 %v1198_v35, %v1197_v29 }
 0x783   :  { %v1194_v20 = vadd.f32 %v1193_v13, %v1192_v7  ;;  %v1216_v32 = vsel %vm1180_vm4, %v1177_v18, 0.0  ;;  %v1223_v13 = vsel %vm1180_vm4, %v1178_v41, 0.0 }
 0x784   :  { %7179 = vmatprep.mubr.msk.f32.mxu1 %vm1180_vm4, %v3035_v53  ;;  %v1237_v33 = vmax.f32 %v1187_v5, 1e-24  ;;  %v1200_v25 = vrot.slane %v1199_v47, 1  ;;  %v1211_v53 = vadd.f32 %v1210_v43, %v1209_v21  ;;  %v1217_v45 = vrot.slane %v1216_v32, 4 }
 0x785   :  { %7180 = vmatmul.mubr.msk.f32.gmra.mrb[78].mxu1 %vm1180_vm4, %v3036_v63  ;;  %v1238_v22 = vmax.f32 %v1194_v20, 1e-24  ;;  %v1206_v63 = vadd.f32 %v1205_v24, %v1204_v60 }
 0x786   :  { %7190 = vmatprep.mubr.msk.f32.mxu1 %vm7960_vm5, %v7961_v1  ;;  %v1201_v52 = vadd.f32 %v1200_v25, %v1199_v47  ;;  %v1212_v26 = vrot.slane %v1211_v53, 2  ;;  %v1218_v7 = vadd.f32 %v1217_v45, %v1216_v32  ;;  %v1224_v47 = vrot.slane %v1223_v13, 4 }
 0x787   :  { %v1207_v36 = vrot.slane %v1206_v63, 1 }
 0x788   :  { %v1239_v2 = vmax.f32 %v1201_v52, 1e-24  ;;  %v1213_v15 = vadd.f32 %v1212_v26, %v1211_v53  ;;  %v1219_v20 = vrot.slane %v1218_v7, 2  ;;  %v1225_v25 = vadd.f32 %v1224_v47, %v1223_v13 }
 0x789   :  { %v1208_v28 = vadd.f32 %v1207_v36, %v1206_v63 }
 0x78b   :  { %v1240_v35 = vmax.f32 %v1208_v28, 1e-24 }
 0x819   :  { %v7080_v11 = vpop.f32.mrb[48].mxu1 }
 0x81a   :  { %7855 = vtanh.f32 %v7080_v11  ;;  %v3871_v37 = vpop.f32.mrb[49].mxu1 }
 0x81b   :  { %7857 = vtanh.f32 %v3871_v37  ;;  %v9834_v37 = vld [vmem:[#allocation11_spill] sm:$0xff] }
 0x81d   :  { %v7083_v40 = vpop.f32.mrb[50].mxu1 }
 0x81e   :  { %7859 = vtanh.f32 %v7083_v40  ;;  %v3881_v4 = vpop.f32.mrb[51].mxu1  ;;  %v1214_v40 = vrot.slane %v1213_v15, 1 }
 0x81f   :  { %7861 = vtanh.f32 %v3881_v4 }
 0x820   :  { %7863 = vrsqrt.f32 %v1237_v33  ;;  %v9538_v33 = vmax.f32 %v9834_v37, 0.0 }
 0x822   :  { %v7094_v54 = vpop.f32.mrb[52].mxu1  ;;  %v1179_v62 = vmul.f32 %v9538_v33, %v9538_v33 }
 0x823   :  { %7865 = vtanh.f32 %v7094_v54  ;;  %v3968_v6 = vpop.f32.mrb[53].mxu1 }
 0x824   :  { %v7856_v9 = vpop.eup %7855  ;;  %7867 = vtanh.f32 %v3968_v6 }
 0x825   :  { %v7858_v16 = vpop.eup %7857 }
 0x826   :  { %v7097_v10 = vpop.f32.mrb[54].mxu1  ;;  %v7555_v27 = vpack.c.bf16 %v7856_v9, %v7858_v16  ;;  %v1215_v9 = vadd.f32 %v1214_v40, %v1213_v15  ;;  %v1220_v16 = vadd.f32 %v1219_v20, %v1218_v7 }
 0x827   :  { %7869 = vtanh.f32 %v7097_v10  ;;  %v3978_v42 = vpop.f32.mrb[55].mxu1 }
 0x828   :  { %v7860_v34 = vpop.eup %7859  ;;  %7871 = vtanh.f32 %v3978_v42  ;;  %7556 = vmatpush3.bf16.msra.mxu1 %v7555_v27  ;;  %v1230_v27 = vsel %vm1180_vm4, %v1179_v62, 0.0  ;;  %v1241_v42 = vmax.f32 %v1215_v9, 1e-24  ;;  %v1221_v63 = vrot.slane %v1220_v16, 1 }
 0x829   :  { %v7862_v17 = vpop.eup %7861  ;;  %7873 = vrsqrt.f32 %v1238_v22  ;;  %7557 = vmatprep.subr.bf16.mxu1 %v7959_v46  ;;  %v1231_v53 = vrot.slane %v1230_v27, 4 }
 0x82a   :  { %v7864_v44 = vpop.eup %7863  ;;  %v7108_v51 = vpop.f32.mrb[56].mxu1  ;;  %v7558_v49 = vpack.c.bf16 %v7860_v34, %v7862_v17 }
 0x82b   :  { %7875 = vtanh.f32 %v7108_v51  ;;  %v4065_v0 = vpop.f32.mrb[57].mxu1  ;;  %v1253_v19 = vmul.f32 %v7864_v44, %v9490_v55  ;;  %v1226_v44 = vrot.slane %v1225_v25, 2 }
 0x82c   :  { %7877 = vtanh.f32 %v4065_v0  ;;  %7559 = vmatpush3.bf16.msra.mxu1 %v7558_v49 }
 0x82d   :  { %v7866_v58 = vpop.eup %7865  ;;  %7566 = vmatprep.subr.bf16.mxu1 %v7959_v46  ;;  %v1227_v36 = vadd.f32 %v1226_v44, %v1225_v25 }
 0x82e   :  { %v7868_v59 = vpop.eup %7867  ;;  %v7111_v50 = vpop.f32.mrb[58].mxu1 }
 0x82f   :  { %7879 = vtanh.f32 %v7111_v50  ;;  %v4075_v30 = vpop.f32.mrb[59].mxu1  ;;  %7191 = vmatmul.mubr.msk.f32.vlgmr.msra.gmra.mrb[80].mxu1 %vm1180_vm4, %v1253_v19  ;;  %v7561_v57 = vpack.c.bf16 %v7866_v58, %v7868_v59  ;;  %v1232_v19 = vadd.f32 %v1231_v53, %v1230_v27  ;;  %v1228_v41 = vrot.slane %v1227_v36, 1  ;;  %v5185_v27 = vld [vmem:[%s9714_s8] sm:$0xff]  ;;  %v5188_v53 = vld [vmem:[%s9714_s8 + $0x18] sm:$0xff] }
 0x830   :  { %7881 = vtanh.f32 %v4075_v30  ;;  %7212 = vmatprep.mubr.msk.f32.mxu1 %vm7960_vm5, %v7961_v1 }
 0x831   :  { %v7870_v55 = vpop.eup %7869  ;;  %7883 = vrsqrt.f32 %v1239_v2  ;;  %7562 = vmatpush3.bf16.msra.mxu0 %v7561_v57  ;;  %v1233_v57 = vrot.slane %v1232_v19, 2 }
 0x832   :  { %v7872_v5 = vpop.eup %7871  ;;  %v7122_v29 = vpop.f32.mrb[60].mxu1  ;;  %7563 = vmatprep.subr.bf16.mxu0 %v7959_v46 }
 0x833   :  { %v7874_v11 = vpop.eup %7873  ;;  %7885 = vtanh.f32 %v7122_v29  ;;  %v4162_v61 = vpop.f32.mrb[61].mxu1  ;;  %v7564_v8 = vpack.c.bf16 %v7870_v55, %v7872_v5  ;;  %v1234_v29 = vadd.f32 %v1233_v57, %v1232_v19 }
 0x834   :  { %7887 = vtanh.f32 %v4162_v61  ;;  %v1254_v4 = vmul.f32 %v7874_v11, %v9496_v14  ;;  %v1229_v11 = vadd.f32 %v1228_v41, %v1227_v36 }
 0x835   :  { %v7876_v56 = vpop.eup %7875  ;;  %7565 = vmatpush3.bf16.msra.mxu0 %v7564_v8  ;;  %v1235_v40 = vrot.slane %v1234_v29, 1 }
 0x836   :  { %v7878_v31 = vpop.eup %7877  ;;  %v7125_v60 = vpop.f32.mrb[62].mxu1  ;;  %7572 = vmatprep.subr.bf16.mxu0 %v7959_v46 }
 0x837   :  { %7889 = vtanh.f32 %v7125_v60  ;;  %v4172_v21 = vpop.f32.mrb[63].mxu1  ;;  %v7567_v54 = vpack.c.bf16 %v7876_v56, %v7878_v31  ;;  %v1243_v31 = vmax.f32 %v1229_v11, 1e-24 }
 0x838   :  { %7891 = vtanh.f32 %v4172_v21  ;;  %7202 = vmatmul.mubr.msk.f32.vlgmr.msra.gmra.mrb[80].mxu0 %vm1180_vm4, %v1254_v4 }
 0x839   :  { %v7880_v6 = vpop.eup %7879  ;;  %7893 = vrsqrt.f32 %v1240_v35  ;;  %7568 = vmatpush3.bf16.msra.mxu1 %v7567_v54  ;;  %7223 = vmatprep.mubr.msk.f32.mxu0 %vm7960_vm5, %v7961_v1 }
 0x83a   :  { %v7882_v14 = vpop.eup %7881  ;;  %v7136_v22 = vpop.f32.mrb[64].mxu1  ;;  %7569 = vmatprep.subr.bf16.mxu1 %v7959_v46 }
 0x83b   :  { %v7884_v24 = vpop.eup %7883  ;;  %7895 = vtanh.f32 %v7136_v22  ;;  %v4259_v43 = vpop.f32.mrb[65].mxu1  ;;  %v7570_v10 = vpack.c.bf16 %v7880_v6, %v7882_v14 }
 0x83c   :  { %7897 = vtanh.f32 %v4259_v43  ;;  %v1255_v17 = vmul.f32 %v7884_v24, %v9502_v39  ;;  %v1222_v39 = vadd.f32 %v1221_v63, %v1220_v16 }
 0x83d   :  { %v7886_v18 = vpop.eup %7885  ;;  %7571 = vmatpush3.bf16.msra.mxu1 %v7570_v10 }
 0x83e   :  { %v7888_v34 = vpop.eup %7887  ;;  %v7139_v52 = vpop.f32.mrb[66].mxu1  ;;  %7578 = vmatprep.subr.bf16.mxu1 %v7959_v46  ;;  %v1242_v30 = vmax.f32 %v1222_v39, 1e-24 }
 0x83f   :  { %7899 = vtanh.f32 %v7139_v52  ;;  %v4269_v51 = vpop.f32.mrb[67].mxu1  ;;  %v7573_v49 = vpack.c.bf16 %v7886_v18, %v7888_v34  ;;  %v5186_v18 = vld [vmem:[%s9714_s8 + $0x8] sm:$0xff]  ;;  %v5187_v52 = vld [vmem:[%s9714_s8 + $0x10] sm:$0xff] }
 0x840   :  { %7901 = vtanh.f32 %v4269_v51  ;;  %7213 = vmatmul.mubr.msk.f32.vlgmr.msra.gmra.mrb[82].mxu1 %vm1180_vm4, %v1255_v17  ;;  %v7602_v34 = vpack.c.bf16 %v5186_v18, %v5185_v27 }
 0x841   :  { %v7890_v32 = vpop.eup %7889  ;;  %7903 = vrsqrt.f32 %v1241_v42  ;;  %7574 = vmatpush3.bf16.msra.mxu0 %v7573_v49  ;;  %7234 = vmatprep.mubr.msk.f32.mxu1 %vm7960_vm5, %v7961_v1 }
 0x842   :  { %v7892_v0 = vpop.eup %7891  ;;  %v7150_v38 = vpop.f32.mrb[68].mxu1  ;;  %7575 = vmatprep.subr.bf16.mxu0 %v7959_v46 }
 0x843   :  { %v7894_v58 = vpop.eup %7893  ;;  %7905 = vtanh.f32 %v7150_v38  ;;  %v4356_v2 = vpop.f32.mrb[69].mxu1  ;;  %v7576_v26 = vpack.c.bf16 %v7890_v32, %v7892_v0  ;;  %v7606_v32 = vpack.c.bf16 %v5188_v53, %v5187_v52 }
 0x844   :  { %7907 = vtanh.f32 %v4356_v2  ;;  %v1256_v50 = vmul.f32 %v7894_v58, %v9507_v23 }
 0x845   :  { %v7896_v59 = vpop.eup %7895  ;;  %7577 = vmatpush3.bf16.msra.mxu0 %v7576_v26  ;;  %v5192_v26 = vld [vmem:[%s9714_s8 + $0x38] sm:$0xff] }
 0x846   :  { %v7898_v45 = vpop.eup %7897  ;;  %7584 = vmatprep.subr.bf16.mxu0 %v7959_v46 }
 0x847   :  { %v7579_v55 = vpack.c.bf16 %v7896_v59, %v7898_v45 }
 0x848   :  { %7224 = vmatmul.mubr.msk.f32.vlgmr.msra.gmra.mrb[82].mxu0 %vm1180_vm4, %v1256_v50  ;;  %v7153_v28 = vpop.f32.mrb[70].mxu1 }
 0x849   :  { %v7900_v15 = vpop.eup %7899  ;;  %7909 = vtanh.f32 %v7153_v28  ;;  %7580 = vmatpush3.bf16.msra.mxu1 %v7579_v55  ;;  %v4366_v5 = vpop.f32.mrb[71].mxu1  ;;  %7245 = vmatprep.mubr.msk.f32.mxu0 %vm7960_vm5, %v7961_v1 }
 0x84a   :  { %v7902_v7 = vpop.eup %7901  ;;  %7911 = vtanh.f32 %v4366_v5  ;;  %7581 = vmatprep.subr.bf16.mxu1 %v7959_v46 }
 0x84b   :  { %v7904_v23 = vpop.eup %7903  ;;  %7913 = vrsqrt.f32 %v1242_v30  ;;  %v7582_v61 = vpack.c.bf16 %v7900_v15, %v7902_v7 }
 0x84c   :  { %v7164_v8 = vpop.f32.mrb[72].mxu1  ;;  %v1257_v35 = vmul.f32 %v7904_v23, %v9514_v48  ;;  %v1236_v48 = vadd.f32 %v1235_v40, %v1234_v29  ;;  %v34_v40 = vld [vmem:[%s9706_s0 + $0x8] sm:$0xff] }
 0x84d   :  { %v7906_v37 = vpop.eup %7905  ;;  %7915 = vtanh.f32 %v7164_v8  ;;  %7583 = vmatpush3.bf16.msra.mxu1 %v7582_v61  ;;  %v4453_v13 = vpop.f32.mrb[73].mxu1 }
 0x84e   :  { %v7908_v56 = vpop.eup %7907  ;;  %7917 = vtanh.f32 %v4453_v13  ;;  %7590 = vmatprep.subr.bf16.mxu1 %v7959_v46  ;;  %v1244_v16 = vmax.f32 %v1236_v48, 1e-24  ;;  %v37_v48 = vld [vmem:[%s9706_s0 + $0x20] sm:$0xff] }
 0x84f   :  { %v7585_v4 = vpack.c.bf16 %v7906_v37, %v7908_v56  ;;  %v33_v56 = vld [vmem:[%s9706_s0] sm:$0xff] }
 0x850   :  { %7235 = vmatmul.mubr.msk.f32.vlgmr.msra.gmra.mrb[84].mxu1 %vm1180_vm4, %v1257_v35  ;;  %v7167_v20 = vpop.f32.mrb[74].mxu1 }
 0x851   :  { %7919 = vtanh.f32 %v7167_v20  ;;  %7586 = vmatpush3.bf16.msra.mxu0 %v7585_v4  ;;  %v4463_v60 = vpop.f32.mrb[75].mxu1  ;;  %7256 = vmatprep.mubr.msk.f32.mxu1 %vm7960_vm5, %v7961_v1  ;;  %v35_v4 = vld [vmem:[%s9706_s0 + $0x10] sm:$0xff] }
 0x852   :  { %7921 = vtanh.f32 %v4463_v60  ;;  %7587 = vmatprep.subr.bf16.mxu0 %v7959_v46  ;;  %v36_v60 = vld [vmem:[%s9706_s0 + $0x18] sm:$0xff] }
 0x853   :  { %v7910_v47 = vpop.eup %7909  ;;  %7923 = vrsqrt.f32 %v1243_v31 }
 0x854   :  { %v7912_v21 = vpop.eup %7911  ;;  %v7178_v54 = vpop.f32.mrb[76].mxu1 }
 0x855   :  { %v7914_v62 = vpop.eup %7913  ;;  %7925 = vtanh.f32 %v7178_v54  ;;  %v4550_v6 = vpop.f32.mrb[77].mxu1  ;;  %v7588_v9 = vpack.c.bf16 %v7910_v47, %v7912_v21  ;;  %v38_v54 = vld [vmem:[%s9706_s0 + $0x28] sm:$0xff] }
 0x856   :  { %7927 = vtanh.f32 %v4550_v6  ;;  %v1258_v24 = vmul.f32 %v7914_v62, %v9520_v12  ;;  %v40_v62 = vld [vmem:[%s9706_s0 + $0x38] sm:$0xff] }
 0x857   :  { %v7916_v14 = vpop.eup %7915  ;;  %7589 = vmatpush3.bf16.msra.mxu0 %v7588_v9  ;;  %v39_v9 = vld [vmem:[%s9706_s0 + $0x30] sm:$0xff]  ;;  %s7964_s0 = smov 32  }
 0x858   :  { %v7918_v22 = vpop.eup %7917  ;;  %v7181_v25 = vpop.f32.mrb[78].mxu1  ;;  %7596 = vmatprep.subr.bf16.mxu0 %v7959_v46 }
 0x859   :  { %7929 = vtanh.f32 %v7181_v25  ;;  %v4560_v43 = vpop.f32.mrb[79].mxu1  ;;  %v7591_v10 = vpack.c.bf16 %v7916_v14, %v7918_v22 }
 0x85a   :  { %7931 = vtanh.f32 %v4560_v43  ;;  %7246 = vmatmul.mubr.msk.f32.vlgmr.msra.gmra.mrb[84].mxu0 %vm1180_vm4, %v1258_v24 }
 0x85b   :  { %v7920_v42 = vpop.eup %7919  ;;  %7933 = vrsqrt.f32 %v1244_v16  ;;  %7592 = vmatpush3.bf16.msra.mxu1 %v7591_v10  ;;  %7267 = vmatprep.mubr.msk.f32.mxu0 %vm7960_vm5, %v7961_v1 }
 0x85c   :  { %v7922_v12 = vpop.eup %7921  ;;  %7593 = vmatprep.subr.bf16.mxu1 %v7959_v46 }
 0x85d   :  { %v7924_v17 = vpop.eup %7923  ;;  %v7594_v63 = vpack.c.bf16 %v7920_v42, %v7922_v12 }
 0x85e   :  { %v1259_v49 = vmul.f32 %v7924_v17, %v9527_v3  ;;  %v5189_v3 = vld [vmem:[%s9714_s8 + $0x20] sm:$0xff] }
 0x85f   :  { %v7926_v44 = vpop.eup %7925  ;;  %7595 = vmatpush3.bf16.msra.mxu1 %v7594_v63 }
 0x860   :  { %v7928_v51 = vpop.eup %7927  ;;  %7603 = vmatprep.subr.bf16.mxu1 %v7602_v34 }
 0x861   :  { %v7597_v0 = vpack.c.bf16 %v7926_v44, %v7928_v51 }
 0x862   :  { %7257 = vmatmul.mubr.msk.f32.vlgmr.msra.gmra.mrb[86].mxu1 %vm1180_vm4, %v1259_v49 }
 0x863   :  { %v7930_v39 = vpop.eup %7929  ;;  %7598 = vmatpush3.bf16.msra.mxu0 %v7597_v0  ;;  %7605 = vmatpush3.bf16.msra.mxu1 %v7602_v34 }
 0x864   :  { %v7932_v38 = vpop.eup %7931  ;;  %7599 = vmatprep.subr.bf16.mxu0 %v7959_v46  ;;  %7607 = vmatprep.subr.bf16.mxu1 %v7606_v32  ;;  %v5190_v46 = vld [vmem:[%s9714_s8 + $0x28] sm:$0xff] }
 0x865   :  { %v7934_v58 = vpop.eup %7933  ;;  %v7600_v19 = vpack.c.bf16 %v7930_v39, %v7932_v38  ;;  %v7610_v2 = vpack.c.bf16 %v5190_v46, %v5189_v3 }
 0x866   :  { %v1260_v36 = vmul.f32 %v7934_v58, %v9538_v33  ;;  %v5191_v33 = vld [vmem:[%s9714_s8 + $0x30] sm:$0xff] }
 0x867   :  { %7601 = vmatpush3.bf16.msra.mxu0 %v7600_v19  ;;  %7609 = vmatpush3.bf16.msra.mxu1 %v7606_v32  ;;  %v7614_v59 = vpack.c.bf16 %v5192_v26, %v5191_v33 }
 0x868   :  { %7298 = vmatprep.subr.mxu0 %v7961_v1  ;;  %7611 = vmatprep.subr.bf16.mxu1 %v7610_v2 }
 0x86a   :  { %7268 = vmatmul.mubr.msk.f32.vlgmr.msra.gmra.mrb[86].mxu0 %vm1180_vm4, %v1260_v36 }
 0x86b   :  { %7300 = vmatprep.mubr.msk.f32.mxu0 %vm7960_vm5, %v7961_v1  ;;  %7613 = vmatpush3.bf16.msra.mxu1 %v7610_v2 }
 0x86c   :  { %7615 = vmatprep.subr.bf16.mxu1 %v7614_v59 }
 0x86f   :  { %7617 = vmatpush3.bf16.msra.mxu1 %v7614_v59 }
 0x870   :  { %7328 = vmatprep.subr.mxu1 %v7961_v1 }
 0x902   :  { %v4670_v45 = vpop.f32.mrb[80].mxu1 }
 0x903   :  { %v7192_v50 = vpop.f32.mrb[81].mxu1  ;;  %7286 = vmatprep.mubr.msk.f32.mxu1 %vm189_vm1, %v4670_v45 }
 0x90b   :  { %v4743_v30 = vpop.f32.mrb[80].mxu0 }
 0x90c   :  { %v7203_v57 = vpop.f32.mrb[81].mxu0  ;;  %7287 = vmatmul.mubr.msk.f32.vlgmr.msra.gmra.mrb[88].mxu1 %vm189_vm1, %v4743_v30 }
 0x913   :  { %v4816_v41 = vpop.f32.mrb[82].mxu1 }
 0x914   :  { %v7214_v55 = vpop.f32.mrb[83].mxu1  ;;  %7289 = vmatprep.mubr.msk.f32.mxu1 %vm189_vm1, %v4816_v41 }
 0x91b   :  { %v4889_v28 = vpop.f32.mrb[82].mxu0 }
 0x91c   :  { %v7225_v15 = vpop.f32.mrb[83].mxu0  ;;  %7290 = vmatmul.mubr.msk.f32.gmra.mrb[90].mxu1 %vm189_vm1, %v4889_v28 }
 0x923   :  { %v4962_v5 = vpop.f32.mrb[84].mxu1 }
 0x924   :  { %v7236_v7 = vpop.f32.mrb[85].mxu1  ;;  %7292 = vmatprep.mubr.msk.f32.mxu1 %vm189_vm1, %v4962_v5 }
 0x92d   :  { %v5035_v23 = vpop.f32.mrb[84].mxu0 }
 0x92e   :  { %v7247_v29 = vpop.f32.mrb[85].mxu0  ;;  %7293 = vmatmul.mubr.msk.f32.gmra.mrb[92].mxu1 %vm189_vm1, %v5035_v23 }
 0x935   :  { %v5108_v11 = vpop.f32.mrb[86].mxu1 }
 0x936   :  { %v7258_v61 = vpop.f32.mrb[87].mxu1  ;;  %7295 = vmatprep.mubr.msk.f32.mxu1 %vm189_vm1, %v5108_v11 }
 0x93d   :  { %v5181_v8 = vpop.f32.mrb[86].mxu0 }
 0x93e   :  { %v7269_v37 = vpop.f32.mrb[87].mxu0  ;;  %7296 = vmatmul.mubr.msk.f32.gmra.mrb[94].mxu1 %vm189_vm1, %v5181_v8 }
 0x93f   :  { %7330 = vmatprep.mubr.msk.f32.mxu1 %vm7960_vm5, %v7961_v1 }
 0x9df   :  { %v7288_v13 = vpop.f32.mrb[88].mxu1 }
 0x9e0   :  { %v5283_v35 = vpop.f32.mrb[89].mxu1 }
 0x9e1   :  { %7299 = vmatpush3.msra.mxu0 %v5283_v35 }
 0x9e2   :  { %7303 = vmatprep.subr.mxu0 %v7961_v1  ;;  %7301 = vmatmul.mubr.msk.f32.vlgmr.msra.gmra.mrb[88].mxu0 %vm979_vm2, %v33_v56 }
 0x9e3   :  { %7304 = vmatpush3.msra.mxu0 %v7288_v13  ;;  %7305 = vmatprep.mubr.msk.f32.mxu0 %vm7960_vm5, %v7961_v1 }
 0x9e4   :  { %7308 = vmatprep.subr.mxu0 %v7961_v1 }
 0x9e6   :  { %7306 = vmatmul.mubr.msk.f32.vlgmr.msra.gmra.mrb[90].mxu0 %vm979_vm2, %v34_v40 }
 0x9e7   :  { %7310 = vmatprep.mubr.msk.f32.mxu0 %vm7960_vm5, %v7961_v1 }
 0x9ef   :  { %v7291_v31 = vpop.f32.mrb[90].mxu1 }
 0x9f0   :  { %v5293_v20 = vpop.f32.mrb[91].mxu1 }
 0x9f1   :  { %7309 = vmatpush3.msra.mxu0 %v5293_v20 }
 0x9f2   :  { %7313 = vmatprep.subr.mxu0 %v7961_v1  ;;  %7311 = vmatmul.mubr.msk.f32.vlgmr.msra.gmra.mrb[92].mxu0 %vm979_vm2, %v35_v4 }
 0x9f3   :  { %7314 = vmatpush3.msra.mxu0 %v7291_v31  ;;  %7315 = vmatprep.mubr.msk.f32.mxu0 %vm7960_vm5, %v7961_v1 }
 0x9f4   :  { %7318 = vmatprep.subr.mxu0 %v7961_v1 }
 0x9f6   :  { %7316 = vmatmul.mubr.msk.f32.vlgmr.msra.gmra.mrb[94].mxu0 %vm979_vm2, %v36_v60 }
 0x9f7   :  { %7320 = vmatprep.mubr.msk.f32.mxu0 %vm7960_vm5, %v7961_v1 }
 0xa01   :  { %v7294_v47 = vpop.f32.mrb[92].mxu1 }
 0xa02   :  { %v5303_v21 = vpop.f32.mrb[93].mxu1 }
 0xa03   :  { %7319 = vmatpush3.msra.mxu0 %v5303_v21 }
 0xa04   :  { %7323 = vmatprep.subr.mxu0 %v7961_v1  ;;  %7321 = vmatmul.mubr.msk.f32.vlgmr.msra.gmra.mrb[96].mxu0 %vm979_vm2, %v37_v48 }
 0xa05   :  { %7324 = vmatpush3.msra.mxu0 %v7294_v47  ;;  %7325 = vmatprep.mubr.msk.f32.mxu0 %vm7960_vm5, %v7961_v1 }
 0xa06   :  { %7333 = vmatprep.subr.mxu0 %v7961_v1 }
 0xa08   :  { %7326 = vmatmul.mubr.msk.f32.vlgmr.msra.gmra.mrb[98].mxu0 %vm979_vm2, %v38_v54 }
 0xa09   :  { %7335 = vmatprep.mubr.msk.f32.mxu0 %vm7960_vm5, %v7961_v1 }
 0xa11   :  { %v7297_v6 = vpop.f32.mrb[94].mxu1 }
 0xa12   :  { %v5313_v14 = vpop.f32.mrb[95].mxu1  ;;  %7334 = vmatpush3.msra.mxu0 %v7297_v6 }
 0xa13   :  { %7329 = vmatpush3.msra.mxu1 %v5313_v14  ;;  %7336 = vmatmul.mubr.msk.f32.vlgmr.msra.gmra.mrb[100].mxu0 %vm979_vm2, %v40_v62 }
 0xa14   :  { %7331 = vmatmul.mubr.msk.f32.vlgmr.msra.gmra.mrb[96].mxu1 %vm979_vm2, %v39_v9  ;;  %vm6175_vm2 = vcmask 916480  }
 0xab5   :  { %v9667_v16 = vpop.f32.mrb[88].mxu0 }
 0xab6   :  { %v5906_v1 = vsel %vm51_vm0, %v9667_v16, 0.0  ;;  %v7302_v22 = vpop.f32.mrb[89].mxu0 }
 0xab7   :  { %v5907_v24 = vrot.slane %v5906_v1, 4 }
 0xab9   :  { %v5908_v25 = vadd.f32 %v5907_v24, %v5906_v1  ;;  %v9671_v43 = vpop.f32.mrb[90].mxu0 }
 0xaba   :  { %v5913_v10 = vsel %vm51_vm0, %v9671_v43, 0.0  ;;  %v7307_v27 = vpop.f32.mrb[91].mxu0 }
 0xabb   :  { %v5909_v18 = vrot.slane %v5908_v25, 2  ;;  %v5914_v42 = vrot.slane %v5913_v10, 4 }
 0xabd   :  { %v5910_v12 = vadd.f32 %v5909_v18, %v5908_v25  ;;  %v5915_v34 = vadd.f32 %v5914_v42, %v5913_v10 }
 0xabf   :  { %v5911_v17 = vrot.slane %v5910_v12, 1  ;;  %v5916_v63 = vrot.slane %v5915_v34, 2 }
 0xac1   :  { %v5912_v52 = vadd.f32 %v5911_v17, %v5910_v12  ;;  %v5917_v53 = vadd.f32 %v5916_v63, %v5915_v34 }
 0xac3   :  { %v5918_v44 = vrot.slane %v5917_v53, 1  ;;  %v5963_v51 = vmul.f32 0.125, %v5912_v52 }
 0xac5   :  { %v5919_v49 = vadd.f32 %v5918_v44, %v5917_v53  ;;  %v9675_v32 = vpop.f32.mrb[92].mxu0 }
 0xac6   :  { %v5920_v0 = vsel %vm51_vm0, %v9675_v32, 0.0  ;;  %v7312_v39 = vpop.f32.mrb[93].mxu0 }
 0xac7   :  { %v5964_v38 = vmul.f32 0.125, %v5919_v49  ;;  %v5921_v58 = vrot.slane %v5920_v0, 4  ;;  %v7962_v49 = vmov 1983009808   ;;  %v6007_v39 = vlaneseq }
 0xac9   :  { %v5980_v19 = vsel %vm5979_vm6, %v5964_v38, %v5963_v51  ;;  %v5922_v36 = vadd.f32 %v5921_v58, %v5920_v0  ;;  %v9679_v3 = vpop.f32.mrb[94].mxu0  ;;  %v6005_v0 = vunpack.c.l.s4 %v7962_v49  ;;  %v7963_v38 = vmov 1934713408  }
 0xaca   :  { %v5927_v46 = vsel %vm51_vm0, %v9679_v3, 0.0  ;;  %v7317_v2 = vpop.f32.mrb[95].mxu0  ;;  %v6069_v58 = vunpack.c.l.s4 %v7963_v38 }
 0xacb   :  { %v5923_v33 = vrot.slane %v5922_v36, 2  ;;  %v5928_v26 = vrot.slane %v5927_v46, 4  ;;  %v6006_v2 = vunpack.c.0.s8 %v6005_v0 }
 0xacd   :  { %v5924_v59 = vadd.f32 %v5923_v33, %v5922_v36  ;;  %v5929_v45 = vadd.f32 %v5928_v26, %v5927_v46  ;;  %v6008_v33 = vshrl.u32 %v6007_v39, 7  ;;  %v6070_v26 = vunpack.c.0.s8 %v6069_v58 }
 0xacf   :  { %v5925_v50 = vrot.slane %v5924_v59, 1  ;;  %v5930_v30 = vrot.slane %v5929_v45, 2 }
 0xad1   :  { %v5926_v57 = vadd.f32 %v5925_v50, %v5924_v59  ;;  %v5931_v41 = vadd.f32 %v5930_v30, %v5929_v45 }
 0xad3   :  { %v5965_v55 = vmul.f32 0.125, %v5926_v57  ;;  %v5932_v28 = vrot.slane %v5931_v41, 1  ;;  %v6009_v57 = vsub.s32 %v6006_v2, %v6008_v33 }
 0xad5   :  { %v5982_v15 = vsel %vm5981_vm7, %v5965_v55, %v5980_v19  ;;  %v5933_v5 = vadd.f32 %v5932_v28, %v5931_v41  ;;  %v6073_v41 = vsub.s32 %v6070_v26, %v6008_v33 }
 0xad7   :  { %v5966_v7 = vmul.f32 0.125, %v5933_v5  ;;  %v5683_v23 = vpop.f32.mrb[96].mxu0 }
 0xad8   :  { %v5934_v29 = vsel %vm51_vm0, %v5683_v23, 0.0  ;;  %v7322_v11 = vpop.f32.mrb[97].mxu0 }
 0xad9   :  { %v5984_v61 = vsel %vm5983_vm8, %v5966_v7, %v5982_v15  ;;  %v5935_v8 = vrot.slane %v5934_v29, 4 }
 0xadb   :  { %v5936_v37 = vadd.f32 %v5935_v8, %v5934_v29  ;;  %v5756_v13 = vpop.f32.mrb[98].mxu0 }
 0xadc   :  { %v5941_v56 = vsel %vm51_vm0, %v5756_v13, 0.0  ;;  %v7327_v35 = vpop.f32.mrb[99].mxu0 }
 0xadd   :  { %v5937_v40 = vrot.slane %v5936_v37, 2  ;;  %v5942_v31 = vrot.slane %v5941_v56, 4 }
 0xadf   :  { %v5938_v4 = vadd.f32 %v5937_v40, %v5936_v37  ;;  %v5943_v20 = vadd.f32 %v5942_v31, %v5941_v56 }
 0xae1   :  { %v5939_v60 = vrot.slane %v5938_v4, 1  ;;  %v5944_v47 = vrot.slane %v5943_v20, 2 }
 0xae3   :  { %v5940_v48 = vadd.f32 %v5939_v60, %v5938_v4  ;;  %v5945_v21 = vadd.f32 %v5944_v47, %v5943_v20 }
 0xae5   :  { %v5967_v54 = vmul.f32 0.125, %v5940_v48  ;;  %v5946_v62 = vrot.slane %v5945_v21, 1 }
 0xae6   :  { %v5902_v6 = vpop.f32.mrb[100].mxu0 }
 0xae7   :  { %v5986_v9 = vsel %vm5985_vm9, %v5967_v54, %v5984_v61  ;;  %v5947_v14 = vadd.f32 %v5946_v62, %v5945_v21  ;;  %v5829_v1 = vpop.f32.mrb[96].mxu1  ;;  %v5955_v22 = vsel %vm51_vm0, %v5902_v6, 0.0  ;;  %v7337_v24 = vpop.f32.mrb[101].mxu0 }
 0xae8   :  { %v5948_v25 = vsel %vm51_vm0, %v5829_v1, 0.0  ;;  %v5956_v10 = vrot.slane %v5955_v22, 4  ;;  %v7332_v27 = vpop.f32.mrb[97].mxu1 }
 0xae9   :  { %v5968_v18 = vmul.f32 0.125, %v5947_v14  ;;  %v5949_v42 = vrot.slane %v5948_v25, 4 }
 0xaea   :  { %v5957_v12 = vadd.f32 %v5956_v10, %v5955_v22 }
 0xaeb   :  { %v5988_v34 = vsel %vm5987_vm10, %v5968_v18, %v5986_v9  ;;  %v5950_v17 = vadd.f32 %v5949_v42, %v5948_v25 }
 0xaec   :  { %v5958_v63 = vrot.slane %v5957_v12, 2 }
 0xaed   :  { %v5951_v52 = vrot.slane %v5950_v17, 2 }
 0xaee   :  { %v5959_v53 = vadd.f32 %v5958_v63, %v5957_v12 }
 0xaef   :  { %v5952_v44 = vadd.f32 %v5951_v52, %v5950_v17 }
 0xaf0   :  { %v5960_v51 = vrot.slane %v5959_v53, 1 }
 0xaf1   :  { %v5953_v19 = vrot.slane %v5952_v44, 1 }
 0xaf2   :  { %v5961_v36 = vadd.f32 %v5960_v51, %v5959_v53 }
 0xaf3   :  { %v5954_v46 = vadd.f32 %v5953_v19, %v5952_v44 }
 0xaf4   :  { %v5970_v45 = vmul.f32 0.125, %v5961_v36 }
 0xaf5   :  { %v5969_v59 = vmul.f32 0.125, %v5954_v46 }
 0xaf7   :  { %v5990_v50 = vsel %vm5989_vm11, %v5969_v59, %v5988_v34 }
 0xaf8   :  { %v5992_v30 = vsel %vm5991_vm12, %v5970_v45, %v5990_v50 }
 0xaf9   :  { %v5998_v55 = vsub.f32 %v5683_v23, %v5992_v30  ;;  %v5999_v28 = vsub.f32 %v5756_v13, %v5992_v30  ;;  %v6000_v15 = vsub.f32 %v5829_v1, %v5992_v30  ;;  %v6001_v5 = vsub.f32 %v5902_v6, %v5992_v30 }
 0xafa   :  { %v5994_v7 = vsub.f32 %v9667_v16, %v5992_v30  ;;  %v5995_v29 = vsub.f32 %v9671_v43, %v5992_v30  ;;  %v5996_v11 = vsub.f32 %v9675_v32, %v5992_v30  ;;  %v5997_v61 = vsub.f32 %v9679_v3, %v5992_v30 }
 0xafb   :  { %v6034_v8 = vcombine.low %v5998_v55, %v6000_v15  ;;  %v6035_v37 = vcombine.high %v5998_v55, %v6000_v15  ;;  %v6050_v56 = vcombine.low %v5999_v28, %v6001_v5  ;;  %v6051_v35 = vcombine.high %v5999_v28, %v6001_v5 }
 0xafc   :  { %v6002_v40 = vcombine.low %v5994_v7, %v5996_v11  ;;  %v6018_v31 = vcombine.low %v5995_v29, %v5997_v61  ;;  %v6003_v4 = vcombine.high %v5994_v7, %v5996_v11  ;;  %v6019_v20 = vcombine.high %v5995_v29, %v5997_v61 }
 0xafd   :  { %v6042_v23 = vrot.slane %v6034_v8, %v6009_v57  ;;  %v6049_v13 = vrot.slane %v6035_v37, %v6009_v57  ;;  %v6058_v60 = vrot.slane %v6050_v56, %v6009_v57  ;;  %v6065_v47 = vrot.slane %v6051_v35, %v6009_v57 }
 0xafe   :  { %v6010_v48 = vrot.slane %v6002_v40, %v6009_v57  ;;  %v6026_v16 = vrot.slane %v6018_v31, %v6009_v57  ;;  %v6017_v21 = vrot.slane %v6003_v4, %v6009_v57  ;;  %v6033_v43 = vrot.slane %v6019_v20, %v6009_v57 }
 0xaff   :  { %v6098_v54 = vcombine.low %v6042_v23, %v6058_v60  ;;  %v6099_v32 = vcombine.high %v6042_v23, %v6058_v60  ;;  %v6114_v62 = vcombine.low %v6049_v13, %v6065_v47  ;;  %v6115_v3 = vcombine.high %v6049_v13, %v6065_v47 }
 0xb00   :  { %v6067_v6 = vcombine.high %v6010_v48, %v6026_v16  ;;  %v6066_v9 = vcombine.low %v6010_v48, %v6026_v16  ;;  %v6082_v14 = vcombine.low %v6017_v21, %v6033_v43  ;;  %v6083_v1 = vcombine.high %v6017_v21, %v6033_v43 }
 0xb01   :  { %v6113_v22 = vrot.slane %v6099_v32, %v6073_v41  ;;  %v6106_v24 = vrot.slane %v6098_v54, %v6073_v41  ;;  %v6122_v25 = vrot.slane %v6114_v62, %v6073_v41  ;;  %v6129_v10 = vrot.slane %v6115_v3, %v6073_v41 }
 0xb02   :  { %v6081_v27 = vrot.slane %v6067_v6, %v6073_v41  ;;  %v6074_v18 = vrot.slane %v6066_v9, %v6073_v41  ;;  %v6090_v42 = vrot.slane %v6082_v14, %v6073_v41  ;;  %v6097_v12 = vrot.slane %v6083_v1, %v6073_v41 }
 0xb04   :  { %v6132_v34 = vcombine.low %v6081_v27, %v6113_v22  ;;  %v6131_v17 = vcombine.high %v6074_v18, %v6106_v24  ;;  %v6133_v63 = vcombine.high %v6081_v27, %v6113_v22  ;;  %v6135_v52 = vcombine.high %v6090_v42, %v6122_v25 }
 0xb05   :  { %v6134_v53 = vcombine.low %v6090_v42, %v6122_v25  ;;  %v6137_v44 = vcombine.high %v6097_v12, %v6129_v10  ;;  %v6136_v51 = vcombine.low %v6097_v12, %v6129_v10  ;;  %v6130_v49 = vcombine.low %v6074_v18, %v6106_v24 }
 0xb06   :  { %6143 = vrot.lane.b32.xlu1 %v6132_v34, %s7964_s0  ;;  %6139 = vrot.lane.b32.xlu0 %v6131_v17, %s7965_s12 }
 0xb0a   :  { %6147 = vrot.lane.b32.xlu1 %v6133_v63, %s7966_s4  ;;  %6155 = vrot.lane.b32.xlu0 %v6135_v52, %s7967_s13 }
 0xb0e   :  { %6151 = vrot.lane.b32.xlu1 %v6134_v53, %s7968_s14  ;;  %6163 = vrot.lane.b32.xlu0 %v6137_v44, %s7969_s15 }
 0xb12   :  { %6159 = vrot.lane.b32.xlu1 %v6136_v51, %s7970_s5 }
 0xb78   :  { %v6144_v0 = vpop.permute.xlu1 %6143  ;;  %v6140_v39 = vpop.permute.xlu0 %6139 }
 0xb79   :  { %v6166_v38 = vsel %vm51_vm0, %v6130_v49, %v6140_v39 }
 0xb7a   :  { %v6167_v19 = vsel %vm1180_vm4, %v6166_v38, %v6144_v0 }
 0xb7c   :  { %v6148_v58 = vpop.permute.xlu1 %6147  ;;  %v6156_v36 = vpop.permute.xlu0 %6155 }
 0xb7d   :  { %v6169_v46 = vsel %vm6168_vm13, %v6167_v19, %v6148_v58 }
 0xb80   :  { %v6152_v2 = vpop.permute.xlu1 %6151  ;;  %v6164_v45 = vpop.permute.xlu0 %6163 }
 0xb81   :  { %v6170_v33 = vsel %vm189_vm1, %v6169_v46, %v6152_v2 }
 0xb82   :  { %v6172_v59 = vsel %vm6171_vm14, %v6170_v33, %v6156_v36 }
 0xb84   :  { %v6160_v26 = vpop.permute.xlu1 %6159 }
 0xb85   :  { %v6174_v50 = vsel %vm6173_vm15, %v6172_v59, %v6160_v26 }
 0xb86   :  { %v6176_v30 = vsel %vm6175_vm2, %v6174_v50, %v6164_v45 }
 0xb87   :  { %6177 = vst [vmem:[#allocation2] sm:$0xff] %v6176_v30 }
 0xb88   :  { %7946 = shalt.err (!%p7943_p4)
}
 0xb89   :  { %s7947_s20 = scalar_lea.hbm %s9715_s9, 128 }
 0xb8a   :  { %p7948_p5 = scmp.ne.s32.totalorder %s9715_s9, %s7947_s20  ;;  %p7951_p6 = scmp.lt.u32.totalorder %s7947_s20, %s9715_s9 }
 0xb8c   :  { %p7953_p7 = pnand %p7951_p6, %p7948_p5 }
 0xb8e   :  { %7956 = shalt.err (!%p7953_p7)
}
 0xb8f   :  { %6187 = dma.vmem_to_hbm [thread:$0]  %s6185_s17, 128, %s9715_s9, [#allocation3]  }
 0xb90   :  { %7957 = dma.done.wait [#allocation3], 128  }
 0xb91   :  { %7958 = vsyncadd [#allocation3], 4294967168 }
 0xb92   :  { %6191 = vsyncpa [#allocation3], 1 }

</bundles_post_ra>
